<compile_context>
chip_gen: v7x
topology: tpu7x:2x2x1
jax: 0.10.0
libtpu: 0.0.40
codegen_flags: <defaults>
</compile_context>

<pallas_src>
import jax
import jax.numpy as jnp
from jax import lax
from jax.experimental import pallas as pl
from jax.experimental.pallas import tpu as pltpu

K = 15
KK = K * K          # 225
PAD = K // 2        # 7


def _kpn_kernel(core_ref, fpad_ref, out_ref, acc_ref, s_ref):
    """One (batch, row-tile) block.

    core_ref: (1, KK, Th, W)      raw (pre-abs, pre-softmax) per-pixel kernels
    fpad_ref: (1, N, H+14, W+14)  full zero-padded frames for this batch element
    out_ref : (1, N, Th, W)       predicted image tile
    acc_ref : (N, Th, W) f32      VMEM accumulator (un-normalized weighted sum)
    s_ref   : (Th, W)    f32      VMEM softmax denominator
    """
    N = out_ref.shape[1]
    Th = out_ref.shape[2]
    W = out_ref.shape[3]
    r0 = pl.program_id(1) * Th       # first output row of this tile

    # ---- pass 1: per-pixel max of |core| (softmax stabilizer; |c| >= 0) ----
    def max_body(i, m):
        for j in range(K):                                        # static unroll
            c = jnp.abs(core_ref[0, i * K + j].astype(jnp.float32))
            m = jnp.maximum(m, c)
        return m

    m = lax.fori_loop(0, K, max_body, jnp.zeros((Th, W), jnp.float32))

    # ---- pass 2: taps-outer / frames-inner accumulation, norm folded out ----
    acc_ref[...] = jnp.zeros_like(acc_ref)
    s_ref[...] = jnp.zeros_like(s_ref)

    def tap_body(i, carry):
        for j in range(K):                                        # static column offset
            c = jnp.abs(core_ref[0, i * K + j].astype(jnp.float32))   # (Th, W)
            e = jnp.exp(c - m)                                        # (Th, W)  EUP
            s_ref[...] += e
            # shifted window: rows [r0+i, r0+i+Th), cols [j, j+W) of the padded frames
            win = fpad_ref[0, :, pl.ds(r0 + i, Th), pl.ds(j, W)]      # (N, Th, W)
            acc_ref[...] += win.astype(jnp.float32) * e[None, :, :]
        return carry

    lax.fori_loop(0, K, tap_body, 0)

    # single normalization per pixel (exact reciprocal -> matches reference numerics)
    inv_s = pl.reciprocal(s_ref[...])                                 # (Th, W)
    out_ref[0] = (acc_ref[...] * inv_s[None, :, :]).astype(out_ref.dtype)


def _pick_row_tile(H, W):
    """Largest row tile (divisor of H, multiple of 8 or == H) keeping the
    per-block core tile (KK*Th*W*4 bytes) <= ~2 MiB — v7x (64 MiB VMEM) safe
    even when double-buffered."""
    budget = 2 * 1024 * 1024
    if KK * H * W * 4 <= budget:
        return H
    for t in (128, 64, 32, 16, 8):
        if H % t == 0 and KK * t * W * 4 <= budget:
            return t
    return 8 if H % 8 == 0 else H
    # TODO(synk): for very wide images (W*8*225*4B > VMEM budget) add a column-tile
    # grid axis as well; row tiling alone is sufficient for typical KPN image widths.


def kernel_conv(frames, core):
    """JAX/Pallas equivalent of KernelConv.forward(frames, core).

    frames: (B, N, H, W) float32
    core:   (B, 225, H, W) float32
    returns [frames, pred] with pred following the PyTorch squeeze convention.
    """
    B, N, H, W = frames.shape
    assert core.shape == (B, KK, H, W), core.shape
    Hp, Wp = H + 2 * PAD, W + 2 * PAD

    # Cheap glue: zero-pad the frames only (no 225x stack materialization).
    fpad = jnp.pad(frames, ((0, 0), (0, 0), (PAD, PAD), (PAD, PAD)))

    Th = _pick_row_tile(H, W)
    nH = H // Th

    cost = pl.CostEstimate(
        flops=int(B * H * W * KK * (2 * N + 4)),          # VPU work (no MXU use)
        transcendentals=int(B * H * W * (KK + 1)),        # exp per tap + 1 recip
        bytes_accessed=int(4 * (B * KK * H * W + B * N * Hp * Wp + B * N * H * W)),
    )

    pred = pl.pallas_call(
        _kpn_kernel,
        out_shape=jax.ShapeDtypeStruct((B, N, H, W), frames.dtype),
        grid=(B, nH),
        in_specs=[
            # per-tile slice of the raw kernels
            pl.BlockSpec((1, KK, Th, W), lambda b, t: (b, 0, t, 0)),
            # full padded frames for this batch (small; same block across row tiles)
            pl.BlockSpec((1, N, Hp, Wp), lambda b, t: (b, 0, 0, 0)),
        ],
        out_specs=pl.BlockSpec((1, N, Th, W), lambda b, t: (b, 0, t, 0)),
        scratch_shapes=[
            pltpu.VMEM((N, Th, W), jnp.float32),   # accumulator
            pltpu.VMEM((Th, W), jnp.float32),      # softmax denominator
        ],
        compiler_params=pltpu.CompilerParams(
            dimension_semantics=("parallel", "parallel")),
        cost_estimate=cost,
    )(core, fpad)

    # Match PyTorch return convention: pred.squeeze() (unsqueeze(0) back when B == 1).
    if B == 1:
        pred_out = jnp.squeeze(pred)[None]
    else:
        pred_out = jnp.squeeze(pred)
    return [frames, pred_out]


def _reference(frames, core):
    """Pure-JAX re-implementation of the PyTorch forward for verification."""
    B, N, H, W = frames.shape
    w = jnp.abs(core).reshape(B, 1, KK, 1, H, W)
    w = jax.nn.softmax(w, axis=2)
    fpad = jnp.pad(frames.reshape(B, N, 1, H, W),
                   ((0, 0), (0, 0), (0, 0), (PAD, PAD), (PAD, PAD)))
    stack = jnp.stack(
        [fpad[..., i:i + H, j:j + W] for i in range(K) for j in range(K)], axis=2)
    pred = jnp.sum(w * stack, axis=2)        # (B, N, 1, H, W)
    return pred.squeeze(2)                   # (B, N, H, W)


if __name__ == "__main__":
    key = jax.random.PRNGKey(0)
    B, N, H, W = 2, 4, 16, 16
    k1, k2 = jax.random.split(key)
    frames = jax.random.normal(k1, (B, N, H, W), dtype=jnp.float32)
    core = jax.random.normal(k2, (B, KK, H, W), dtype=jnp.float32)

    outs = kernel_conv(frames, core)
    pred = jax.block_until_ready(outs[1])

    ref = jax.block_until_ready(_reference(frames, core))
    assert pred.shape == (B, N, H, W), pred.shape
    assert jnp.allclose(pred, ref, atol=1e-5, rtol=1e-5), \
        f"max abs err {jnp.max(jnp.abs(pred - ref))}"
    print("KERNEL_OK")
</pallas_src>

<mosaic_0001>
module attributes {stable_mosaic.version = 11 : i64} {
  func.func @_kpn_kernel(%arg0: i32, %arg1: i32, %arg2: memref<1x225x16x16xf32, #tpu.memory_space<vmem>>, %arg3: memref<1x4x30x30xf32, #tpu.memory_space<vmem>>, %arg4: memref<1x4x16x16xf32, #tpu.memory_space<vmem>>, %arg5: memref<4x16x16xf32, #tpu.memory_space<vmem>>, %arg6: memref<16x16xf32, #tpu.memory_space<vmem>>) attributes {dimension_semantics = [#tpu.dimension_semantics<parallel>, #tpu.dimension_semantics<parallel>], iteration_bounds = array<i64: 2, 1>, scalar_prefetch = 0 : i64, scratch_operands = 2 : i64, tpu.core_type = #tpu.core_type<tc>, window_params = [{transform_indices = @transform_0, window_bounds = array<i64: 1, 225, 16, 16>}, {transform_indices = @transform_1, window_bounds = array<i64: 1, 4, 30, 30>}, {transform_indices = @transform_2, window_bounds = array<i64: 1, 4, 16, 16>}]} {
    %c16_i32 = arith.constant 16 : i32
    %0 = arith.muli %arg1, %c16_i32 : i32
    %cst = arith.constant 0.000000e+00 : f32
    %1 = vector.broadcast %cst : f32 to vector<16x16xf32>
    %c0_i32 = arith.constant 0 : i32
    %c15_i32 = arith.constant 15 : i32
    %2 = arith.addi %c0_i32, %c15_i32 : i32
    %c1_i32 = arith.constant 1 : i32
    %3 = scf.for %arg7 = %c0_i32 to %2 step %c1_i32 iter_args(%arg8 = %1) -> (vector<16x16xf32>)  : i32 {
      %c15_i32_20 = arith.constant 15 : i32
      %18 = arith.muli %arg7, %c15_i32_20 : i32
      %c0_i32_21 = arith.constant 0 : i32
      %19 = arith.addi %18, %c0_i32_21 : i32
      %c0_22 = arith.constant 0 : index
      %20 = arith.index_cast %19 : i32 to index
      %c0_23 = arith.constant 0 : index
      %c0_24 = arith.constant 0 : index
      %21 = vector.load %arg2[%c0_22, %20, %c0_23, %c0_24] : memref<1x225x16x16xf32, #tpu.memory_space<vmem>>, vector<1x1x16x16xf32>
      %22 = vector.shape_cast %21 : vector<1x1x16x16xf32> to vector<16x16xf32>
      %23 = math.absf %22 : vector<16x16xf32>
      %24 = arith.maximumf %arg8, %23 : vector<16x16xf32>
      %c15_i32_25 = arith.constant 15 : i32
      %25 = arith.muli %arg7, %c15_i32_25 : i32
      %c1_i32_26 = arith.constant 1 : i32
      %26 = arith.addi %25, %c1_i32_26 : i32
      %c0_27 = arith.constant 0 : index
      %27 = arith.index_cast %26 : i32 to index
      %c0_28 = arith.constant 0 : index
      %c0_29 = arith.constant 0 : index
      %28 = vector.load %arg2[%c0_27, %27, %c0_28, %c0_29] : memref<1x225x16x16xf32, #tpu.memory_space<vmem>>, vector<1x1x16x16xf32>
      %29 = vector.shape_cast %28 : vector<1x1x16x16xf32> to vector<16x16xf32>
      %30 = math.absf %29 : vector<16x16xf32>
      %31 = arith.maximumf %24, %30 : vector<16x16xf32>
      %c15_i32_30 = arith.constant 15 : i32
      %32 = arith.muli %arg7, %c15_i32_30 : i32
      %c2_i32 = arith.constant 2 : i32
      %33 = arith.addi %32, %c2_i32 : i32
      %c0_31 = arith.constant 0 : index
      %34 = arith.index_cast %33 : i32 to index
      %c0_32 = arith.constant 0 : index
      %c0_33 = arith.constant 0 : index
      %35 = vector.load %arg2[%c0_31, %34, %c0_32, %c0_33] : memref<1x225x16x16xf32, #tpu.memory_space<vmem>>, vector<1x1x16x16xf32>
      %36 = vector.shape_cast %35 : vector<1x1x16x16xf32> to vector<16x16xf32>
      %37 = math.absf %36 : vector<16x16xf32>
      %38 = arith.maximumf %31, %37 : vector<16x16xf32>
      %c15_i32_34 = arith.constant 15 : i32
      %39 = arith.muli %arg7, %c15_i32_34 : i32
      %c3_i32 = arith.constant 3 : i32
      %40 = arith.addi %39, %c3_i32 : i32
      %c0_35 = arith.constant 0 : index
      %41 = arith.index_cast %40 : i32 to index
      %c0_36 = arith.constant 0 : index
      %c0_37 = arith.constant 0 : index
      %42 = vector.load %arg2[%c0_35, %41, %c0_36, %c0_37] : memref<1x225x16x16xf32, #tpu.memory_space<vmem>>, vector<1x1x16x16xf32>
      %43 = vector.shape_cast %42 : vector<1x1x16x16xf32> to vector<16x16xf32>
      %44 = math.absf %43 : vector<16x16xf32>
      %45 = arith.maximumf %38, %44 : vector<16x16xf32>
      %c15_i32_38 = arith.constant 15 : i32
      %46 = arith.muli %arg7, %c15_i32_38 : i32
      %c4_i32 = arith.constant 4 : i32
      %47 = arith.addi %46, %c4_i32 : i32
      %c0_39 = arith.constant 0 : index
      %48 = arith.index_cast %47 : i32 to index
      %c0_40 = arith.constant 0 : index
      %c0_41 = arith.constant 0 : index
      %49 = vector.load %arg2[%c0_39, %48, %c0_40, %c0_41] : memref<1x225x16x16xf32, #tpu.memory_space<vmem>>, vector<1x1x16x16xf32>
      %50 = vector.shape_cast %49 : vector<1x1x16x16xf32> to vector<16x16xf32>
      %51 = math.absf %50 : vector<16x16xf32>
      %52 = arith.maximumf %45, %51 : vector<16x16xf32>
      %c15_i32_42 = arith.constant 15 : i32
      %53 = arith.muli %arg7, %c15_i32_42 : i32
      %c5_i32 = arith.constant 5 : i32
      %54 = arith.addi %53, %c5_i32 : i32
      %c0_43 = arith.constant 0 : index
      %55 = arith.index_cast %54 : i32 to index
      %c0_44 = arith.constant 0 : index
      %c0_45 = arith.constant 0 : index
      %56 = vector.load %arg2[%c0_43, %55, %c0_44, %c0_45] : memref<1x225x16x16xf32, #tpu.memory_space<vmem>>, vector<1x1x16x16xf32>
      %57 = vector.shape_cast %56 : vector<1x1x16x16xf32> to vector<16x16xf32>
      %58 = math.absf %57 : vector<16x16xf32>
      %59 = arith.maximumf %52, %58 : vector<16x16xf32>
      %c15_i32_46 = arith.constant 15 : i32
      %60 = arith.muli %arg7, %c15_i32_46 : i32
      %c6_i32 = arith.constant 6 : i32
      %61 = arith.addi %60, %c6_i32 : i32
      %c0_47 = arith.constant 0 : index
      %62 = arith.index_cast %61 : i32 to index
      %c0_48 = arith.constant 0 : index
      %c0_49 = arith.constant 0 : index
      %63 = vector.load %arg2[%c0_47, %62, %c0_48, %c0_49] : memref<1x225x16x16xf32, #tpu.memory_space<vmem>>, vector<1x1x16x16xf32>
      %64 = vector.shape_cast %63 : vector<1x1x16x16xf32> to vector<16x16xf32>
      %65 = math.absf %64 : vector<16x16xf32>
      %66 = arith.maximumf %59, %65 : vector<16x16xf32>
      %c15_i32_50 = arith.constant 15 : i32
      %67 = arith.muli %arg7, %c15_i32_50 : i32
      %c7_i32 = arith.constant 7 : i32
      %68 = arith.addi %67, %c7_i32 : i32
      %c0_51 = arith.constant 0 : index
      %69 = arith.index_cast %68 : i32 to index
      %c0_52 = arith.constant 0 : index
      %c0_53 = arith.constant 0 : index
      %70 = vector.load %arg2[%c0_51, %69, %c0_52, %c0_53] : memref<1x225x16x16xf32, #tpu.memory_space<vmem>>, vector<1x1x16x16xf32>
      %71 = vector.shape_cast %70 : vector<1x1x16x16xf32> to vector<16x16xf32>
      %72 = math.absf %71 : vector<16x16xf32>
      %73 = arith.maximumf %66, %72 : vector<16x16xf32>
      %c15_i32_54 = arith.constant 15 : i32
      %74 = arith.muli %arg7, %c15_i32_54 : i32
      %c8_i32 = arith.constant 8 : i32
      %75 = arith.addi %74, %c8_i32 : i32
      %c0_55 = arith.constant 0 : index
      %76 = arith.index_cast %75 : i32 to index
      %c0_56 = arith.constant 0 : index
      %c0_57 = arith.constant 0 : index
      %77 = vector.load %arg2[%c0_55, %76, %c0_56, %c0_57] : memref<1x225x16x16xf32, #tpu.memory_space<vmem>>, vector<1x1x16x16xf32>
      %78 = vector.shape_cast %77 : vector<1x1x16x16xf32> to vector<16x16xf32>
      %79 = math.absf %78 : vector<16x16xf32>
      %80 = arith.maximumf %73, %79 : vector<16x16xf32>
      %c15_i32_58 = arith.constant 15 : i32
      %81 = arith.muli %arg7, %c15_i32_58 : i32
      %c9_i32 = arith.constant 9 : i32
      %82 = arith.addi %81, %c9_i32 : i32
      %c0_59 = arith.constant 0 : index
      %83 = arith.index_cast %82 : i32 to index
      %c0_60 = arith.constant 0 : index
      %c0_61 = arith.constant 0 : index
      %84 = vector.load %arg2[%c0_59, %83, %c0_60, %c0_61] : memref<1x225x16x16xf32, #tpu.memory_space<vmem>>, vector<1x1x16x16xf32>
      %85 = vector.shape_cast %84 : vector<1x1x16x16xf32> to vector<16x16xf32>
      %86 = math.absf %85 : vector<16x16xf32>
      %87 = arith.maximumf %80, %86 : vector<16x16xf32>
      %c15_i32_62 = arith.constant 15 : i32
      %88 = arith.muli %arg7, %c15_i32_62 : i32
      %c10_i32 = arith.constant 10 : i32
      %89 = arith.addi %88, %c10_i32 : i32
      %c0_63 = arith.constant 0 : index
      %90 = arith.index_cast %89 : i32 to index
      %c0_64 = arith.constant 0 : index
      %c0_65 = arith.constant 0 : index
      %91 = vector.load %arg2[%c0_63, %90, %c0_64, %c0_65] : memref<1x225x16x16xf32, #tpu.memory_space<vmem>>, vector<1x1x16x16xf32>
      %92 = vector.shape_cast %91 : vector<1x1x16x16xf32> to vector<16x16xf32>
      %93 = math.absf %92 : vector<16x16xf32>
      %94 = arith.maximumf %87, %93 : vector<16x16xf32>
      %c15_i32_66 = arith.constant 15 : i32
      %95 = arith.muli %arg7, %c15_i32_66 : i32
      %c11_i32 = arith.constant 11 : i32
      %96 = arith.addi %95, %c11_i32 : i32
      %c0_67 = arith.constant 0 : index
      %97 = arith.index_cast %96 : i32 to index
      %c0_68 = arith.constant 0 : index
      %c0_69 = arith.constant 0 : index
      %98 = vector.load %arg2[%c0_67, %97, %c0_68, %c0_69] : memref<1x225x16x16xf32, #tpu.memory_space<vmem>>, vector<1x1x16x16xf32>
      %99 = vector.shape_cast %98 : vector<1x1x16x16xf32> to vector<16x16xf32>
      %100 = math.absf %99 : vector<16x16xf32>
      %101 = arith.maximumf %94, %100 : vector<16x16xf32>
      %c15_i32_70 = arith.constant 15 : i32
      %102 = arith.muli %arg7, %c15_i32_70 : i32
      %c12_i32 = arith.constant 12 : i32
      %103 = arith.addi %102, %c12_i32 : i32
      %c0_71 = arith.constant 0 : index
      %104 = arith.index_cast %103 : i32 to index
      %c0_72 = arith.constant 0 : index
      %c0_73 = arith.constant 0 : index
      %105 = vector.load %arg2[%c0_71, %104, %c0_72, %c0_73] : memref<1x225x16x16xf32, #tpu.memory_space<vmem>>, vector<1x1x16x16xf32>
      %106 = vector.shape_cast %105 : vector<1x1x16x16xf32> to vector<16x16xf32>
      %107 = math.absf %106 : vector<16x16xf32>
      %108 = arith.maximumf %101, %107 : vector<16x16xf32>
      %c15_i32_74 = arith.constant 15 : i32
      %109 = arith.muli %arg7, %c15_i32_74 : i32
      %c13_i32 = arith.constant 13 : i32
      %110 = arith.addi %109, %c13_i32 : i32
      %c0_75 = arith.constant 0 : index
      %111 = arith.index_cast %110 : i32 to index
      %c0_76 = arith.constant 0 : index
      %c0_77 = arith.constant 0 : index
      %112 = vector.load %arg2[%c0_75, %111, %c0_76, %c0_77] : memref<1x225x16x16xf32, #tpu.memory_space<vmem>>, vector<1x1x16x16xf32>
      %113 = vector.shape_cast %112 : vector<1x1x16x16xf32> to vector<16x16xf32>
      %114 = math.absf %113 : vector<16x16xf32>
      %115 = arith.maximumf %108, %114 : vector<16x16xf32>
      %c15_i32_78 = arith.constant 15 : i32
      %116 = arith.muli %arg7, %c15_i32_78 : i32
      %c14_i32 = arith.constant 14 : i32
      %117 = arith.addi %116, %c14_i32 : i32
      %c0_79 = arith.constant 0 : index
      %118 = arith.index_cast %117 : i32 to index
      %c0_80 = arith.constant 0 : index
      %c0_81 = arith.constant 0 : index
      %119 = vector.load %arg2[%c0_79, %118, %c0_80, %c0_81] : memref<1x225x16x16xf32, #tpu.memory_space<vmem>>, vector<1x1x16x16xf32>
      %120 = vector.shape_cast %119 : vector<1x1x16x16xf32> to vector<16x16xf32>
      %121 = math.absf %120 : vector<16x16xf32>
      %122 = arith.maximumf %115, %121 : vector<16x16xf32>
      scf.yield %122 : vector<16x16xf32>
    }
    %c15_i32_0 = arith.constant 15 : i32
    %cst_1 = arith.constant 0.000000e+00 : f32
    %4 = vector.broadcast %cst_1 : f32 to vector<4x16x16xf32>
    %c0 = arith.constant 0 : index
    %c0_2 = arith.constant 0 : index
    %c0_3 = arith.constant 0 : index
    %5 = vector.load %arg5[%c0, %c0_2, %c0_3] : memref<4x16x16xf32, #tpu.memory_space<vmem>>, vector<4x16x16xf32>
    tpu.vector_store %arg5[%c0, %c0_2, %c0_3], %4 {strides = array<i32>} : memref<4x16x16xf32, #tpu.memory_space<vmem>>, vector<4x16x16xf32>,
    %cst_4 = arith.constant 0.000000e+00 : f32
    %6 = vector.broadcast %cst_4 : f32 to vector<16x16xf32>
    %c0_5 = arith.constant 0 : index
    %c0_6 = arith.constant 0 : index
    %7 = vector.load %arg6[%c0_5, %c0_6] : memref<16x16xf32, #tpu.memory_space<vmem>>, vector<16x16xf32>
    tpu.vector_store %arg6[%c0_5, %c0_6], %6 {strides = array<i32>} : memref<16x16xf32, #tpu.memory_space<vmem>>, vector<16x16xf32>,
    %c0_i32_7 = arith.constant 0 : i32
    %c15_i32_8 = arith.constant 15 : i32
    %8 = arith.addi %c0_i32_7, %c15_i32_8 : i32
    %c1_i32_9 = arith.constant 1 : i32
    scf.for %arg7 = %c0_i32_7 to %8 step %c1_i32_9  : i32 {
      %c15_i32_20 = arith.constant 15 : i32
      %18 = arith.muli %arg7, %c15_i32_20 : i32
      %c0_i32_21 = arith.constant 0 : i32
      %19 = arith.addi %18, %c0_i32_21 : i32
      %c0_22 = arith.constant 0 : index
      %20 = arith.index_cast %19 : i32 to index
      %c0_23 = arith.constant 0 : index
      %c0_24 = arith.constant 0 : index
      %21 = vector.load %arg2[%c0_22, %20, %c0_23, %c0_24] : memref<1x225x16x16xf32, #tpu.memory_space<vmem>>, vector<1x1x16x16xf32>
      %22 = vector.shape_cast %21 : vector<1x1x16x16xf32> to vector<16x16xf32>
      %23 = math.absf %22 : vector<16x16xf32>
      %24 = arith.subf %23, %3 : vector<16x16xf32>
      %25 = math.exp %24 : vector<16x16xf32>
      %c0_25 = arith.constant 0 : index
      %c0_26 = arith.constant 0 : index
      %26 = vector.load %arg6[%c0_25, %c0_26] : memref<16x16xf32, #tpu.memory_space<vmem>>, vector<16x16xf32>
      %27 = arith.addf %26, %25 : vector<16x16xf32>
      %c0_27 = arith.constant 0 : index
      %c0_28 = arith.constant 0 : index
      %28 = vector.load %arg6[%c0_27, %c0_28] : memref<16x16xf32, #tpu.memory_space<vmem>>, vector<16x16xf32>
      tpu.vector_store %arg6[%c0_27, %c0_28], %27 {strides = array<i32>} : memref<16x16xf32, #tpu.memory_space<vmem>>, vector<16x16xf32>,
      %29 = arith.addi %0, %arg7 : i32
      %c0_29 = arith.constant 0 : index
      %c0_30 = arith.constant 0 : index
      %30 = arith.index_cast %29 : i32 to index
      %c0_31 = arith.constant 0 : index
      %31 = vector.load %arg3[%c0_29, %c0_30, %30, %c0_31] : memref<1x4x30x30xf32, #tpu.memory_space<vmem>>, vector<1x4x16x16xf32>
      %32 = vector.shape_cast %31 : vector<1x4x16x16xf32> to vector<4x16x16xf32>
      %c0_32 = arith.constant 0 : index
      %c0_33 = arith.constant 0 : index
      %c0_34 = arith.constant 0 : index
      %33 = vector.load %arg5[%c0_32, %c0_33, %c0_34] : memref<4x16x16xf32, #tpu.memory_space<vmem>>, vector<4x16x16xf32>
      %34 = vector.shape_cast %25 : vector<16x16xf32> to vector<1x16x16xf32>
      %35 = vector.broadcast %34 : vector<1x16x16xf32> to vector<4x16x16xf32>
      %36 = arith.mulf %32, %35 : vector<4x16x16xf32>
      %37 = arith.addf %33, %36 : vector<4x16x16xf32>
      %c0_35 = arith.constant 0 : index
      %c0_36 = arith.constant 0 : index
      %c0_37 = arith.constant 0 : index
      %38 = vector.load %arg5[%c0_35, %c0_36, %c0_37] : memref<4x16x16xf32, #tpu.memory_space<vmem>>, vector<4x16x16xf32>
      tpu.vector_store %arg5[%c0_35, %c0_36, %c0_37], %37 {strides = array<i32>} : memref<4x16x16xf32, #tpu.memory_space<vmem>>, vector<4x16x16xf32>,
      %c15_i32_38 = arith.constant 15 : i32
      %39 = arith.muli %arg7, %c15_i32_38 : i32
      %c1_i32_39 = arith.constant 1 : i32
      %40 = arith.addi %39, %c1_i32_39 : i32
      %c0_40 = arith.constant 0 : index
      %41 = arith.index_cast %40 : i32 to index
      %c0_41 = arith.constant 0 : index
      %c0_42 = arith.constant 0 : index
      %42 = vector.load %arg2[%c0_40, %41, %c0_41, %c0_42] : memref<1x225x16x16xf32, #tpu.memory_space<vmem>>, vector<1x1x16x16xf32>
      %43 = vector.shape_cast %42 : vector<1x1x16x16xf32> to vector<16x16xf32>
      %44 = math.absf %43 : vector<16x16xf32>
      %45 = arith.subf %44, %3 : vector<16x16xf32>
      %46 = math.exp %45 : vector<16x16xf32>
      %c0_43 = arith.constant 0 : index
      %c0_44 = arith.constant 0 : index
      %47 = vector.load %arg6[%c0_43, %c0_44] : memref<16x16xf32, #tpu.memory_space<vmem>>, vector<16x16xf32>
      %48 = arith.addf %47, %46 : vector<16x16xf32>
      %c0_45 = arith.constant 0 : index
      %c0_46 = arith.constant 0 : index
      %49 = vector.load %arg6[%c0_45, %c0_46] : memref<16x16xf32, #tpu.memory_space<vmem>>, vector<16x16xf32>
      tpu.vector_store %arg6[%c0_45, %c0_46], %48 {strides = array<i32>} : memref<16x16xf32, #tpu.memory_space<vmem>>, vector<16x16xf32>,
      %50 = arith.addi %0, %arg7 : i32
      %c0_47 = arith.constant 0 : index
      %c0_48 = arith.constant 0 : index
      %51 = arith.index_cast %50 : i32 to index
      %c1 = arith.constant 1 : index
      %52 = vector.load %arg3[%c0_47, %c0_48, %51, %c1] : memref<1x4x30x30xf32, #tpu.memory_space<vmem>>, vector<1x4x16x16xf32>
      %53 = vector.shape_cast %52 : vector<1x4x16x16xf32> to vector<4x16x16xf32>
      %c0_49 = arith.constant 0 : index
      %c0_50 = arith.constant 0 : index
      %c0_51 = arith.constant 0 : index
      %54 = vector.load %arg5[%c0_49, %c0_50, %c0_51] : memref<4x16x16xf32, #tpu.memory_space<vmem>>, vector<4x16x16xf32>
      %55 = vector.shape_cast %46 : vector<16x16xf32> to vector<1x16x16xf32>
      %56 = vector.broadcast %55 : vector<1x16x16xf32> to vector<4x16x16xf32>
      %57 = arith.mulf %53, %56 : vector<4x16x16xf32>
      %58 = arith.addf %54, %57 : vector<4x16x16xf32>
      %c0_52 = arith.constant 0 : index
      %c0_53 = arith.constant 0 : index
      %c0_54 = arith.constant 0 : index
      %59 = vector.load %arg5[%c0_52, %c0_53, %c0_54] : memref<4x16x16xf32, #tpu.memory_space<vmem>>, vector<4x16x16xf32>
      tpu.vector_store %arg5[%c0_52, %c0_53, %c0_54], %58 {strides = array<i32>} : memref<4x16x16xf32, #tpu.memory_space<vmem>>, vector<4x16x16xf32>,
      %c15_i32_55 = arith.constant 15 : i32
      %60 = arith.muli %arg7, %c15_i32_55 : i32
      %c2_i32 = arith.constant 2 : i32
      %61 = arith.addi %60, %c2_i32 : i32
      %c0_56 = arith.constant 0 : index
      %62 = arith.index_cast %61 : i32 to index
      %c0_57 = arith.constant 0 : index
      %c0_58 = arith.constant 0 : index
      %63 = vector.load %arg2[%c0_56, %62, %c0_57, %c0_58] : memref<1x225x16x16xf32, #tpu.memory_space<vmem>>, vector<1x1x16x16xf32>
      %64 = vector.shape_cast %63 : vector<1x1x16x16xf32> to vector<16x16xf32>
      %65 = math.absf %64 : vector<16x16xf32>
      %66 = arith.subf %65, %3 : vector<16x16xf32>
      %67 = math.exp %66 : vector<16x16xf32>
      %c0_59 = arith.constant 0 : index
      %c0_60 = arith.constant 0 : index
      %68 = vector.load %arg6[%c0_59, %c0_60] : memref<16x16xf32, #tpu.memory_space<vmem>>, vector<16x16xf32>
      %69 = arith.addf %68, %67 : vector<16x16xf32>
      %c0_61 = arith.constant 0 : index
      %c0_62 = arith.constant 0 : index
      %70 = vector.load %arg6[%c0_61, %c0_62] : memref<16x16xf32, #tpu.memory_space<vmem>>, vector<16x16xf32>
      tpu.vector_store %arg6[%c0_61, %c0_62], %69 {strides = array<i32>} : memref<16x16xf32, #tpu.memory_space<vmem>>, vector<16x16xf32>,
      %71 = arith.addi %0, %arg7 : i32
      %c0_63 = arith.constant 0 : index
      %c0_64 = arith.constant 0 : index
      %72 = arith.index_cast %71 : i32 to index
      %c2 = arith.constant 2 : index
      %73 = vector.load %arg3[%c0_63, %c0_64, %72, %c2] : memref<1x4x30x30xf32, #tpu.memory_space<vmem>>, vector<1x4x16x16xf32>
      %74 = vector.shape_cast %73 : vector<1x4x16x16xf32> to vector<4x16x16xf32>
      %c0_65 = arith.constant 0 : index
      %c0_66 = arith.constant 0 : index
      %c0_67 = arith.constant 0 : index
      %75 = vector.load %arg5[%c0_65, %c0_66, %c0_67] : memref<4x16x16xf32, #tpu.memory_space<vmem>>, vector<4x16x16xf32>
      %76 = vector.shape_cast %67 : vector<16x16xf32> to vector<1x16x16xf32>
      %77 = vector.broadcast %76 : vector<1x16x16xf32> to vector<4x16x16xf32>
      %78 = arith.mulf %74, %77 : vector<4x16x16xf32>
      %79 = arith.addf %75, %78 : vector<4x16x16xf32>
      %c0_68 = arith.constant 0 : index
      %c0_69 = arith.constant 0 : index
      %c0_70 = arith.constant 0 : index
      %80 = vector.load %arg5[%c0_68, %c0_69, %c0_70] : memref<4x16x16xf32, #tpu.memory_space<vmem>>, vector<4x16x16xf32>
      tpu.vector_store %arg5[%c0_68, %c0_69, %c0_70], %79 {strides = array<i32>} : memref<4x16x16xf32, #tpu.memory_space<vmem>>, vector<4x16x16xf32>,
      %c15_i32_71 = arith.constant 15 : i32
      %81 = arith.muli %arg7, %c15_i32_71 : i32
      %c3_i32 = arith.constant 3 : i32
      %82 = arith.addi %81, %c3_i32 : i32
      %c0_72 = arith.constant 0 : index
      %83 = arith.index_cast %82 : i32 to index
      %c0_73 = arith.constant 0 : index
      %c0_74 = arith.constant 0 : index
      %84 = vector.load %arg2[%c0_72, %83, %c0_73, %c0_74] : memref<1x225x16x16xf32, #tpu.memory_space<vmem>>, vector<1x1x16x16xf32>
      %85 = vector.shape_cast %84 : vector<1x1x16x16xf32> to vector<16x16xf32>
      %86 = math.absf %85 : vector<16x16xf32>
      %87 = arith.subf %86, %3 : vector<16x16xf32>
      %88 = math.exp %87 : vector<16x16xf32>
      %c0_75 = arith.constant 0 : index
      %c0_76 = arith.constant 0 : index
      %89 = vector.load %arg6[%c0_75, %c0_76] : memref<16x16xf32, #tpu.memory_space<vmem>>, vector<16x16xf32>
      %90 = arith.addf %89, %88 : vector<16x16xf32>
      %c0_77 = arith.constant 0 : index
      %c0_78 = arith.constant 0 : index
      %91 = vector.load %arg6[%c0_77, %c0_78] : memref<16x16xf32, #tpu.memory_space<vmem>>, vector<16x16xf32>
      tpu.vector_store %arg6[%c0_77, %c0_78], %90 {strides = array<i32>} : memref<16x16xf32, #tpu.memory_space<vmem>>, vector<16x16xf32>,
      %92 = arith.addi %0, %arg7 : i32
      %c0_79 = arith.constant 0 : index
      %c0_80 = arith.constant 0 : index
      %93 = arith.index_cast %92 : i32 to index
      %c3 = arith.constant 3 : index
      %94 = vector.load %arg3[%c0_79, %c0_80, %93, %c3] : memref<1x4x30x30xf32, #tpu.memory_space<vmem>>, vector<1x4x16x16xf32>
      %95 = vector.shape_cast %94 : vector<1x4x16x16xf32> to vector<4x16x16xf32>
      %c0_81 = arith.constant 0 : index
      %c0_82 = arith.constant 0 : index
      %c0_83 = arith.constant 0 : index
      %96 = vector.load %arg5[%c0_81, %c0_82, %c0_83] : memref<4x16x16xf32, #tpu.memory_space<vmem>>, vector<4x16x16xf32>
      %97 = vector.shape_cast %88 : vector<16x16xf32> to vector<1x16x16xf32>
      %98 = vector.broadcast %97 : vector<1x16x16xf32> to vector<4x16x16xf32>
      %99 = arith.mulf %95, %98 : vector<4x16x16xf32>
      %100 = arith.addf %96, %99 : vector<4x16x16xf32>
      %c0_84 = arith.constant 0 : index
      %c0_85 = arith.constant 0 : index
      %c0_86 = arith.constant 0 : index
      %101 = vector.load %arg5[%c0_84, %c0_85, %c0_86] : memref<4x16x16xf32, #tpu.memory_space<vmem>>, vector<4x16x16xf32>
      tpu.vector_store %arg5[%c0_84, %c0_85, %c0_86], %100 {strides = array<i32>} : memref<4x16x16xf32, #tpu.memory_space<vmem>>, vector<4x16x16xf32>,
      %c15_i32_87 = arith.constant 15 : i32
      %102 = arith.muli %arg7, %c15_i32_87 : i32
      %c4_i32 = arith.constant 4 : i32
      %103 = arith.addi %102, %c4_i32 : i32
      %c0_88 = arith.constant 0 : index
      %104 = arith.index_cast %103 : i32 to index
      %c0_89 = arith.constant 0 : index
      %c0_90 = arith.constant 0 : index
      %105 = vector.load %arg2[%c0_88, %104, %c0_89, %c0_90] : memref<1x225x16x16xf32, #tpu.memory_space<vmem>>, vector<1x1x16x16xf32>
      %106 = vector.shape_cast %105 : vector<1x1x16x16xf32> to vector<16x16xf32>
      %107 = math.absf %106 : vector<16x16xf32>
      %108 = arith.subf %107, %3 : vector<16x16xf32>
      %109 = math.exp %108 : vector<16x16xf32>
      %c0_91 = arith.constant 0 : index
      %c0_92 = arith.constant 0 : index
      %110 = vector.load %arg6[%c0_91, %c0_92] : memref<16x16xf32, #tpu.memory_space<vmem>>, vector<16x16xf32>
      %111 = arith.addf %110, %109 : vector<16x16xf32>
      %c0_93 = arith.constant 0 : index
      %c0_94 = arith.constant 0 : index
      %112 = vector.load %arg6[%c0_93, %c0_94] : memref<16x16xf32, #tpu.memory_space<vmem>>, vector<16x16xf32>
      tpu.vector_store %arg6[%c0_93, %c0_94], %111 {strides = array<i32>} : memref<16x16xf32, #tpu.memory_space<vmem>>, vector<16x16xf32>,
      %113 = arith.addi %0, %arg7 : i32
      %c0_95 = arith.constant 0 : index
      %c0_96 = arith.constant 0 : index
      %114 = arith.index_cast %113 : i32 to index
      %c4 = arith.constant 4 : index
      %115 = vector.load %arg3[%c0_95, %c0_96, %114, %c4] : memref<1x4x30x30xf32, #tpu.memory_space<vmem>>, vector<1x4x16x16xf32>
      %116 = vector.shape_cast %115 : vector<1x4x16x16xf32> to vector<4x16x16xf32>
      %c0_97 = arith.constant 0 : index
      %c0_98 = arith.constant 0 : index
      %c0_99 = arith.constant 0 : index
      %117 = vector.load %arg5[%c0_97, %c0_98, %c0_99] : memref<4x16x16xf32, #tpu.memory_space<vmem>>, vector<4x16x16xf32>
      %118 = vector.shape_cast %109 : vector<16x16xf32> to vector<1x16x16xf32>
      %119 = vector.broadcast %118 : vector<1x16x16xf32> to vector<4x16x16xf32>
      %120 = arith.mulf %116, %119 : vector<4x16x16xf32>
      %121 = arith.addf %117, %120 : vector<4x16x16xf32>
      %c0_100 = arith.constant 0 : index
      %c0_101 = arith.constant 0 : index
      %c0_102 = arith.constant 0 : index
      %122 = vector.load %arg5[%c0_100, %c0_101, %c0_102] : memref<4x16x16xf32, #tpu.memory_space<vmem>>, vector<4x16x16xf32>
      tpu.vector_store %arg5[%c0_100, %c0_101, %c0_102], %121 {strides = array<i32>} : memref<4x16x16xf32, #tpu.memory_space<vmem>>, vector<4x16x16xf32>,
      %c15_i32_103 = arith.constant 15 : i32
      %123 = arith.muli %arg7, %c15_i32_103 : i32
      %c5_i32 = arith.constant 5 : i32
      %124 = arith.addi %123, %c5_i32 : i32
      %c0_104 = arith.constant 0 : index
      %125 = arith.index_cast %124 : i32 to index
      %c0_105 = arith.constant 0 : index
      %c0_106 = arith.constant 0 : index
      %126 = vector.load %arg2[%c0_104, %125, %c0_105, %c0_106] : memref<1x225x16x16xf32, #tpu.memory_space<vmem>>, vector<1x1x16x16xf32>
      %127 = vector.shape_cast %126 : vector<1x1x16x16xf32> to vector<16x16xf32>
      %128 = math.absf %127 : vector<16x16xf32>
      %129 = arith.subf %128, %3 : vector<16x16xf32>
      %130 = math.exp %129 : vector<16x16xf32>
      %c0_107 = arith.constant 0 : index
      %c0_108 = arith.constant 0 : index
      %131 = vector.load %arg6[%c0_107, %c0_108] : memref<16x16xf32, #tpu.memory_space<vmem>>, vector<16x16xf32>
      %132 = arith.addf %131, %130 : vector<16x16xf32>
      %c0_109 = arith.constant 0 : index
      %c0_110 = arith.constant 0 : index
      %133 = vector.load %arg6[%c0_109, %c0_110] : memref<16x16xf32, #tpu.memory_space<vmem>>, vector<16x16xf32>
      tpu.vector_store %arg6[%c0_109, %c0_110], %132 {strides = array<i32>} : memref<16x16xf32, #tpu.memory_space<vmem>>, vector<16x16xf32>,
      %134 = arith.addi %0, %arg7 : i32
      %c0_111 = arith.constant 0 : index
      %c0_112 = arith.constant 0 : index
      %135 = arith.index_cast %134 : i32 to index
      %c5 = arith.constant 5 : index
      %136 = vector.load %arg3[%c0_111, %c0_112, %135, %c5] : memref<1x4x30x30xf32, #tpu.memory_space<vmem>>, vector<1x4x16x16xf32>
      %137 = vector.shape_cast %136 : vector<1x4x16x16xf32> to vector<4x16x16xf32>
      %c0_113 = arith.constant 0 : index
      %c0_114 = arith.constant 0 : index
      %c0_115 = arith.constant 0 : index
      %138 = vector.load %arg5[%c0_113, %c0_114, %c0_115] : memref<4x16x16xf32, #tpu.memory_space<vmem>>, vector<4x16x16xf32>
      %139 = vector.shape_cast %130 : vector<16x16xf32> to vector<1x16x16xf32>
      %140 = vector.broadcast %139 : vector<1x16x16xf32> to vector<4x16x16xf32>
      %141 = arith.mulf %137, %140 : vector<4x16x16xf32>
      %142 = arith.addf %138, %141 : vector<4x16x16xf32>
      %c0_116 = arith.constant 0 : index
      %c0_117 = arith.constant 0 : index
      %c0_118 = arith.constant 0 : index
      %143 = vector.load %arg5[%c0_116, %c0_117, %c0_118] : memref<4x16x16xf32, #tpu.memory_space<vmem>>, vector<4x16x16xf32>
      tpu.vector_store %arg5[%c0_116, %c0_117, %c0_118], %142 {strides = array<i32>} : memref<4x16x16xf32, #tpu.memory_space<vmem>>, vector<4x16x16xf32>,
      %c15_i32_119 = arith.constant 15 : i32
      %144 = arith.muli %arg7, %c15_i32_119 : i32
      %c6_i32 = arith.constant 6 : i32
      %145 = arith.addi %144, %c6_i32 : i32
      %c0_120 = arith.constant 0 : index
      %146 = arith.index_cast %145 : i32 to index
      %c0_121 = arith.constant 0 : index
      %c0_122 = arith.constant 0 : index
      %147 = vector.load %arg2[%c0_120, %146, %c0_121, %c0_122] : memref<1x225x16x16xf32, #tpu.memory_space<vmem>>, vector<1x1x16x16xf32>
      %148 = vector.shape_cast %147 : vector<1x1x16x16xf32> to vector<16x16xf32>
      %149 = math.absf %148 : vector<16x16xf32>
      %150 = arith.subf %149, %3 : vector<16x16xf32>
      %151 = math.exp %150 : vector<16x16xf32>
      %c0_123 = arith.constant 0 : index
      %c0_124 = arith.constant 0 : index
      %152 = vector.load %arg6[%c0_123, %c0_124] : memref<16x16xf32, #tpu.memory_space<vmem>>, vector<16x16xf32>
      %153 = arith.addf %152, %151 : vector<16x16xf32>
      %c0_125 = arith.constant 0 : index
      %c0_126 = arith.constant 0 : index
      %154 = vector.load %arg6[%c0_125, %c0_126] : memref<16x16xf32, #tpu.memory_space<vmem>>, vector<16x16xf32>
      tpu.vector_store %arg6[%c0_125, %c0_126], %153 {strides = array<i32>} : memref<16x16xf32, #tpu.memory_space<vmem>>, vector<16x16xf32>,
      %155 = arith.addi %0, %arg7 : i32
      %c0_127 = arith.constant 0 : index
      %c0_128 = arith.constant 0 : index
      %156 = arith.index_cast %155 : i32 to index
      %c6 = arith.constant 6 : index
      %157 = vector.load %arg3[%c0_127, %c0_128, %156, %c6] : memref<1x4x30x30xf32, #tpu.memory_space<vmem>>, vector<1x4x16x16xf32>
      %158 = vector.shape_cast %157 : vector<1x4x16x16xf32> to vector<4x16x16xf32>
      %c0_129 = arith.constant 0 : index
      %c0_130 = arith.constant 0 : index
      %c0_131 = arith.constant 0 : index
      %159 = vector.load %arg5[%c0_129, %c0_130, %c0_131] : memref<4x16x16xf32, #tpu.memory_space<vmem>>, vector<4x16x16xf32>
      %160 = vector.shape_cast %151 : vector<16x16xf32> to vector<1x16x16xf32>
      %161 = vector.broadcast %160 : vector<1x16x16xf32> to vector<4x16x16xf32>
      %162 = arith.mulf %158, %161 : vector<4x16x16xf32>
      %163 = arith.addf %159, %162 : vector<4x16x16xf32>
      %c0_132 = arith.constant 0 : index
      %c0_133 = arith.constant 0 : index
      %c0_134 = arith.constant 0 : index
      %164 = vector.load %arg5[%c0_132, %c0_133, %c0_134] : memref<4x16x16xf32, #tpu.memory_space<vmem>>, vector<4x16x16xf32>
      tpu.vector_store %arg5[%c0_132, %c0_133, %c0_134], %163 {strides = array<i32>} : memref<4x16x16xf32, #tpu.memory_space<vmem>>, vector<4x16x16xf32>,
      %c15_i32_135 = arith.constant 15 : i32
      %165 = arith.muli %arg7, %c15_i32_135 : i32
      %c7_i32 = arith.constant 7 : i32
      %166 = arith.addi %165, %c7_i32 : i32
      %c0_136 = arith.constant 0 : index
      %167 = arith.index_cast %166 : i32 to index
      %c0_137 = arith.constant 0 : index
      %c0_138 = arith.constant 0 : index
      %168 = vector.load %arg2[%c0_136, %167, %c0_137, %c0_138] : memref<1x225x16x16xf32, #tpu.memory_space<vmem>>, vector<1x1x16x16xf32>
      %169 = vector.shape_cast %168 : vector<1x1x16x16xf32> to vector<16x16xf32>
      %170 = math.absf %169 : vector<16x16xf32>
      %171 = arith.subf %170, %3 : vector<16x16xf32>
      %172 = math.exp %171 : vector<16x16xf32>
      %c0_139 = arith.constant 0 : index
      %c0_140 = arith.constant 0 : index
      %173 = vector.load %arg6[%c0_139, %c0_140] : memref<16x16xf32, #tpu.memory_space<vmem>>, vector<16x16xf32>
      %174 = arith.addf %173, %172 : vector<16x16xf32>
      %c0_141 = arith.constant 0 : index
      %c0_142 = arith.constant 0 : index
      %175 = vector.load %arg6[%c0_141, %c0_142] : memref<16x16xf32, #tpu.memory_space<vmem>>, vector<16x16xf32>
      tpu.vector_store %arg6[%c0_141, %c0_142], %174 {strides = array<i32>} : memref<16x16xf32, #tpu.memory_space<vmem>>, vector<16x16xf32>,
      %176 = arith.addi %0, %arg7 : i32
      %c0_143 = arith.constant 0 : index
      %c0_144 = arith.constant 0 : index
      %177 = arith.index_cast %176 : i32 to index
      %c7 = arith.constant 7 : index
      %178 = vector.load %arg3[%c0_143, %c0_144, %177, %c7] : memref<1x4x30x30xf32, #tpu.memory_space<vmem>>, vector<1x4x16x16xf32>
      %179 = vector.shape_cast %178 : vector<1x4x16x16xf32> to vector<4x16x16xf32>
      %c0_145 = arith.constant 0 : index
      %c0_146 = arith.constant 0 : index
      %c0_147 = arith.constant 0 : index
      %180 = vector.load %arg5[%c0_145, %c0_146, %c0_147] : memref<4x16x16xf32, #tpu.memory_space<vmem>>, vector<4x16x16xf32>
      %181 = vector.shape_cast %172 : vector<16x16xf32> to vector<1x16x16xf32>
      %182 = vector.broadcast %181 : vector<1x16x16xf32> to vector<4x16x16xf32>
      %183 = arith.mulf %179, %182 : vector<4x16x16xf32>
      %184 = arith.addf %180, %183 : vector<4x16x16xf32>
      %c0_148 = arith.constant 0 : index
      %c0_149 = arith.constant 0 : index
      %c0_150 = arith.constant 0 : index
      %185 = vector.load %arg5[%c0_148, %c0_149, %c0_150] : memref<4x16x16xf32, #tpu.memory_space<vmem>>, vector<4x16x16xf32>
      tpu.vector_store %arg5[%c0_148, %c0_149, %c0_150], %184 {strides = array<i32>} : memref<4x16x16xf32, #tpu.memory_space<vmem>>, vector<4x16x16xf32>,
      %c15_i32_151 = arith.constant 15 : i32
      %186 = arith.muli %arg7, %c15_i32_151 : i32
      %c8_i32 = arith.constant 8 : i32
      %187 = arith.addi %186, %c8_i32 : i32
      %c0_152 = arith.constant 0 : index
      %188 = arith.index_cast %187 : i32 to index
      %c0_153 = arith.constant 0 : index
      %c0_154 = arith.constant 0 : index
      %189 = vector.load %arg2[%c0_152, %188, %c0_153, %c0_154] : memref<1x225x16x16xf32, #tpu.memory_space<vmem>>, vector<1x1x16x16xf32>
      %190 = vector.shape_cast %189 : vector<1x1x16x16xf32> to vector<16x16xf32>
      %191 = math.absf %190 : vector<16x16xf32>
      %192 = arith.subf %191, %3 : vector<16x16xf32>
      %193 = math.exp %192 : vector<16x16xf32>
      %c0_155 = arith.constant 0 : index
      %c0_156 = arith.constant 0 : index
      %194 = vector.load %arg6[%c0_155, %c0_156] : memref<16x16xf32, #tpu.memory_space<vmem>>, vector<16x16xf32>
      %195 = arith.addf %194, %193 : vector<16x16xf32>
      %c0_157 = arith.constant 0 : index
      %c0_158 = arith.constant 0 : index
      %196 = vector.load %arg6[%c0_157, %c0_158] : memref<16x16xf32, #tpu.memory_space<vmem>>, vector<16x16xf32>
      tpu.vector_store %arg6[%c0_157, %c0_158], %195 {strides = array<i32>} : memref<16x16xf32, #tpu.memory_space<vmem>>, vector<16x16xf32>,
      %197 = arith.addi %0, %arg7 : i32
      %c0_159 = arith.constant 0 : index
      %c0_160 = arith.constant 0 : index
      %198 = arith.index_cast %197 : i32 to index
      %c8 = arith.constant 8 : index
      %199 = vector.load %arg3[%c0_159, %c0_160, %198, %c8] : memref<1x4x30x30xf32, #tpu.memory_space<vmem>>, vector<1x4x16x16xf32>
      %200 = vector.shape_cast %199 : vector<1x4x16x16xf32> to vector<4x16x16xf32>
      %c0_161 = arith.constant 0 : index
      %c0_162 = arith.constant 0 : index
      %c0_163 = arith.constant 0 : index
      %201 = vector.load %arg5[%c0_161, %c0_162, %c0_163] : memref<4x16x16xf32, #tpu.memory_space<vmem>>, vector<4x16x16xf32>
      %202 = vector.shape_cast %193 : vector<16x16xf32> to vector<1x16x16xf32>
      %203 = vector.broadcast %202 : vector<1x16x16xf32> to vector<4x16x16xf32>
      %204 = arith.mulf %200, %203 : vector<4x16x16xf32>
      %205 = arith.addf %201, %204 : vector<4x16x16xf32>
      %c0_164 = arith.constant 0 : index
      %c0_165 = arith.constant 0 : index
      %c0_166 = arith.constant 0 : index
      %206 = vector.load %arg5[%c0_164, %c0_165, %c0_166] : memref<4x16x16xf32, #tpu.memory_space<vmem>>, vector<4x16x16xf32>
      tpu.vector_store %arg5[%c0_164, %c0_165, %c0_166], %205 {strides = array<i32>} : memref<4x16x16xf32, #tpu.memory_space<vmem>>, vector<4x16x16xf32>,
      %c15_i32_167 = arith.constant 15 : i32
      %207 = arith.muli %arg7, %c15_i32_167 : i32
      %c9_i32 = arith.constant 9 : i32
      %208 = arith.addi %207, %c9_i32 : i32
      %c0_168 = arith.constant 0 : index
      %209 = arith.index_cast %208 : i32 to index
      %c0_169 = arith.constant 0 : index
      %c0_170 = arith.constant 0 : index
      %210 = vector.load %arg2[%c0_168, %209, %c0_169, %c0_170] : memref<1x225x16x16xf32, #tpu.memory_space<vmem>>, vector<1x1x16x16xf32>
      %211 = vector.shape_cast %210 : vector<1x1x16x16xf32> to vector<16x16xf32>
      %212 = math.absf %211 : vector<16x16xf32>
      %213 = arith.subf %212, %3 : vector<16x16xf32>
      %214 = math.exp %213 : vector<16x16xf32>
      %c0_171 = arith.constant 0 : index
      %c0_172 = arith.constant 0 : index
      %215 = vector.load %arg6[%c0_171, %c0_172] : memref<16x16xf32, #tpu.memory_space<vmem>>, vector<16x16xf32>
      %216 = arith.addf %215, %214 : vector<16x16xf32>
      %c0_173 = arith.constant 0 : index
      %c0_174 = arith.constant 0 : index
      %217 = vector.load %arg6[%c0_173, %c0_174] : memref<16x16xf32, #tpu.memory_space<vmem>>, vector<16x16xf32>
      tpu.vector_store %arg6[%c0_173, %c0_174], %216 {strides = array<i32>} : memref<16x16xf32, #tpu.memory_space<vmem>>, vector<16x16xf32>,
      %218 = arith.addi %0, %arg7 : i32
      %c0_175 = arith.constant 0 : index
      %c0_176 = arith.constant 0 : index
      %219 = arith.index_cast %218 : i32 to index
      %c9 = arith.constant 9 : index
      %220 = vector.load %arg3[%c0_175, %c0_176, %219, %c9] : memref<1x4x30x30xf32, #tpu.memory_space<vmem>>, vector<1x4x16x16xf32>
      %221 = vector.shape_cast %220 : vector<1x4x16x16xf32> to vector<4x16x16xf32>
      %c0_177 = arith.constant 0 : index
      %c0_178 = arith.constant 0 : index
      %c0_179 = arith.constant 0 : index
      %222 = vector.load %arg5[%c0_177, %c0_178, %c0_179] : memref<4x16x16xf32, #tpu.memory_space<vmem>>, vector<4x16x16xf32>
      %223 = vector.shape_cast %214 : vector<16x16xf32> to vector<1x16x16xf32>
      %224 = vector.broadcast %223 : vector<1x16x16xf32> to vector<4x16x16xf32>
      %225 = arith.mulf %221, %224 : vector<4x16x16xf32>
      %226 = arith.addf %222, %225 : vector<4x16x16xf32>
      %c0_180 = arith.constant 0 : index
      %c0_181 = arith.constant 0 : index
      %c0_182 = arith.constant 0 : index
      %227 = vector.load %arg5[%c0_180, %c0_181, %c0_182] : memref<4x16x16xf32, #tpu.memory_space<vmem>>, vector<4x16x16xf32>
      tpu.vector_store %arg5[%c0_180, %c0_181, %c0_182], %226 {strides = array<i32>} : memref<4x16x16xf32, #tpu.memory_space<vmem>>, vector<4x16x16xf32>,
      %c15_i32_183 = arith.constant 15 : i32
      %228 = arith.muli %arg7, %c15_i32_183 : i32
      %c10_i32 = arith.constant 10 : i32
      %229 = arith.addi %228, %c10_i32 : i32
      %c0_184 = arith.constant 0 : index
      %230 = arith.index_cast %229 : i32 to index
      %c0_185 = arith.constant 0 : index
      %c0_186 = arith.constant 0 : index
      %231 = vector.load %arg2[%c0_184, %230, %c0_185, %c0_186] : memref<1x225x16x16xf32, #tpu.memory_space<vmem>>, vector<1x1x16x16xf32>
      %232 = vector.shape_cast %231 : vector<1x1x16x16xf32> to vector<16x16xf32>
      %233 = math.absf %232 : vector<16x16xf32>
      %234 = arith.subf %233, %3 : vector<16x16xf32>
      %235 = math.exp %234 : vector<16x16xf32>
      %c0_187 = arith.constant 0 : index
      %c0_188 = arith.constant 0 : index
      %236 = vector.load %arg6[%c0_187, %c0_188] : memref<16x16xf32, #tpu.memory_space<vmem>>, vector<16x16xf32>
      %237 = arith.addf %236, %235 : vector<16x16xf32>
      %c0_189 = arith.constant 0 : index
      %c0_190 = arith.constant 0 : index
      %238 = vector.load %arg6[%c0_189, %c0_190] : memref<16x16xf32, #tpu.memory_space<vmem>>, vector<16x16xf32>
      tpu.vector_store %arg6[%c0_189, %c0_190], %237 {strides = array<i32>} : memref<16x16xf32, #tpu.memory_space<vmem>>, vector<16x16xf32>,
      %239 = arith.addi %0, %arg7 : i32
      %c0_191 = arith.constant 0 : index
      %c0_192 = arith.constant 0 : index
      %240 = arith.index_cast %239 : i32 to index
      %c10 = arith.constant 10 : index
      %241 = vector.load %arg3[%c0_191, %c0_192, %240, %c10] : memref<1x4x30x30xf32, #tpu.memory_space<vmem>>, vector<1x4x16x16xf32>
      %242 = vector.shape_cast %241 : vector<1x4x16x16xf32> to vector<4x16x16xf32>
      %c0_193 = arith.constant 0 : index
      %c0_194 = arith.constant 0 : index
      %c0_195 = arith.constant 0 : index
      %243 = vector.load %arg5[%c0_193, %c0_194, %c0_195] : memref<4x16x16xf32, #tpu.memory_space<vmem>>, vector<4x16x16xf32>
      %244 = vector.shape_cast %235 : vector<16x16xf32> to vector<1x16x16xf32>
      %245 = vector.broadcast %244 : vector<1x16x16xf32> to vector<4x16x16xf32>
      %246 = arith.mulf %242, %245 : vector<4x16x16xf32>
      %247 = arith.addf %243, %246 : vector<4x16x16xf32>
      %c0_196 = arith.constant 0 : index
      %c0_197 = arith.constant 0 : index
      %c0_198 = arith.constant 0 : index
      %248 = vector.load %arg5[%c0_196, %c0_197, %c0_198] : memref<4x16x16xf32, #tpu.memory_space<vmem>>, vector<4x16x16xf32>
      tpu.vector_store %arg5[%c0_196, %c0_197, %c0_198], %247 {strides = array<i32>} : memref<4x16x16xf32, #tpu.memory_space<vmem>>, vector<4x16x16xf32>,
      %c15_i32_199 = arith.constant 15 : i32
      %249 = arith.muli %arg7, %c15_i32_199 : i32
      %c11_i32 = arith.constant 11 : i32
      %250 = arith.addi %249, %c11_i32 : i32
      %c0_200 = arith.constant 0 : index
      %251 = arith.index_cast %250 : i32 to index
      %c0_201 = arith.constant 0 : index
      %c0_202 = arith.constant 0 : index
      %252 = vector.load %arg2[%c0_200, %251, %c0_201, %c0_202] : memref<1x225x16x16xf32, #tpu.memory_space<vmem>>, vector<1x1x16x16xf32>
      %253 = vector.shape_cast %252 : vector<1x1x16x16xf32> to vector<16x16xf32>
      %254 = math.absf %253 : vector<16x16xf32>
      %255 = arith.subf %254, %3 : vector<16x16xf32>
      %256 = math.exp %255 : vector<16x16xf32>
      %c0_203 = arith.constant 0 : index
      %c0_204 = arith.constant 0 : index
      %257 = vector.load %arg6[%c0_203, %c0_204] : memref<16x16xf32, #tpu.memory_space<vmem>>, vector<16x16xf32>
      %258 = arith.addf %257, %256 : vector<16x16xf32>
      %c0_205 = arith.constant 0 : index
      %c0_206 = arith.constant 0 : index
      %259 = vector.load %arg6[%c0_205, %c0_206] : memref<16x16xf32, #tpu.memory_space<vmem>>, vector<16x16xf32>
      tpu.vector_store %arg6[%c0_205, %c0_206], %258 {strides = array<i32>} : memref<16x16xf32, #tpu.memory_space<vmem>>, vector<16x16xf32>,
      %260 = arith.addi %0, %arg7 : i32
      %c0_207 = arith.constant 0 : index
      %c0_208 = arith.constant 0 : index
      %261 = arith.index_cast %260 : i32 to index
      %c11 = arith.constant 11 : index
      %262 = vector.load %arg3[%c0_207, %c0_208, %261, %c11] : memref<1x4x30x30xf32, #tpu.memory_space<vmem>>, vector<1x4x16x16xf32>
      %263 = vector.shape_cast %262 : vector<1x4x16x16xf32> to vector<4x16x16xf32>
      %c0_209 = arith.constant 0 : index
      %c0_210 = arith.constant 0 : index
      %c0_211 = arith.constant 0 : index
      %264 = vector.load %arg5[%c0_209, %c0_210, %c0_211] : memref<4x16x16xf32, #tpu.memory_space<vmem>>, vector<4x16x16xf32>
      %265 = vector.shape_cast %256 : vector<16x16xf32> to vector<1x16x16xf32>
      %266 = vector.broadcast %265 : vector<1x16x16xf32> to vector<4x16x16xf32>
      %267 = arith.mulf %263, %266 : vector<4x16x16xf32>
      %268 = arith.addf %264, %267 : vector<4x16x16xf32>
      %c0_212 = arith.constant 0 : index
      %c0_213 = arith.constant 0 : index
      %c0_214 = arith.constant 0 : index
      %269 = vector.load %arg5[%c0_212, %c0_213, %c0_214] : memref<4x16x16xf32, #tpu.memory_space<vmem>>, vector<4x16x16xf32>
      tpu.vector_store %arg5[%c0_212, %c0_213, %c0_214], %268 {strides = array<i32>} : memref<4x16x16xf32, #tpu.memory_space<vmem>>, vector<4x16x16xf32>,
      %c15_i32_215 = arith.constant 15 : i32
      %270 = arith.muli %arg7, %c15_i32_215 : i32
      %c12_i32 = arith.constant 12 : i32
      %271 = arith.addi %270, %c12_i32 : i32
      %c0_216 = arith.constant 0 : index
      %272 = arith.index_cast %271 : i32 to index
      %c0_217 = arith.constant 0 : index
      %c0_218 = arith.constant 0 : index
      %273 = vector.load %arg2[%c0_216, %272, %c0_217, %c0_218] : memref<1x225x16x16xf32, #tpu.memory_space<vmem>>, vector<1x1x16x16xf32>
      %274 = vector.shape_cast %273 : vector<1x1x16x16xf32> to vector<16x16xf32>
      %275 = math.absf %274 : vector<16x16xf32>
      %276 = arith.subf %275, %3 : vector<16x16xf32>
      %277 = math.exp %276 : vector<16x16xf32>
      %c0_219 = arith.constant 0 : index
      %c0_220 = arith.constant 0 : index
      %278 = vector.load %arg6[%c0_219, %c0_220] : memref<16x16xf32, #tpu.memory_space<vmem>>, vector<16x16xf32>
      %279 = arith.addf %278, %277 : vector<16x16xf32>
      %c0_221 = arith.constant 0 : index
      %c0_222 = arith.constant 0 : index
      %280 = vector.load %arg6[%c0_221, %c0_222] : memref<16x16xf32, #tpu.memory_space<vmem>>, vector<16x16xf32>
      tpu.vector_store %arg6[%c0_221, %c0_222], %279 {strides = array<i32>} : memref<16x16xf32, #tpu.memory_space<vmem>>, vector<16x16xf32>,
      %281 = arith.addi %0, %arg7 : i32
      %c0_223 = arith.constant 0 : index
      %c0_224 = arith.constant 0 : index
      %282 = arith.index_cast %281 : i32 to index
      %c12 = arith.constant 12 : index
      %283 = vector.load %arg3[%c0_223, %c0_224, %282, %c12] : memref<1x4x30x30xf32, #tpu.memory_space<vmem>>, vector<1x4x16x16xf32>
      %284 = vector.shape_cast %283 : vector<1x4x16x16xf32> to vector<4x16x16xf32>
      %c0_225 = arith.constant 0 : index
      %c0_226 = arith.constant 0 : index
      %c0_227 = arith.constant 0 : index
      %285 = vector.load %arg5[%c0_225, %c0_226, %c0_227] : memref<4x16x16xf32, #tpu.memory_space<vmem>>, vector<4x16x16xf32>
      %286 = vector.shape_cast %277 : vector<16x16xf32> to vector<1x16x16xf32>
      %287 = vector.broadcast %286 : vector<1x16x16xf32> to vector<4x16x16xf32>
      %288 = arith.mulf %284, %287 : vector<4x16x16xf32>
      %289 = arith.addf %285, %288 : vector<4x16x16xf32>
      %c0_228 = arith.constant 0 : index
      %c0_229 = arith.constant 0 : index
      %c0_230 = arith.constant 0 : index
      %290 = vector.load %arg5[%c0_228, %c0_229, %c0_230] : memref<4x16x16xf32, #tpu.memory_space<vmem>>, vector<4x16x16xf32>
      tpu.vector_store %arg5[%c0_228, %c0_229, %c0_230], %289 {strides = array<i32>} : memref<4x16x16xf32, #tpu.memory_space<vmem>>, vector<4x16x16xf32>,
      %c15_i32_231 = arith.constant 15 : i32
      %291 = arith.muli %arg7, %c15_i32_231 : i32
      %c13_i32 = arith.constant 13 : i32
      %292 = arith.addi %291, %c13_i32 : i32
      %c0_232 = arith.constant 0 : index
      %293 = arith.index_cast %292 : i32 to index
      %c0_233 = arith.constant 0 : index
      %c0_234 = arith.constant 0 : index
      %294 = vector.load %arg2[%c0_232, %293, %c0_233, %c0_234] : memref<1x225x16x16xf32, #tpu.memory_space<vmem>>, vector<1x1x16x16xf32>
      %295 = vector.shape_cast %294 : vector<1x1x16x16xf32> to vector<16x16xf32>
      %296 = math.absf %295 : vector<16x16xf32>
      %297 = arith.subf %296, %3 : vector<16x16xf32>
      %298 = math.exp %297 : vector<16x16xf32>
      %c0_235 = arith.constant 0 : index
      %c0_236 = arith.constant 0 : index
      %299 = vector.load %arg6[%c0_235, %c0_236] : memref<16x16xf32, #tpu.memory_space<vmem>>, vector<16x16xf32>
      %300 = arith.addf %299, %298 : vector<16x16xf32>
      %c0_237 = arith.constant 0 : index
      %c0_238 = arith.constant 0 : index
      %301 = vector.load %arg6[%c0_237, %c0_238] : memref<16x16xf32, #tpu.memory_space<vmem>>, vector<16x16xf32>
      tpu.vector_store %arg6[%c0_237, %c0_238], %300 {strides = array<i32>} : memref<16x16xf32, #tpu.memory_space<vmem>>, vector<16x16xf32>,
      %302 = arith.addi %0, %arg7 : i32
      %c0_239 = arith.constant 0 : index
      %c0_240 = arith.constant 0 : index
      %303 = arith.index_cast %302 : i32 to index
      %c13 = arith.constant 13 : index
      %304 = vector.load %arg3[%c0_239, %c0_240, %303, %c13] : memref<1x4x30x30xf32, #tpu.memory_space<vmem>>, vector<1x4x16x16xf32>
      %305 = vector.shape_cast %304 : vector<1x4x16x16xf32> to vector<4x16x16xf32>
      %c0_241 = arith.constant 0 : index
      %c0_242 = arith.constant 0 : index
      %c0_243 = arith.constant 0 : index
      %306 = vector.load %arg5[%c0_241, %c0_242, %c0_243] : memref<4x16x16xf32, #tpu.memory_space<vmem>>, vector<4x16x16xf32>
      %307 = vector.shape_cast %298 : vector<16x16xf32> to vector<1x16x16xf32>
      %308 = vector.broadcast %307 : vector<1x16x16xf32> to vector<4x16x16xf32>
      %309 = arith.mulf %305, %308 : vector<4x16x16xf32>
      %310 = arith.addf %306, %309 : vector<4x16x16xf32>
      %c0_244 = arith.constant 0 : index
      %c0_245 = arith.constant 0 : index
      %c0_246 = arith.constant 0 : index
      %311 = vector.load %arg5[%c0_244, %c0_245, %c0_246] : memref<4x16x16xf32, #tpu.memory_space<vmem>>, vector<4x16x16xf32>
      tpu.vector_store %arg5[%c0_244, %c0_245, %c0_246], %310 {strides = array<i32>} : memref<4x16x16xf32, #tpu.memory_space<vmem>>, vector<4x16x16xf32>,
      %c15_i32_247 = arith.constant 15 : i32
      %312 = arith.muli %arg7, %c15_i32_247 : i32
      %c14_i32 = arith.constant 14 : i32
      %313 = arith.addi %312, %c14_i32 : i32
      %c0_248 = arith.constant 0 : index
      %314 = arith.index_cast %313 : i32 to index
      %c0_249 = arith.constant 0 : index
      %c0_250 = arith.constant 0 : index
      %315 = vector.load %arg2[%c0_248, %314, %c0_249, %c0_250] : memref<1x225x16x16xf32, #tpu.memory_space<vmem>>, vector<1x1x16x16xf32>
      %316 = vector.shape_cast %315 : vector<1x1x16x16xf32> to vector<16x16xf32>
      %317 = math.absf %316 : vector<16x16xf32>
      %318 = arith.subf %317, %3 : vector<16x16xf32>
      %319 = math.exp %318 : vector<16x16xf32>
      %c0_251 = arith.constant 0 : index
      %c0_252 = arith.constant 0 : index
      %320 = vector.load %arg6[%c0_251, %c0_252] : memref<16x16xf32, #tpu.memory_space<vmem>>, vector<16x16xf32>
      %321 = arith.addf %320, %319 : vector<16x16xf32>
      %c0_253 = arith.constant 0 : index
      %c0_254 = arith.constant 0 : index
      %322 = vector.load %arg6[%c0_253, %c0_254] : memref<16x16xf32, #tpu.memory_space<vmem>>, vector<16x16xf32>
      tpu.vector_store %arg6[%c0_253, %c0_254], %321 {strides = array<i32>} : memref<16x16xf32, #tpu.memory_space<vmem>>, vector<16x16xf32>,
      %323 = arith.addi %0, %arg7 : i32
      %c0_255 = arith.constant 0 : index
      %c0_256 = arith.constant 0 : index
      %324 = arith.index_cast %323 : i32 to index
      %c14 = arith.constant 14 : index
      %325 = vector.load %arg3[%c0_255, %c0_256, %324, %c14] : memref<1x4x30x30xf32, #tpu.memory_space<vmem>>, vector<1x4x16x16xf32>
      %326 = vector.shape_cast %325 : vector<1x4x16x16xf32> to vector<4x16x16xf32>
      %c0_257 = arith.constant 0 : index
      %c0_258 = arith.constant 0 : index
      %c0_259 = arith.constant 0 : index
      %327 = vector.load %arg5[%c0_257, %c0_258, %c0_259] : memref<4x16x16xf32, #tpu.memory_space<vmem>>, vector<4x16x16xf32>
      %328 = vector.shape_cast %319 : vector<16x16xf32> to vector<1x16x16xf32>
      %329 = vector.broadcast %328 : vector<1x16x16xf32> to vector<4x16x16xf32>
      %330 = arith.mulf %326, %329 : vector<4x16x16xf32>
      %331 = arith.addf %327, %330 : vector<4x16x16xf32>
      %c0_260 = arith.constant 0 : index
      %c0_261 = arith.constant 0 : index
      %c0_262 = arith.constant 0 : index
      %332 = vector.load %arg5[%c0_260, %c0_261, %c0_262] : memref<4x16x16xf32, #tpu.memory_space<vmem>>, vector<4x16x16xf32>
      tpu.vector_store %arg5[%c0_260, %c0_261, %c0_262], %331 {strides = array<i32>} : memref<4x16x16xf32, #tpu.memory_space<vmem>>, vector<4x16x16xf32>,
    }
    %c15_i32_10 = arith.constant 15 : i32
    %c0_11 = arith.constant 0 : index
    %c0_12 = arith.constant 0 : index
    %9 = vector.load %arg6[%c0_11, %c0_12] : memref<16x16xf32, #tpu.memory_space<vmem>>, vector<16x16xf32>
    %10 = tpu.reciprocal %9 : vector<16x16xf32> -> vector<16x16xf32>
    %c0_13 = arith.constant 0 : index
    %c0_14 = arith.constant 0 : index
    %c0_15 = arith.constant 0 : index
    %11 = vector.load %arg5[%c0_13, %c0_14, %c0_15] : memref<4x16x16xf32, #tpu.memory_space<vmem>>, vector<4x16x16xf32>
    %12 = vector.shape_cast %10 : vector<16x16xf32> to vector<1x16x16xf32>
    %13 = vector.broadcast %12 : vector<1x16x16xf32> to vector<4x16x16xf32>
    %14 = arith.mulf %11, %13 : vector<4x16x16xf32>
    %c0_16 = arith.constant 0 : index
    %c0_17 = arith.constant 0 : index
    %c0_18 = arith.constant 0 : index
    %c0_19 = arith.constant 0 : index
    %15 = vector.load %arg4[%c0_16, %c0_17, %c0_18, %c0_19] : memref<1x4x16x16xf32, #tpu.memory_space<vmem>>, vector<1x4x16x16xf32>
    %16 = vector.shape_cast %15 : vector<1x4x16x16xf32> to vector<4x16x16xf32>
    %17 = vector.shape_cast %14 : vector<4x16x16xf32> to vector<1x4x16x16xf32>
    tpu.vector_store %arg4[%c0_16, %c0_17, %c0_18, %c0_19], %17 {strides = array<i32>} : memref<1x4x16x16xf32, #tpu.memory_space<vmem>>, vector<1x4x16x16xf32>,
    return
  }
  func.func @transform_0(%arg0: i32, %arg1: i32) -> (i32, i32, i32, i32) {
    %c0_i32 = arith.constant 0 : i32
    %c0_i32_0 = arith.constant 0 : i32
    %c0_i32_1 = arith.constant 0 : i32
    return %arg0, %c0_i32, %arg1, %c0_i32_0 : i32, i32, i32, i32
  }
  func.func @transform_1(%arg0: i32, %arg1: i32) -> (i32, i32, i32, i32) {
    %c0_i32 = arith.constant 0 : i32
    %c0_i32_0 = arith.constant 0 : i32
    %c0_i32_1 = arith.constant 0 : i32
    %c0_i32_2 = arith.constant 0 : i32
    return %arg0, %c0_i32, %c0_i32_0, %c0_i32_1 : i32, i32, i32, i32
  }
  func.func @transform_2(%arg0: i32, %arg1: i32) -> (i32, i32, i32, i32) {
    %c0_i32 = arith.constant 0 : i32
    %c0_i32_0 = arith.constant 0 : i32
    %c0_i32_1 = arith.constant 0 : i32
    return %arg0, %c0_i32, %arg1, %c0_i32_0 : i32, i32, i32, i32
  }
}

</mosaic_0001>

<bundles_post_ra>
// kernel: tpu_custom_call.1
= control target key start
LH: loop header
LB: loop body
LE: loop exit
PB: predicated region body
PF: predicated region fallthrough
CT: control target
= control target key end

     0   :  { %7 = vsyncpa [#allocation5], 0  ;;  %s3364_s0 = inlined_call_operand.vmem [shape: f32[2,225,16,16], index: 0, kind: input, shape index: {}]   ;;  %s3365_s1 = inlined_call_operand.vmem [shape: f32[2,4,30,30], index: 1, kind: input, shape index: {}]   ;;  %s3366_s2 = inlined_call_operand.hbm [shape: f32[2,4,16,16], index: 2, kind: output, shape index: {}]  }
   0x1   :  { %9 = vsyncpa [#allocation5 + $0x1], 0  ;;  %s2515_s9 = smov 0   ;;  %s2517_s10 = smov 0  }
   0x2   :  { %s2519_s11 = smov 0   ;;  %s2521_s12 = smov 0  }
   0x3   :  { %s2523_s13 = smov 0   ;;  %s2525_s14 = smov 0  }
   0x4 LB: > { %s2071_s15 = sadd.s32 4294967295, %s2450_s14   ;;  %s2072_s16 = sadd.s32 4294967294, %s2450_s14   ;;  %s2450_s14 = sphi %s2525_s14, %s15_s14   ;;  %s2446_s13 = sphi %s2523_s13, %s3377_s13   ;;  %s2442_s12 = sphi %s2521_s12, %s3376_s12   ;;  %s2438_s11 = sphi %s2519_s11, %s3375_s11   ;;  %s2434_s10 = sphi %s2517_s10, %s3374_s10   ;;  %s2430_s9 = sphi %s2515_s9, %s3373_s9  }
   0x5   : > { %s27_s17 = sadd.s32 1, %s2446_s13  ;;  %s90_s18 = sadd.s32 1, %s2438_s11 }
   0x6   : > { %p29_p0 = scmp.ge.s32.totalorder %s27_s17, 2  ;;  %p100_p1 = scmp.ne.s32.totalorder %s2438_s11, %s2434_s10 }
   0x7   : > { %p101_p2 = scmp.eq.s32.totalorder %s2071_s15, 1  ;;  %p106_p3 = scmp.ne.s32.totalorder %s2434_s10, %s2430_s9 }
   0x8   : > { %s3379_s17 = smov (%p29_p0, %s27_s17), 0  ;;  %p107_p5 = scmp.eq.s32.totalorder %s2072_s16, 1 }
   0x9   : > { %p2555_p4 = por %p101_p2, %p100_p1  ;;  %s85_s20 = ssub.s32 %s2446_s13, %s3379_s17 }
   0xa   : > { %p2075_p6 = scmp.ge.s32.totalorder %s2450_s14, 1  ;;  %p88_p7 = scmp.eq.s32.totalorder %s85_s20, 0 }
   0xb   : > { %p2562_p8 = por %p107_p5, %p106_p3  ;;  %p146_p9 = scmp.lt.s32.totalorder %s2450_s14, 3 }
   0xc   : > { %s2568_s22 = scalar_select %p88_p7, %s2438_s11, %s90_s18  }
   0xd   : > { %p147_p10 = pnand %p2075_p6, %p146_p9 }
   0xe   : > { %s174_s23 = sand.u32 (!%p147_p10), 1, %s2434_s10   ;;  %p178_p11 = scmp.lt.s32.totalorder (!%p147_p10), %s2442_s12, 1  ;;  %v2587_v0 = vmov (!%p147_p10), 0.0   ;;  %v2589_v1 = vmov (!%p147_p10), 0.0  }
   0xf   : > { %150 = sbr.rel (%p147_p10) target bundleno = 610 (0x262), region = 28  ;;  %s2076_s24 = sshll.u32 (!%p147_p10), %s174_s23, 6 }
  0x10   : > { %s2585_s6 = scalar_lea.vmem (!%p147_p10), [#allocation4], %s2076_s24  ;;  %s2591_s7 = smov (!%p147_p10), 0  }
  0x16   : > { %s179_s25 = scalar_select %p178_p11, %s2442_s12, 1 }
  0x18   : > { %s2173_s26 = smul.u32 3600, %s179_s25  ;;  %s2171_s27 = sshll.u32 %s179_s25, 7 }
  0x19   : > { %s2578_s30 = scalar_lea.vmem %s3365_s1, %s2171_s27 }
  0x1a   : > { %s2583_s5 = scalar_lea.vmem %s3364_s0, %s2173_s26 }
  0x1b LB: >> { %s2080_s8 = smul.u32 240, %s2462_s7  ;;  %s199_s7 = sadd.s32 1, %s2462_s7   ;;  %s2462_s7 = sphi %s2591_s7, %s199_s7   ;;  %v2458_v1 = vphi %v2589_v1, %v3372_v1   ;;  %v2454_v0 = vphi %v2587_v0, %v3371_v0  }
  0x1c   : >> { %p196_p12 = scmp.ge.s32.totalorder %s199_s7, 15  }
  0x1d   : >> { %s2600_s15 = scalar_lea.vmem %s2583_s5, %s2080_s8  ;;  %vm337_vm0 = vcmask (%p196_p12), 130048   ;;  %s2655_s16 = smov (%p196_p12), 0  }
  0x1e   : >> { %v205_v2 = vld [vmem:[%s2600_s15] sm:$0xff]  ;;  %v206_v3 = vld [vmem:[%s2600_s15 + $0x8] sm:$0xff]  ;;  %v2082_v4 = vld [vmem:[%s2600_s15 + $0x10] sm:$0xff] }
  0x1f   : >> { %v207_v5 = vand.u32 2147483647, %v205_v2  ;;  %v208_v6 = vand.u32 2147483647, %v206_v3  ;;  %v2083_v7 = vld [vmem:[%s2600_s15 + $0x18] sm:$0xff]  ;;  %v2085_v8 = vld [vmem:[%s2600_s15 + $0x20] sm:$0xff] }
  0x20   : >> { %v216_v9 = vand.u32 2147483647, %v2082_v4  ;;  %v217_v10 = vand.u32 2147483647, %v2083_v7  ;;  %v2086_v11 = vld [vmem:[%s2600_s15 + $0x28] sm:$0xff]  ;;  %v2088_v12 = vld [vmem:[%s2600_s15 + $0x30] sm:$0xff] }
  0x21   : >> { %v209_v13 = vmax.f32 %v2458_v1, %v207_v5  ;;  %v210_v14 = vmax.f32 %v2454_v0, %v208_v6  ;;  %v225_v15 = vand.u32 2147483647, %v2085_v8  ;;  %v226_v16 = vand.u32 2147483647, %v2086_v11  ;;  %v2089_v17 = vld [vmem:[%s2600_s15 + $0x38] sm:$0xff]  ;;  %v2091_v18 = vld [vmem:[%s2600_s15 + $0x40] sm:$0xff] }
  0x22   : >> { %v2092_v19 = vld [vmem:[%s2600_s15 + $0x48] sm:$0xff]  ;;  %v234_v22 = vand.u32 2147483647, %v2088_v12  ;;  %v235_v23 = vand.u32 2147483647, %v2089_v17  ;;  %v2094_v24 = vld [vmem:[%s2600_s15 + $0x50] sm:$0xff] }
  0x23   : >> { %v218_v20 = vmax.f32 %v209_v13, %v216_v9  ;;  %v219_v21 = vmax.f32 %v210_v14, %v217_v10  ;;  %v2095_v25 = vld [vmem:[%s2600_s15 + $0x58] sm:$0xff]  ;;  %v243_v28 = vand.u32 2147483647, %v2091_v18  ;;  %v244_v29 = vand.u32 2147483647, %v2092_v19  ;;  %v2097_v30 = vld [vmem:[%s2600_s15 + $0x60] sm:$0xff] }
  0x24   : >> { %v2098_v31 = vld [vmem:[%s2600_s15 + $0x68] sm:$0xff]  ;;  %v252_v34 = vand.u32 2147483647, %v2094_v24  ;;  %v253_v35 = vand.u32 2147483647, %v2095_v25  ;;  %v2100_v36 = vld [vmem:[%s2600_s15 + $0x70] sm:$0xff] }
  0x25   : >> { %v227_v26 = vmax.f32 %v218_v20, %v225_v15  ;;  %v228_v27 = vmax.f32 %v219_v21, %v226_v16  ;;  %v2101_v37 = vld [vmem:[%s2600_s15 + $0x78] sm:$0xff]  ;;  %v261_v40 = vand.u32 2147483647, %v2097_v30  ;;  %v262_v41 = vand.u32 2147483647, %v2098_v31  ;;  %v2103_v42 = vld [vmem:[%s2600_s15 + $0x80] sm:$0xff] }
  0x26   : >> { %v2104_v43 = vld [vmem:[%s2600_s15 + $0x88] sm:$0xff]  ;;  %v270_v46 = vand.u32 2147483647, %v2100_v36  ;;  %v271_v47 = vand.u32 2147483647, %v2101_v37  ;;  %v2106_v48 = vld [vmem:[%s2600_s15 + $0x90] sm:$0xff] }
  0x27   : >> { %v236_v32 = vmax.f32 %v227_v26, %v234_v22  ;;  %v237_v33 = vmax.f32 %v228_v27, %v235_v23  ;;  %v2107_v49 = vld [vmem:[%s2600_s15 + $0x98] sm:$0xff]  ;;  %v279_v52 = vand.u32 2147483647, %v2103_v42  ;;  %v280_v53 = vand.u32 2147483647, %v2104_v43  ;;  %v2109_v54 = vld [vmem:[%s2600_s15 + $0xa0] sm:$0xff] }
  0x28   : >> { %v2110_v55 = vld [vmem:[%s2600_s15 + $0xa8] sm:$0xff]  ;;  %v288_v58 = vand.u32 2147483647, %v2106_v48  ;;  %v289_v59 = vand.u32 2147483647, %v2107_v49  ;;  %v2112_v60 = vld [vmem:[%s2600_s15 + $0xb0] sm:$0xff] }
  0x29   : >> { %v245_v38 = vmax.f32 %v236_v32, %v243_v28  ;;  %v246_v39 = vmax.f32 %v237_v33, %v244_v29  ;;  %v2113_v61 = vld [vmem:[%s2600_s15 + $0xb8] sm:$0xff]  ;;  %v297_v0 = vand.u32 2147483647, %v2109_v54  ;;  %v298_v1 = vand.u32 2147483647, %v2110_v55  ;;  %v2115_v2 = vld [vmem:[%s2600_s15 + $0xc0] sm:$0xff] }
  0x2a   : >> { %v2116_v3 = vld [vmem:[%s2600_s15 + $0xc8] sm:$0xff]  ;;  %v306_v6 = vand.u32 2147483647, %v2112_v60  ;;  %v307_v7 = vand.u32 2147483647, %v2113_v61  ;;  %v2118_v8 = vld [vmem:[%s2600_s15 + $0xd0] sm:$0xff] }
  0x2b   : >> { %v254_v44 = vmax.f32 %v245_v38, %v252_v34  ;;  %v255_v45 = vmax.f32 %v246_v39, %v253_v35  ;;  %v2119_v9 = vld [vmem:[%s2600_s15 + $0xd8] sm:$0xff]  ;;  %v315_v12 = vand.u32 2147483647, %v2115_v2  ;;  %v316_v13 = vand.u32 2147483647, %v2116_v3  ;;  %v2121_v14 = vld [vmem:[%s2600_s15 + $0xe0] sm:$0xff] }
  0x2c   : >> { %v2122_v15 = vld [vmem:[%s2600_s15 + $0xe8] sm:$0xff]  ;;  %v324_v18 = vand.u32 2147483647, %v2118_v8  ;;  %v325_v19 = vand.u32 2147483647, %v2119_v9  ;;  %v2468_v28 = vmov (%p196_p12), 0.0  }
  0x2d   : >> { %v263_v50 = vmax.f32 %v254_v44, %v261_v40  ;;  %v264_v51 = vmax.f32 %v255_v45, %v262_v41  ;;  %v333_v22 = vand.u32 2147483647, %v2121_v14  ;;  %v334_v23 = vand.u32 2147483647, %v2122_v15  ;;  %338 = vst.msk [vmem:[#allocation2] sm:$0xff] (%p196_p12), %vm337_vm0, %v2468_v28  ;;  %339 = vst.msk [vmem:[#allocation2 + $0x8] sm:$0xff] (%p196_p12), %vm337_vm0, %v2468_v28 }
  0x2e   : > { %340 = vst.msk [vmem:[#allocation2 + $0x10] sm:$0xff] (%p196_p12), %vm337_vm0, %v2468_v28  ;;  %341 = vst.msk [vmem:[#allocation2 + $0x18] sm:$0xff] (%p196_p12), %vm337_vm0, %v2468_v28 }
  0x2f   : >> { %v272_v56 = vmax.f32 %v263_v50, %v270_v46  ;;  %v273_v57 = vmax.f32 %v264_v51, %v271_v47  ;;  %342 = vst.msk [vmem:[#allocation2 + $0x20] sm:$0xff] (%p196_p12), %vm337_vm0, %v2468_v28  ;;  %343 = vst.msk [vmem:[#allocation2 + $0x28] sm:$0xff] (%p196_p12), %vm337_vm0, %v2468_v28 }
  0x30   : > { %344 = vst.msk [vmem:[#allocation2 + $0x30] sm:$0xff] (%p196_p12), %vm337_vm0, %v2468_v28  ;;  %345 = vst.msk [vmem:[#allocation2 + $0x38] sm:$0xff] (%p196_p12), %vm337_vm0, %v2468_v28 }
  0x31   : >> { %v281_v62 = vmax.f32 %v272_v56, %v279_v52  ;;  %v282_v63 = vmax.f32 %v273_v57, %v280_v53  ;;  %346 = vst.msk [vmem:[#allocation3] sm:$0xff] (%p196_p12), %vm337_vm0, %v2468_v28  ;;  %347 = vst.msk [vmem:[#allocation3 + $0x8] sm:$0xff] (%p196_p12), %vm337_vm0, %v2468_v28 }
  0x33   : >> { %v290_v4 = vmax.f32 %v281_v62, %v288_v58  ;;  %v291_v5 = vmax.f32 %v282_v63, %v289_v59 }
  0x35   : >> { %v299_v10 = vmax.f32 %v290_v4, %v297_v0  ;;  %v300_v11 = vmax.f32 %v291_v5, %v298_v1 }
  0x37   : >> { %v308_v16 = vmax.f32 %v299_v10, %v306_v6  ;;  %v309_v17 = vmax.f32 %v300_v11, %v307_v7 }
  0x39   : >> { %v317_v20 = vmax.f32 %v308_v16, %v315_v12  ;;  %v318_v21 = vmax.f32 %v309_v17, %v316_v13 }
  0x3a   : > { %198 = sbr.rel (!%p196_p12) target bundleno = 27 (0x1b), region = 111 }
  0x3b   : >> { %v326_v24 = vmax.f32 %v317_v20, %v324_v18  ;;  %v327_v25 = vmax.f32 %v318_v21, %v325_v19 }
  0x3d   : >> { %v2632_v1 = vmax.f32 %v326_v24, %v333_v22   ;;  %v2634_v0 = vmax.f32 %v327_v25, %v334_v23  }
  0x3f   : >> { %v3369_v26 = vmov %v2632_v1  ;;  %v3370_v27 = vmov %v2634_v0 }
  0x40   : >> { %v3371_v0 = vmov %v3370_v27  ;;  %v3372_v1 = vmov %v3369_v26 }
  0x41 LB: >> { %s2123_s18 = smul.u32 240, %s2466_s16  ;;  %v367_v13 = vld [vmem:[#allocation3] sm:$0xff]  ;;  %s2469_s24 = smov 1   ;;  %v368_v28 = vld [vmem:[#allocation3 + $0x8] sm:$0xff]  ;;  %s2466_s16 = sphi %s2655_s16, %s353_s16  }
  0x42   : >> { %s2470_s25 = smov 2   ;;  %s2471_s26 = smov 3  }
  0x43   : >> { %s2662_s20 = scalar_lea.vmem %s2583_s5, %s2123_s18  ;;  %s2472_s27 = smov 4  }
  0x44   : >> { %v2125_v29 = vld [vmem:[%s2662_s20 + $0x10] sm:$0xff]  ;;  %v357_v30 = vld [vmem:[%s2662_s20] sm:$0xff]  ;;  %v2126_v31 = vld [vmem:[%s2662_s20 + $0x18] sm:$0xff]  ;;  %s2473_s28 = smov 5   ;;  %s2474_s29 = smov 6  }
  0x45   : >> { %v420_v32 = vand.u32 2147483647, %v2125_v29  ;;  %v359_v33 = vand.u32 2147483647, %v357_v30  ;;  %v421_v34 = vand.u32 2147483647, %v2126_v31 }
  0x46   : >> { %v2128_v35 = vld [vmem:[%s2662_s20 + $0x20] sm:$0xff]  ;;  %v2129_v36 = vld [vmem:[%s2662_s20 + $0x28] sm:$0xff]  ;;  %v2131_v42 = vld [vmem:[%s2662_s20 + $0x30] sm:$0xff]  ;;  %s2475_s3 = smov 7   ;;  %s2476_s4 = smov 8  }
  0x47   : >> { %v358_v37 = vld [vmem:[%s2662_s20 + $0x8] sm:$0xff]  ;;  %v422_v38 = vsub.f32 %v420_v32, %v3369_v26  ;;  %v361_v39 = vsub.f32 %v359_v33, %v3369_v26  ;;  %v423_v40 = vsub.f32 %v421_v34, %v3370_v27  ;;  %v519_v41 = vand.u32 2147483647, %v2128_v35  ;;  %v2132_v43 = vld [vmem:[%s2662_s20 + $0x38] sm:$0xff]  ;;  %v2134_v44 = vld [vmem:[%s2662_s20 + $0x40] sm:$0xff]  ;;  %s2477_s7 = smov 9  }
  0x48   : >> { %v520_v45 = vand.u32 2147483647, %v2129_v36  ;;  %v360_v46 = vand.u32 2147483647, %v358_v37  ;;  %v618_v47 = vand.u32 2147483647, %v2131_v42 }
  0x49   : >> { %v424_v48 = vmul.f32 1.442695, %v422_v38  ;;  %v363_v49 = vmul.f32 1.442695, %v361_v39  ;;  %v426_v50 = vmul.f32 1.442695, %v423_v40  ;;  %v521_v51 = vsub.f32 %v519_v41, %v3369_v26 }
  0x4a   : >> { %v522_v52 = vsub.f32 %v520_v45, %v3370_v27  ;;  %v362_v53 = vsub.f32 %v360_v46, %v3370_v27  ;;  %v619_v54 = vand.u32 2147483647, %v2132_v43  ;;  %v2135_v55 = vld [vmem:[%s2662_s20 + $0x48] sm:$0xff]  ;;  %v620_v56 = vsub.f32 %v618_v47, %v3369_v26  ;;  %v2137_v58 = vld [vmem:[%s2662_s20 + $0x50] sm:$0xff]  ;;  %v2138_v1 = vld [vmem:[%s2662_s20 + $0x58] sm:$0xff]  ;;  %s2478_s8 = smov 10  }
  0x4b   : >> { %2292 = vpow2.f32 %v424_v48  ;;  %v718_v57 = vand.u32 2147483647, %v2135_v55  ;;  %v717_v61 = vand.u32 2147483647, %v2134_v44  ;;  %v523_v62 = vmul.f32 1.442695, %v521_v51 }
  0x4c   : >> { %2294 = vpow2.f32 %v363_v49  ;;  %v525_v59 = vmul.f32 1.442695, %v522_v52  ;;  %v365_v60 = vmul.f32 1.442695, %v362_v53  ;;  %v621_v63 = vsub.f32 %v619_v54, %v3370_v27  ;;  %v2141_v3 = vld [vmem:[%s2662_s20 + $0x68] sm:$0xff]  ;;  %v2140_v10 = vld [vmem:[%s2662_s20 + $0x60] sm:$0xff] }
  0x4d   : >> { %2296 = vpow2.f32 %v426_v50  ;;  %v720_v0 = vsub.f32 %v718_v57, %v3370_v27  ;;  %v816_v2 = vand.u32 2147483647, %v2137_v58  ;;  %v622_v5 = vmul.f32 1.442695, %v620_v56  ;;  %v2143_v12 = vld [vmem:[%s2662_s20 + $0x70] sm:$0xff]  ;;  %v2144_v21 = vld [vmem:[%s2662_s20 + $0x78] sm:$0xff] }
  0x4e   : >> { %2298 = vpow2.f32 %v525_v59  ;;  %v624_v4 = vmul.f32 1.442695, %v621_v63  ;;  %v719_v6 = vsub.f32 %v717_v61, %v3369_v26  ;;  %v817_v7 = vand.u32 2147483647, %v2138_v1  ;;  %v2147_v23 = vld [vmem:[%s2662_s20 + $0x88] sm:$0xff]  ;;  %v2146_v32 = vld [vmem:[%s2662_s20 + $0x80] sm:$0xff] }
  0x4f   : >> { %2300 = vpow2.f32 %v365_v60  ;;  %v723_v8 = vmul.f32 1.442695, %v720_v0  ;;  %v818_v9 = vsub.f32 %v816_v2, %v3369_v26  ;;  %v916_v11 = vand.u32 2147483647, %v2141_v3  ;;  %v2149_v37 = vld [vmem:[%s2662_s20 + $0x90] sm:$0xff]  ;;  %v2150_v48 = vld [vmem:[%s2662_s20 + $0x98] sm:$0xff] }
  0x50   : >> { %2302 = vpow2.f32 %v523_v62  ;;  %v721_v14 = vmul.f32 1.442695, %v719_v6  ;;  %v819_v15 = vsub.f32 %v817_v7, %v3370_v27  ;;  %v915_v16 = vand.u32 2147483647, %v2140_v10  ;;  %v2153_v50 = vld [vmem:[%s2662_s20 + $0xa8] sm:$0xff]  ;;  %v2152_v60 = vld [vmem:[%s2662_s20 + $0xa0] sm:$0xff] }
  0x51   : >> { %2304 = vpow2.f32 %v624_v4  ;;  %v820_v18 = vmul.f32 1.442695, %v818_v9  ;;  %v918_v19 = vsub.f32 %v916_v11, %v3370_v27  ;;  %v1014_v20 = vand.u32 2147483647, %v2143_v12  ;;  %v2155_v62 = vld [vmem:[%s2662_s20 + $0xb0] sm:$0xff]  ;;  %v2159_v10 = vld [vmem:[%s2662_s20 + $0xc8] sm:$0xff] }
  0x52   : >> { %2306 = vpow2.f32 %v622_v5  ;;  %v822_v29 = vmul.f32 1.442695, %v819_v15  ;;  %v917_v30 = vsub.f32 %v915_v16, %v3369_v26  ;;  %v1015_v31 = vand.u32 2147483647, %v2144_v21  ;;  %s2479_s15 = smov 11   ;;  %s2480_s18 = smov 12  }
  0x53   : >> { %2308 = vpow2.f32 %v723_v8  ;;  %v921_v34 = vmul.f32 1.442695, %v918_v19  ;;  %v1016_v35 = vsub.f32 %v1014_v20, %v3369_v26  ;;  %v1114_v36 = vand.u32 2147483647, %v2147_v23  ;;  %v2156_v8 = vld [vmem:[%s2662_s20 + $0xb8] sm:$0xff]  ;;  %v2158_v20 = vld [vmem:[%s2662_s20 + $0xc0] sm:$0xff] }
  0x54   : >> { %2310 = vpow2.f32 %v721_v14  ;;  %v1113_v41 = vand.u32 2147483647, %v2146_v32  ;;  %v919_v43 = vmul.f32 1.442695, %v917_v30  ;;  %v1017_v44 = vsub.f32 %v1015_v31, %v3370_v27 }
  0x55   : >> { %v2293_v17 = vpop.eup %2292  ;;  %2312 = vpow2.f32 %v820_v18  ;;  %v1212_v45 = vand.u32 2147483647, %v2149_v37  ;;  %v1018_v46 = vmul.f32 1.442695, %v1016_v35  ;;  %v1116_v47 = vsub.f32 %v1114_v36, %v3370_v27 }
  0x56   : >> { %v2693_v22 = vpop.eup %2294  ;;  %452 = vrot.lane.b32.xlu0 %v2293_v17, %s2469_s24  ;;  %2314 = vpow2.f32 %v822_v29  ;;  %v1115_v52 = vsub.f32 %v1113_v41, %v3369_v26  ;;  %v1020_v54 = vmul.f32 1.442695, %v1017_v44  ;;  %v1213_v56 = vand.u32 2147483647, %v2150_v48 }
  0x57   : >> { %v2297_v24 = vpop.eup %2296  ;;  %v369_v25 = vadd.f32 %v2693_v22, %v367_v13  ;;  %2316 = vpow2.f32 %v921_v34  ;;  %v1214_v55 = vsub.f32 %v1212_v45, %v3369_v26  ;;  %v1119_v58 = vmul.f32 1.442695, %v1116_v47 }
  0x58   : >> { %v2699_v33 = vpop.eup %2298  ;;  %2318 = vpow2.f32 %v919_v43  ;;  %v1312_v59 = vand.u32 2147483647, %v2153_v50  ;;  %v1117_v0 = vmul.f32 1.442695, %v1115_v52  ;;  %v1215_v3 = vsub.f32 %v1213_v56, %v3370_v27 }
  0x59   : >> { %371 = vst.msk [vmem:[#allocation3] sm:$0xff] %vm337_vm0, %v369_v25  ;;  %v2704_v38 = vpop.eup %2300  ;;  %553 = vrot.lane.b32.xlu1 %v2699_v33, %s2470_s25  ;;  %2320 = vpow2.f32 %v1018_v46  ;;  %v1216_v2 = vmul.f32 1.442695, %v1214_v55  ;;  %v1311_v4 = vand.u32 2147483647, %v2152_v60 }
  0x5a   : >> { %454 = vrot.lane.b32.xlu0 %v2297_v24, %s2469_s24  ;;  %v2707_v39 = vpop.eup %2302  ;;  %v370_v40 = vadd.f32 %v2704_v38, %v368_v28  ;;  %2322 = vpow2.f32 %v1020_v54  ;;  %v1314_v6 = vsub.f32 %v1312_v59, %v3370_v27  ;;  %v1410_v7 = vand.u32 2147483647, %v2155_v62  ;;  %s2818_s24 = scalar_lea.vmem %s2578_s30, %s2466_s16  ;;  %s353_s16 = sadd.s32 1, %s2466_s16  }
  0x5b   : >> { %v2710_v42 = vpop.eup %2304  ;;  %2324 = vpow2.f32 %v1119_v58  ;;  %v1218_v12 = vmul.f32 1.442695, %v1215_v3  ;;  %v1313_v13 = vsub.f32 %v1311_v4, %v3369_v26  ;;  %v1411_v14 = vand.u32 2147483647, %v2156_v8  ;;  %p350_p13 = scmp.ge.s32.totalorder %s353_s16, 15  }
  0x5c   : >> { %372 = vst.msk [vmem:[#allocation3 + $0x8] sm:$0xff] %vm337_vm0, %v370_v40  ;;  %v2716_v49 = vpop.eup %2306  ;;  %2326 = vpow2.f32 %v1117_v0  ;;  %v1317_v15 = vmul.f32 1.442695, %v1314_v6  ;;  %v1412_v16 = vsub.f32 %v1410_v7, %v3369_v26  ;;  %v1509_v30 = vand.u32 2147483647, %v2158_v20  ;;  %s3318_s16 = scalar_lea.sflag (%p350_p13), [#allocation5], %s174_s23 }
  0x5d   : >> { %652 = vrot.lane.b32.xlu1 %v2710_v42, %s2471_s26  ;;  %v2721_v51 = vpop.eup %2308  ;;  %2328 = vpow2.f32 %v1216_v2  ;;  %v1413_v25 = vsub.f32 %v1411_v14, %v3370_v27 }
  0x5e   : >> { %551 = vrot.lane.b32.xlu0 %v2707_v39, %s2470_s25  ;;  %v2726_v61 = vpop.eup %2310  ;;  %2330 = vpow2.f32 %v1218_v12  ;;  %v1414_v28 = vmul.f32 1.442695, %v1412_v16  ;;  %v2825_v12 = vld [vmem:[%s2818_s24] sm:$0xff]  ;;  %s2481_s25 = smov 127  }
  0x5f   : >> { %v2731_v63 = vpop.eup %2312  ;;  %2332 = vpow2.f32 %v1317_v15  ;;  %v1416_v36 = vmul.f32 1.442695, %v1413_v25  ;;  %v383_v16 = vld [vmem:[#allocation2] sm:$0xff] }
  0x60   : >> { %v428_v53 = vld [vmem:[#allocation3] sm:$0xff]  ;;  %v2737_v9 = vpop.eup %2314 }
  0x61   : >> { %v430_v57 = vadd.f32 %v2293_v17, %v428_v53  ;;  %751 = vrot.lane.b32.xlu1 %v2721_v51, %s2472_s27  ;;  %v2742_v11 = vpop.eup %2316  ;;  %v1510_v17 = vand.u32 2147483647, %v2159_v10 }
  0x62   : >> { %650 = vrot.lane.b32.xlu0 %v2716_v49, %s2471_s26  ;;  %v2747_v18 = vpop.eup %2318  ;;  %s2483_s26 = smov 125  }
  0x63   : >> { %432 = vst.msk [vmem:[#allocation3] sm:$0xff] %vm337_vm0, %v430_v57  ;;  %v429_v1 = vld [vmem:[#allocation3 + $0x8] sm:$0xff]  ;;  %v2752_v21 = vpop.eup %2320  ;;  %v1512_v29 = vsub.f32 %v1510_v17, %v3370_v27  ;;  %v385_v17 = vld [vmem:[#allocation2 + $0x10] sm:$0xff] }
  0x64   : >> { %v431_v5 = vadd.f32 %v2297_v24, %v429_v1  ;;  %v1315_v24 = vmul.f32 1.442695, %v1313_v13  ;;  %v2758_v31 = vpop.eup %2322  ;;  %v391_v13 = vmul.f32 %v2693_v22, %v2825_v12 }
  0x65   : >> { %848 = vrot.lane.b32.xlu1 %v2731_v63, %s2473_s28  ;;  %v2762_v34 = vpop.eup %2324  ;;  %v1515_v37 = vmul.f32 1.442695, %v1512_v29  ;;  %v387_v29 = vld [vmem:[#allocation2 + $0x20] sm:$0xff] }
  0x66   : >> { %749 = vrot.lane.b32.xlu0 %v2726_v61, %s2472_s27  ;;  %433 = vst.msk [vmem:[#allocation3 + $0x8] sm:$0xff] %vm337_vm0, %v431_v5  ;;  %2334 = vpow2.f32 %v1315_v24  ;;  %v2327_v40 = vpop.eup %2326  ;;  %s2484_s27 = smov 124  }
  0x67   : >> { %2336 = vpow2.f32 %v1414_v28  ;;  %v2769_v41 = vpop.eup %2328  ;;  %v384_v28 = vld [vmem:[#allocation2 + $0x8] sm:$0xff] }
  0x68   : >> { %2338 = vpow2.f32 %v1416_v36  ;;  %v2772_v45 = vpop.eup %2330 }
  0x69   : >> { %949 = vrot.lane.b32.xlu1 %v2742_v11, %s2474_s29  ;;  %2340 = vpow2.f32 %v1515_v37  ;;  %v2775_v46 = vpop.eup %2332 }
  0x6a   : >> { %v527_v19 = vld [vmem:[#allocation3] sm:$0xff]  ;;  %850 = vrot.lane.b32.xlu0 %v2737_v9, %s2473_s28  ;;  %s2485_s28 = smov 123  }
  0x6b   : >> { %v529_v23 = vadd.f32 %v2707_v39, %v527_v19  ;;  %v1511_v39 = vsub.f32 %v1509_v30, %v3369_v26  ;;  %v399_v19 = vadd.f32 %v391_v13, %v383_v16 }
  0x6d   : >> { %531 = vst.msk [vmem:[#allocation3] sm:$0xff] %vm337_vm0, %v529_v23  ;;  %v528_v32 = vld [vmem:[#allocation3 + $0x8] sm:$0xff]  ;;  %1046 = vrot.lane.b32.xlu1 %v2752_v21, %s2475_s3  ;;  %v1513_v44 = vmul.f32 1.442695, %v1511_v39  ;;  %407 = vst.msk [vmem:[#allocation2] sm:$0xff] %vm337_vm0, %v399_v19 }
  0x6e   : >> { %947 = vrot.lane.b32.xlu0 %v2747_v18, %s2474_s29  ;;  %v530_v35 = vadd.f32 %v2699_v33, %v528_v32  ;;  %v2837_v23 = vld [vmem:[%s2818_s24 + $0x8] sm:$0xff]  ;;  %s2486_s29 = smov 122  }
  0x6f   : >> { %2342 = vpow2.f32 %v1513_v44  ;;  %v392_v24 = vmul.f32 %v2704_v38, %v2837_v23 }
  0x70   : >> { %532 = vst.msk [vmem:[#allocation3 + $0x8] sm:$0xff] %vm337_vm0, %v530_v35  ;;  %v2779_v50 = vpop.eup %2334  ;;  %v2850_v35 = vld [vmem:[%s2818_s24 + $0x28] sm:$0xff] }
  0x71   : >> { %1147 = vrot.lane.b32.xlu1 %v2762_v34, %s2476_s4  ;;  %v400_v30 = vadd.f32 %v392_v24, %v384_v28  ;;  %v394_v37 = vmul.f32 %v2704_v38, %v2850_v35 }
  0x72   : >> { %1048 = vrot.lane.b32.xlu0 %v2758_v31, %s2475_s3  ;;  %s2487_s3 = smov 121  }
  0x73   : >> { %408 = vst.msk [vmem:[#allocation2 + $0x8] sm:$0xff] %vm337_vm0, %v400_v30 }
  0x74   : >> { %v626_v43 = vld [vmem:[#allocation3] sm:$0xff] }
  0x75   : >> { %v628_v33 = vadd.f32 %v2716_v49, %v626_v43  ;;  %1244 = vrot.lane.b32.xlu1 %v2769_v41, %s2477_s7  ;;  %v2783_v49 = vpop.eup %2336 }
  0x76   : >> { %1145 = vrot.lane.b32.xlu0 %v2327_v40, %s2476_s4  ;;  %v2786_v52 = vpop.eup %2338  ;;  %s2488_s4 = smov 13  }
  0x77   : >> { %630 = vst.msk [vmem:[#allocation3] sm:$0xff] %vm337_vm0, %v628_v33  ;;  %v627_v47 = vld [vmem:[#allocation3 + $0x8] sm:$0xff] }
  0x78   : >> { %v629_v48 = vadd.f32 %v2710_v42, %v627_v47  ;;  %v2790_v42 = vpop.eup %2340 }
  0x79   : >> { %1345 = vrot.lane.b32.xlu1 %v2775_v46, %s2478_s8  ;;  %v2796_v56 = vpop.eup %2342 }
  0x7a   : >> { %1246 = vrot.lane.b32.xlu0 %v2772_v45, %s2477_s7  ;;  %631 = vst.msk [vmem:[#allocation3 + $0x8] sm:$0xff] %vm337_vm0, %v629_v48  ;;  %v388_v48 = vld [vmem:[#allocation2 + $0x28] sm:$0xff]  ;;  %s2489_s7 = smov 120  }
  0x7d   : >> { %1442 = vrot.lane.b32.xlu1 %v2783_v49, %s2479_s15 }
  0x7e   : >> { %v725_v53 = vld [vmem:[#allocation3] sm:$0xff]  ;;  %1343 = vrot.lane.b32.xlu0 %v2779_v50, %s2478_s8  ;;  %s2490_s8 = smov 14  }
  0x7f   : >> { %v727_v54 = vadd.f32 %v2726_v61, %v725_v53 }
  0x81   : >> { %729 = vst.msk [vmem:[#allocation3] sm:$0xff] %vm337_vm0, %v727_v54  ;;  %v726_v55 = vld [vmem:[#allocation3 + $0x8] sm:$0xff]  ;;  %1543 = vrot.lane.b32.xlu1 %v2790_v42, %s2480_s18 }
  0x82   : >> { %1444 = vrot.lane.b32.xlu0 %v2786_v52, %s2479_s15  ;;  %v728_v57 = vadd.f32 %v2721_v51, %v726_v55  ;;  %v2871_v54 = vld [vmem:[%s2818_s24 + $0x68] sm:$0xff]  ;;  %s2491_s15 = smov 119  }
  0x83   : >> { %v398_v55 = vmul.f32 %v2704_v38, %v2871_v54 }
  0x84   : >> { %730 = vst.msk [vmem:[#allocation3 + $0x8] sm:$0xff] %vm337_vm0, %v728_v57 }
  0x86   : >> { %1541 = vrot.lane.b32.xlu0 %v2796_v56, %s2480_s18  ;;  %s2492_s18 = smov 118  }
  0x88   : >> { %v824_v58 = vld [vmem:[#allocation3] sm:$0xff] }
  0x89   : >> { %v826_v59 = vadd.f32 %v2731_v63, %v824_v58  ;;  %v390_v58 = vld [vmem:[#allocation2 + $0x38] sm:$0xff] }
  0x8b   : >> { %828 = vst.msk [vmem:[#allocation3] sm:$0xff] %vm337_vm0, %v826_v59  ;;  %v825_v60 = vld [vmem:[#allocation3 + $0x8] sm:$0xff] }
  0x8c   : >> { %v827_v61 = vadd.f32 %v2737_v9, %v825_v60  ;;  %v2162_v60 = vld [vmem:[%s2662_s20 + $0xd8] sm:$0xff] }
  0x8e   : >> { %829 = vst.msk [vmem:[#allocation3 + $0x8] sm:$0xff] %vm337_vm0, %v827_v61  ;;  %v406_v61 = vadd.f32 %v398_v55, %v390_v58 }
  0x90   : >> { %414 = vst.msk [vmem:[#allocation2 + $0x38] sm:$0xff] %vm337_vm0, %v406_v61 }
  0x92   : >> { %v923_v62 = vld [vmem:[#allocation3] sm:$0xff] }
  0x93   : >> { %v925_v0 = vadd.f32 %v2747_v18, %v923_v62 }
  0x95   : >> { %927 = vst.msk [vmem:[#allocation3] sm:$0xff] %vm337_vm0, %v925_v0  ;;  %v924_v51 = vld [vmem:[#allocation3 + $0x8] sm:$0xff] }
  0x96   : >> { %v926_v1 = vadd.f32 %v2742_v11, %v924_v51  ;;  %v2822_v11 = vld [vmem:[%s2818_s24 + $0x20] sm:$0xff] }
  0x97   : >> { %v393_v14 = vmul.f32 %v2693_v22, %v2822_v11 }
  0x98   : >> { %928 = vst.msk [vmem:[#allocation3 + $0x8] sm:$0xff] %vm337_vm0, %v926_v1  ;;  %v1609_v1 = vand.u32 2147483647, %v2162_v60 }
  0x99   : >> { %v401_v20 = vadd.f32 %v393_v14, %v385_v17  ;;  %v2165_v14 = vld [vmem:[%s2662_s20 + $0xe8] sm:$0xff] }
  0x9b   : >> { %409 = vst.msk [vmem:[#allocation2 + $0x10] sm:$0xff] %vm337_vm0, %v401_v20  ;;  %v1708_v20 = vand.u32 2147483647, %v2165_v14 }
  0x9c   : >> { %v1022_v63 = vld [vmem:[#allocation3] sm:$0xff] }
  0x9d   : >> { %v1024_v2 = vadd.f32 %v2752_v21, %v1022_v63  ;;  %v2834_v21 = vld [vmem:[%s2818_s24 + $0x40] sm:$0xff]  ;;  %v1710_v28 = vsub.f32 %v1708_v20, %v3370_v27 }
  0x9e   : >> { %v395_v25 = vmul.f32 %v2693_v22, %v2834_v21 }
  0x9f   : >> { %1026 = vst.msk [vmem:[#allocation3] sm:$0xff] %vm337_vm0, %v1024_v2  ;;  %v1023_v3 = vld [vmem:[#allocation3 + $0x8] sm:$0xff] }
  0xa0   : >> { %v1025_v4 = vadd.f32 %v2758_v31, %v1023_v3  ;;  %v403_v31 = vadd.f32 %v395_v25, %v387_v29 }
  0xa2   : >> { %1027 = vst.msk [vmem:[#allocation3 + $0x8] sm:$0xff] %vm337_vm0, %v1025_v4  ;;  %411 = vst.msk [vmem:[#allocation2 + $0x20] sm:$0xff] %vm337_vm0, %v403_v31 }
  0xa6   : >> { %v1121_v5 = vld [vmem:[#allocation3] sm:$0xff] }
  0xa7   : >> { %v1123_v6 = vadd.f32 %v2327_v40, %v1121_v5  ;;  %v386_v40 = vld [vmem:[#allocation2 + $0x18] sm:$0xff]  ;;  %v1611_v5 = vsub.f32 %v1609_v1, %v3370_v27 }
  0xa8   : >> { %v402_v43 = vadd.f32 %v394_v37, %v386_v40  ;;  %v1713_v40 = vmul.f32 1.442695, %v1710_v28 }
  0xa9   : >> { %1125 = vst.msk [vmem:[#allocation3] sm:$0xff] %vm337_vm0, %v1123_v6  ;;  %v1122_v7 = vld [vmem:[#allocation3 + $0x8] sm:$0xff]  ;;  %v1614_v13 = vmul.f32 1.442695, %v1611_v5 }
  0xaa   : >> { %v1124_v8 = vadd.f32 %v2762_v34, %v1122_v7  ;;  %v2847_v34 = vld [vmem:[%s2818_s24 + $0x60] sm:$0xff]  ;;  %410 = vst.msk [vmem:[#allocation2 + $0x18] sm:$0xff] %vm337_vm0, %v402_v43 }
  0xab   : >> { %v397_v39 = vmul.f32 %v2693_v22, %v2847_v34 }
  0xac   : >> { %1126 = vst.msk [vmem:[#allocation3 + $0x8] sm:$0xff] %vm337_vm0, %v1124_v8 }
  0xb0   : >> { %v1220_v9 = vld [vmem:[#allocation3] sm:$0xff] }
  0xb1   : >> { %v1222_v10 = vadd.f32 %v2769_v41, %v1220_v9  ;;  %v389_v41 = vld [vmem:[#allocation2 + $0x30] sm:$0xff] }
  0xb2   : >> { %v405_v33 = vadd.f32 %v397_v39, %v389_v41 }
  0xb3   : >> { %1224 = vst.msk [vmem:[#allocation3] sm:$0xff] %vm337_vm0, %v1222_v10  ;;  %v1221_v15 = vld [vmem:[#allocation3 + $0x8] sm:$0xff] }
  0xb4   : >> { %v1223_v18 = vadd.f32 %v2772_v45, %v1221_v15  ;;  %v2861_v45 = vld [vmem:[%s2818_s24 + $0x48] sm:$0xff]  ;;  %413 = vst.msk [vmem:[#allocation2 + $0x30] sm:$0xff] %vm337_vm0, %v405_v33 }
  0xb5   : >> { %v396_v22 = vmul.f32 %v2704_v38, %v2861_v45 }
  0xb6   : >> { %1225 = vst.msk [vmem:[#allocation3 + $0x8] sm:$0xff] %vm337_vm0, %v1223_v18 }
  0xb7   : >> { %v404_v53 = vadd.f32 %v396_v22, %v388_v48 }
  0xb9   : >> { %412 = vst.msk [vmem:[#allocation2 + $0x28] sm:$0xff] %vm337_vm0, %v404_v53 }
  0xba   : >> { %v1319_v32 = vld [vmem:[#allocation3] sm:$0xff] }
  0xbb   : >> { %v1321_v36 = vadd.f32 %v2779_v50, %v1319_v32  ;;  %v2161_v50 = vld [vmem:[%s2662_s20 + $0xd0] sm:$0xff] }
  0xbc   : >> { %v1608_v57 = vand.u32 2147483647, %v2161_v50 }
  0xbd   : >> { %1323 = vst.msk [vmem:[#allocation3] sm:$0xff] %vm337_vm0, %v1321_v36  ;;  %v1320_v44 = vld [vmem:[#allocation3 + $0x8] sm:$0xff] }
  0xbe   : >> { %v1322_v47 = vadd.f32 %v2775_v46, %v1320_v44  ;;  %v1610_v51 = vsub.f32 %v1608_v57, %v3369_v26 }
  0xc0   : >> { %1324 = vst.msk [vmem:[#allocation3 + $0x8] sm:$0xff] %vm337_vm0, %v1322_v47  ;;  %v1612_v4 = vmul.f32 1.442695, %v1610_v51 }
  0xc2   : >> { %2344 = vpow2.f32 %v1612_v4 }
  0xc3   : >> { %2346 = vpow2.f32 %v1614_v13 }
  0xc4   : >> { %v1418_v46 = vld [vmem:[#allocation3] sm:$0xff] }
  0xc5   : >> { %v1420_v59 = vadd.f32 %v2783_v49, %v1418_v46  ;;  %v2164_v49 = vld [vmem:[%s2662_s20 + $0xe0] sm:$0xff]  ;;  %s2482_s20 = smov 126  }
  0xc6   : >> { %v1707_v8 = vand.u32 2147483647, %v2164_v49 }
  0xc7   : >> { %1422 = vst.msk [vmem:[#allocation3] sm:$0xff] %vm337_vm0, %v1420_v59  ;;  %v1419_v62 = vld [vmem:[#allocation3 + $0x8] sm:$0xff] }
  0xc8   : >> { %v453_v0 = vpop.permute.xlu0 %452  ;;  %v1421_v63 = vadd.f32 %v2786_v52, %v1419_v62  ;;  %v1709_v18 = vsub.f32 %v1707_v8, %v3369_v26 }
  0xc9   : >> { %v460_v38 = vmul.f32 %v453_v0, %v2822_v11  ;;  %v458_v2 = vmul.f32 %v453_v0, %v2825_v12  ;;  %v462_v6 = vmul.f32 %v453_v0, %v2834_v21  ;;  %v464_v15 = vmul.f32 %v453_v0, %v2847_v34 }
  0xca   : >> { %1423 = vst.msk [vmem:[#allocation3 + $0x8] sm:$0xff] %vm337_vm0, %v1421_v63  ;;  %v1711_v25 = vmul.f32 1.442695, %v1709_v18 }
  0xcb   : >> { %478 = vrot.lane.b32.xlu0 %v460_v38, %s2481_s25  ;;  %474 = vrot.lane.b32.xlu1 %v458_v2, %s2481_s25  ;;  %v554_v29 = vpop.permute.xlu1 %553 }
  0xcc   : >> { %v455_v3 = vpop.permute.xlu0 %454  ;;  %v2910_v32 = vpop.eup %2344  ;;  %2348 = vpow2.f32 %v1711_v25  ;;  %v558_v36 = vmul.f32 %v554_v29, %v2837_v23  ;;  %v560_v47 = vmul.f32 %v554_v29, %v2850_v35  ;;  %v562_v55 = vmul.f32 %v554_v29, %v2861_v45 }
  0xcd   : >> { %v459_v52 = vmul.f32 %v455_v3, %v2837_v23  ;;  %v461_v16 = vmul.f32 %v455_v3, %v2850_v35  ;;  %v463_v24 = vmul.f32 %v455_v3, %v2861_v45  ;;  %v465_v31 = vmul.f32 %v455_v3, %v2871_v54  ;;  %v2918_v43 = vpop.eup %2346 }
  0xce   : >> { %v1517_v7 = vld [vmem:[#allocation3] sm:$0xff]  ;;  %2350 = vpow2.f32 %v1713_v40  ;;  %v564_v61 = vmul.f32 %v554_v29, %v2871_v54 }
  0xcf   : >> { %v1519_v9 = vadd.f32 %v2796_v56, %v1517_v7  ;;  %482 = vrot.lane.b32.xlu0 %v462_v6, %s2481_s25  ;;  %476 = vrot.lane.b32.xlu1 %v459_v52, %s2481_s25  ;;  %v653_v58 = vpop.permute.xlu1 %652 }
  0xd0   : >> { %v552_v10 = vpop.permute.xlu0 %551  ;;  %v657_v0 = vmul.f32 %v653_v58, %v2837_v23  ;;  %v659_v63 = vmul.f32 %v653_v58, %v2850_v35  ;;  %v661_v49 = vmul.f32 %v653_v58, %v2861_v45  ;;  %v663_v5 = vmul.f32 %v653_v58, %v2871_v54 }
  0xd1   : >> { %1521 = vst.msk [vmem:[#allocation3] sm:$0xff] %vm337_vm0, %v1519_v9  ;;  %v1518_v17 = vld [vmem:[#allocation3 + $0x8] sm:$0xff]  ;;  %v557_v56 = vmul.f32 %v552_v10, %v2825_v12  ;;  %v561_v37 = vmul.f32 %v552_v10, %v2834_v21  ;;  %v563_v22 = vmul.f32 %v552_v10, %v2847_v34 }
  0xd2   : >> { %v1520_v19 = vadd.f32 %v2790_v42, %v1518_v17  ;;  %v559_v42 = vmul.f32 %v552_v10, %v2822_v11 }
  0xd3   : >> { %486 = vrot.lane.b32.xlu0 %v464_v15, %s2481_s25  ;;  %480 = vrot.lane.b32.xlu1 %v461_v16, %s2481_s25  ;;  %v752_v4 = vpop.permute.xlu1 %751 }
  0xd4   : >> { %1522 = vst.msk [vmem:[#allocation3 + $0x8] sm:$0xff] %vm337_vm0, %v1520_v19  ;;  %v651_v44 = vpop.permute.xlu0 %650  ;;  %v756_v6 = vmul.f32 %v752_v4, %v2837_v23  ;;  %v758_v8 = vmul.f32 %v752_v4, %v2850_v35  ;;  %v760_v13 = vmul.f32 %v752_v4, %v2861_v45  ;;  %v762_v16 = vmul.f32 %v752_v4, %v2871_v54  ;;  %v444_v4 = vld [vmem:[#allocation2 + $0x10] sm:$0xff] }
  0xd5   : >> { %v656_v48 = vmul.f32 %v651_v44, %v2825_v12  ;;  %v658_v57 = vmul.f32 %v651_v44, %v2822_v11  ;;  %v660_v51 = vmul.f32 %v651_v44, %v2834_v21  ;;  %v662_v38 = vmul.f32 %v651_v44, %v2847_v34 }
  0xd6   : >> { %v2929_v50 = vpop.eup %2348 }
  0xd7   : >> { %484 = vrot.lane.b32.xlu1 %v463_v24, %s2481_s25  ;;  %573 = vrot.lane.b32.xlu0 %v557_v56, %s2482_s20  ;;  %v849_v7 = vpop.permute.xlu1 %848 }
  0xd8   : >> { %v1616_v30 = vld [vmem:[#allocation3] sm:$0xff]  ;;  %v2936_v60 = vpop.eup %2350  ;;  %v750_v1 = vpop.permute.xlu0 %749  ;;  %v854_v10 = vmul.f32 %v849_v7, %v2825_v12  ;;  %v856_v14 = vmul.f32 %v849_v7, %v2822_v11  ;;  %v858_v17 = vmul.f32 %v849_v7, %v2834_v21  ;;  %v860_v56 = vmul.f32 %v849_v7, %v2847_v34 }
  0xd9   : >> { %v1618_v39 = vadd.f32 %v2910_v32, %v1616_v30  ;;  %v755_v2 = vmul.f32 %v750_v1, %v2825_v12  ;;  %v757_v3 = vmul.f32 %v750_v1, %v2822_v11  ;;  %v759_v52 = vmul.f32 %v750_v1, %v2834_v21 }
  0xda   : >> { %v761_v9 = vmul.f32 %v750_v1, %v2847_v34 }
  0xdb   : >> { %488 = vrot.lane.b32.xlu1 %v465_v31, %s2481_s25  ;;  %577 = vrot.lane.b32.xlu0 %v559_v42, %s2482_s20  ;;  %v1617_v41 = vld [vmem:[#allocation3 + $0x8] sm:$0xff]  ;;  %1620 = vst.msk [vmem:[#allocation3] sm:$0xff] %vm337_vm0, %v1618_v39  ;;  %v950_v42 = vpop.permute.xlu1 %949  ;;  %s2493_s25 = smov 117  }
  0xdc   : >> { %v1619_v33 = vadd.f32 %v2918_v43, %v1617_v41  ;;  %v851_v15 = vpop.permute.xlu0 %850  ;;  %v956_v41 = vmul.f32 %v950_v42, %v2850_v35 }
  0xdd   : >> { %v855_v18 = vmul.f32 %v851_v15, %v2837_v23  ;;  %v857_v20 = vmul.f32 %v851_v15, %v2850_v35  ;;  %v859_v25 = vmul.f32 %v851_v15, %v2861_v45  ;;  %v861_v29 = vmul.f32 %v851_v15, %v2871_v54 }
  0xde   : >> { %1621 = vst.msk [vmem:[#allocation3 + $0x8] sm:$0xff] %vm337_vm0, %v1619_v33 }
  0xdf   : >> { %575 = vrot.lane.b32.xlu1 %v558_v36, %s2482_s20  ;;  %581 = vrot.lane.b32.xlu0 %v561_v37, %s2482_s20  ;;  %v1047_v30 = vpop.permute.xlu1 %1046  ;;  %v954_v36 = vmul.f32 %v950_v42, %v2837_v23 }
  0xe0   : >> { %v948_v19 = vpop.permute.xlu0 %947  ;;  %v1052_v44 = vmul.f32 %v1047_v30, %v2825_v12 }
  0xe1   : >> { %v953_v24 = vmul.f32 %v948_v19, %v2825_v12  ;;  %v955_v28 = vmul.f32 %v948_v19, %v2822_v11  ;;  %v957_v37 = vmul.f32 %v948_v19, %v2834_v21  ;;  %v959_v33 = vmul.f32 %v948_v19, %v2847_v34 }
  0xe2   : >> { %v1715_v53 = vld [vmem:[#allocation3] sm:$0xff] }
  0xe3   : >> { %579 = vrot.lane.b32.xlu1 %v560_v47, %s2482_s20  ;;  %585 = vrot.lane.b32.xlu0 %v563_v22, %s2482_s20  ;;  %v1717_v46 = vadd.f32 %v2929_v50, %v1715_v53  ;;  %v2968_v39 = vpop.permute.xlu1 %1147  ;;  %v958_v47 = vmul.f32 %v950_v42, %v2861_v45  ;;  %v960_v53 = vmul.f32 %v950_v42, %v2871_v54 }
  0xe4   : >> { %v1049_v31 = vpop.permute.xlu0 %1048 }
  0xe5   : >> { %1719 = vst.msk [vmem:[#allocation3] sm:$0xff] %vm337_vm0, %v1717_v46  ;;  %v1716_v59 = vld [vmem:[#allocation3 + $0x8] sm:$0xff]  ;;  %v1053_v46 = vmul.f32 %v1049_v31, %v2837_v23  ;;  %v1057_v1 = vmul.f32 %v1049_v31, %v2861_v45 }
  0xe6   : >> { %v1718_v62 = vadd.f32 %v2936_v60, %v1716_v59  ;;  %v1056_v59 = vmul.f32 %v1047_v30, %v2834_v21 }
  0xe7   : >> { %583 = vrot.lane.b32.xlu1 %v562_v55, %s2482_s20  ;;  %672 = vrot.lane.b32.xlu0 %v656_v48, %s2483_s26  ;;  %v2976_v22 = vpop.permute.xlu1 %1244  ;;  %v1054_v55 = vmul.f32 %v1047_v30, %v2822_v11 }
  0xe8   : >> { %1720 = vst.msk [vmem:[#allocation3 + $0x8] sm:$0xff] %vm337_vm0, %v1718_v62  ;;  %v2970_v40 = vpop.permute.xlu0 %1145  ;;  %v1055_v62 = vmul.f32 %v1049_v31, %v2850_v35 }
  0xe9   : >> { %v1155_v15 = vmul.f32 %v2970_v40, %v2834_v21 }
  0xeb   : >> { %587 = vrot.lane.b32.xlu1 %v564_v61, %s2482_s20  ;;  %676 = vrot.lane.b32.xlu0 %v658_v57, %s2483_s26  ;;  %v2983_v57 = vpop.permute.xlu1 %1345  ;;  %v1058_v61 = vmul.f32 %v1047_v30, %v2847_v34  ;;  %s2494_s20 = smov 116  }
  0xec   : >> { %v2978_v48 = vpop.permute.xlu0 %1246 }
  0xef   : >> { %674 = vrot.lane.b32.xlu1 %v657_v0, %s2483_s26  ;;  %680 = vrot.lane.b32.xlu0 %v660_v51, %s2483_s26  ;;  %v2990_v0 = vpop.permute.xlu1 %1442 }
  0xf0   : >> { %v2985_v58 = vpop.permute.xlu0 %1343 }
  0xf3   : >> { %678 = vrot.lane.b32.xlu1 %v659_v63, %s2483_s26  ;;  %684 = vrot.lane.b32.xlu0 %v662_v38, %s2483_s26  ;;  %v2996_v63 = vpop.permute.xlu1 %1543 }
  0xf4   : >> { %v2992_v51 = vpop.permute.xlu0 %1444 }
  0xf7   : >> { %682 = vrot.lane.b32.xlu1 %v661_v49, %s2483_s26  ;;  %771 = vrot.lane.b32.xlu0 %v755_v2, %s2484_s27  ;;  %v1059_v2 = vmul.f32 %v1049_v31, %v2871_v54  ;;  %v1151_v49 = vmul.f32 %v2970_v40, %v2825_v12 }
  0xf8   : >> { %v2998_v38 = vpop.permute.xlu0 %1541 }
  0xfb   : >> { %686 = vrot.lane.b32.xlu1 %v663_v5, %s2483_s26  ;;  %775 = vrot.lane.b32.xlu0 %v757_v3, %s2484_s27  ;;  %v442_v3 = vld [vmem:[#allocation2] sm:$0xff]  ;;  %s2495_s26 = smov 115  }
  0xff   : >> { %773 = vrot.lane.b32.xlu1 %v756_v6, %s2484_s27  ;;  %779 = vrot.lane.b32.xlu0 %v759_v52, %s2484_s27 }
 0x103   : >> { %777 = vrot.lane.b32.xlu1 %v758_v8, %s2484_s27  ;;  %783 = vrot.lane.b32.xlu0 %v761_v9, %s2484_s27  ;;  %v443_v8 = vld [vmem:[#allocation2 + $0x8] sm:$0xff]  ;;  %v446_v9 = vld [vmem:[#allocation2 + $0x20] sm:$0xff] }
 0x107   : >> { %781 = vrot.lane.b32.xlu1 %v760_v13, %s2484_s27  ;;  %870 = vrot.lane.b32.xlu0 %v854_v10, %s2485_s28 }
 0x10b   : >> { %785 = vrot.lane.b32.xlu1 %v762_v16, %s2484_s27  ;;  %874 = vrot.lane.b32.xlu0 %v856_v14, %s2485_s28  ;;  %v1152_v14 = vmul.f32 %v2968_v39, %v2837_v23  ;;  %s2172_s27 = sshll.u32 (%p350_p13), %s2442_s12, 10 }
 0x10c   : > { %s3296_s5 = scalar_lea.hbm (%p350_p13), %s3366_s2, %s2172_s27 }
 0x10f   : >> { %878 = vrot.lane.b32.xlu0 %v858_v17, %s2485_s28  ;;  %872 = vrot.lane.b32.xlu1 %v855_v18, %s2485_s28  ;;  %v448_v18 = vld [vmem:[#allocation2 + $0x30] sm:$0xff] }
 0x113   : >> { %882 = vrot.lane.b32.xlu0 %v860_v56, %s2485_s28  ;;  %876 = vrot.lane.b32.xlu1 %v857_v20, %s2485_s28  ;;  %v1154_v20 = vmul.f32 %v2968_v39, %v2850_v35 }
 0x117   : >> { %880 = vrot.lane.b32.xlu1 %v859_v25, %s2485_s28  ;;  %969 = vrot.lane.b32.xlu0 %v953_v24, %s2486_s29  ;;  %v1157_v24 = vmul.f32 %v2970_v40, %v2847_v34 }
 0x11b   : >> { %884 = vrot.lane.b32.xlu1 %v861_v29, %s2485_s28  ;;  %973 = vrot.lane.b32.xlu0 %v955_v28, %s2486_s29  ;;  %v447_v28 = vld [vmem:[#allocation2 + $0x28] sm:$0xff]  ;;  %s1845_s28 = sshll.u32 (%p350_p13), %s2585_s6, 4  ;;  %s3298_s28 = int_to_ptr.vmem [resolvable:$true] %s1845_s28 }
 0x11f   : >> { %971 = vrot.lane.b32.xlu1 %v954_v36, %s2486_s29  ;;  %977 = vrot.lane.b32.xlu0 %v957_v37, %s2486_s29  ;;  %v1156_v36 = vmul.f32 %v2968_v39, %v2861_v45 }
 0x123   : >> { %975 = vrot.lane.b32.xlu1 %v956_v41, %s2486_s29  ;;  %981 = vrot.lane.b32.xlu0 %v959_v33, %s2486_s29 }
 0x127   : >> { %979 = vrot.lane.b32.xlu1 %v958_v47, %s2486_s29  ;;  %1068 = vrot.lane.b32.xlu0 %v1052_v44, %s2487_s3 }
 0x12b   : >> { %983 = vrot.lane.b32.xlu1 %v960_v53, %s2486_s29  ;;  %1072 = vrot.lane.b32.xlu0 %v1054_v55, %s2487_s3  ;;  %v1158_v53 = vmul.f32 %v2968_v39, %v2871_v54  ;;  %v1250_v55 = vmul.f32 %v2976_v22, %v2825_v12  ;;  %v1252_v39 = vmul.f32 %v2976_v22, %v2822_v11  ;;  %s2356_s29 = scalar_lea.vmem (%p350_p13), %s3298_s28, 1024 }
 0x12c   : > { %p2357_p0 = scmp.ne.s32.totalorder (%p350_p13), %s3298_s28, %s2356_s29 }
 0x12e   : > { %p2358_p1 = pnand (%p350_p13), %p2357_p0, %p2555_p4 }
 0x12f   : >> { %1076 = vrot.lane.b32.xlu0 %v1056_v59, %s2487_s3  ;;  %1070 = vrot.lane.b32.xlu1 %v1053_v46, %s2487_s3 }
 0x130   : > { %p2359_p2 = pneg (%p350_p13), %p2358_p1 }
 0x133   : >> { %1080 = vrot.lane.b32.xlu0 %v1058_v61, %s2487_s3  ;;  %1074 = vrot.lane.b32.xlu1 %v1055_v62, %s2487_s3 }
 0x137   : >> { %1640 = vrot.lane.b32.xlu0 %v2910_v32, %s2488_s4  ;;  %1078 = vrot.lane.b32.xlu1 %v1057_v1, %s2487_s3  ;;  %v1153_v32 = vmul.f32 %v2970_v40, %v2822_v11  ;;  %v449_v40 = vld [vmem:[#allocation2 + $0x38] sm:$0xff] }
 0x13b   : >> { %1082 = vrot.lane.b32.xlu1 %v1059_v2, %s2487_s3  ;;  %1167 = vrot.lane.b32.xlu0 %v1151_v49, %s2489_s7  ;;  %s2497_s3 = smov (%p350_p13), [#allocation4]  }
 0x13d   : >> { %v475_v5 = vpop.permute.xlu1 %474  ;;  %v479_v6 = vpop.permute.xlu0 %478 }
 0x13e   : >> { %v498_v52 = vadd.f32 %v475_v5, %v442_v3  ;;  %v500_v7 = vadd.f32 %v479_v6, %v444_v4 }
 0x13f   : >> { %1642 = vrot.lane.b32.xlu1 %v2918_v43, %s2488_s4  ;;  %1171 = vrot.lane.b32.xlu0 %v1153_v32, %s2489_s7  ;;  %v445_v43 = vld [vmem:[#allocation2 + $0x18] sm:$0xff]  ;;  %v1254_v32 = vmul.f32 %v2976_v22, %v2834_v21  ;;  %s2360_s4 = sshll.u32 (%p350_p13), %s2497_s3, 4  ;;  %s2361_s4 = int_to_ptr.vmem [resolvable:$false] %s2360_s4 }
 0x140   : >> { %506 = vst.msk [vmem:[#allocation2] sm:$0xff] %vm337_vm0, %v498_v52  ;;  %508 = vst.msk [vmem:[#allocation2 + $0x10] sm:$0xff] %vm337_vm0, %v500_v7  ;;  %v1251_v52 = vmul.f32 %v2978_v48, %v2837_v23  ;;  %p2363_p3 = scmp.lt.s32.totalorder (%p350_p13), %s3298_s28, %s2361_s4 }
 0x141   : >> { %v477_v10 = vpop.permute.xlu1 %476  ;;  %v483_v13 = vpop.permute.xlu0 %482 }
 0x142   : >> { %v499_v16 = vadd.f32 %v477_v10, %v443_v8  ;;  %v502_v17 = vadd.f32 %v483_v13, %v446_v9 }
 0x143   : >> { %1169 = vrot.lane.b32.xlu1 %v1152_v14, %s2489_s7  ;;  %1175 = vrot.lane.b32.xlu0 %v1155_v15, %s2489_s7  ;;  %v1256_v14 = vmul.f32 %v2976_v22, %v2847_v34  ;;  %v1253_v15 = vmul.f32 %v2978_v48, %v2850_v35  ;;  %v1255_v22 = vmul.f32 %v2978_v48, %v2861_v45 }
 0x144   : >> { %507 = vst.msk [vmem:[#allocation2 + $0x8] sm:$0xff] %vm337_vm0, %v499_v16  ;;  %510 = vst.msk [vmem:[#allocation2 + $0x20] sm:$0xff] %vm337_vm0, %v502_v17 }
 0x145   : >> { %v481_v19 = vpop.permute.xlu1 %480  ;;  %v487_v56 = vpop.permute.xlu0 %486 }
 0x146   : >> { %v501_v25 = vadd.f32 %v481_v19, %v445_v43  ;;  %v504_v42 = vadd.f32 %v487_v56, %v448_v18 }
 0x147   : >> { %1173 = vrot.lane.b32.xlu1 %v1154_v20, %s2489_s7  ;;  %1179 = vrot.lane.b32.xlu0 %v1157_v24, %s2489_s7  ;;  %v541_v31 = vld [vmem:[#allocation2] sm:$0xff]  ;;  %v543_v47 = vld [vmem:[#allocation2 + $0x10] sm:$0xff]  ;;  %v1349_v20 = vmul.f32 %v2985_v58, %v2825_v12 }
 0x148   : >> { %509 = vst.msk [vmem:[#allocation2 + $0x18] sm:$0xff] %vm337_vm0, %v501_v25  ;;  %512 = vst.msk [vmem:[#allocation2 + $0x30] sm:$0xff] %vm337_vm0, %v504_v42 }
 0x149   : >> { %v485_v29 = vpop.permute.xlu1 %484  ;;  %v574_v30 = vpop.permute.xlu0 %573 }
 0x14a   : >> { %v503_v37 = vadd.f32 %v485_v29, %v447_v28  ;;  %v597_v41 = vadd.f32 %v574_v30, %v541_v31  ;;  %v1257_v31 = vmul.f32 %v2978_v48, %v2871_v54  ;;  %v1350_v48 = vmul.f32 %v2983_v57, %v2837_v23 }
 0x14b   : >> { %1177 = vrot.lane.b32.xlu1 %v1156_v36, %s2489_s7  ;;  %1739 = vrot.lane.b32.xlu0 %v2929_v50, %s2490_s8  ;;  %v542_v61 = vld [vmem:[#allocation2 + $0x8] sm:$0xff]  ;;  %v545_v1 = vld [vmem:[#allocation2 + $0x20] sm:$0xff]  ;;  %v1351_v36 = vmul.f32 %v2985_v58, %v2822_v11 }
 0x14c   : >> { %511 = vst.msk [vmem:[#allocation2 + $0x28] sm:$0xff] %vm337_vm0, %v503_v37  ;;  %605 = vst.msk [vmem:[#allocation2] sm:$0xff] %vm337_vm0, %v597_v41 }
 0x14d   : >> { %v489_v33 = vpop.permute.xlu1 %488  ;;  %v578_v44 = vpop.permute.xlu0 %577 }
 0x14e   : >> { %v505_v46 = vadd.f32 %v489_v33, %v449_v40  ;;  %v599_v59 = vadd.f32 %v578_v44, %v543_v47 }
 0x14f   : >> { %1181 = vrot.lane.b32.xlu1 %v1158_v53, %s2489_s7  ;;  %1266 = vrot.lane.b32.xlu0 %v1250_v55, %s2491_s15  ;;  %v544_v4 = vld [vmem:[#allocation2 + $0x18] sm:$0xff]  ;;  %v547_v6 = vld [vmem:[#allocation2 + $0x30] sm:$0xff]  ;;  %v1353_v53 = vmul.f32 %v2985_v58, %v2834_v21  ;;  %s2362_s7 = scalar_lea.vmem (%p350_p13), %s2361_s4, 2048 }
 0x150   : >> { %513 = vst.msk [vmem:[#allocation2 + $0x38] sm:$0xff] %vm337_vm0, %v505_v46  ;;  %607 = vst.msk [vmem:[#allocation2 + $0x10] sm:$0xff] %vm337_vm0, %v599_v59  ;;  %p2364_p5 = scmp.lt.s32.totalorder (%p350_p13), %s2362_s7, %s2356_s29 }
 0x151   : >> { %v576_v50 = vpop.permute.xlu1 %575  ;;  %v582_v62 = vpop.permute.xlu0 %581 }
 0x152   : >> { %v598_v2 = vadd.f32 %v576_v50, %v542_v61  ;;  %v601_v49 = vadd.f32 %v582_v62, %v545_v1  ;;  %v1352_v1 = vmul.f32 %v2983_v57, %v2850_v35  ;;  %p2365_p6 = por (%p350_p13), %p2364_p5, %p2363_p3 }
 0x153   : >> { %1741 = vrot.lane.b32.xlu1 %v2936_v60, %s2490_s8  ;;  %1270 = vrot.lane.b32.xlu0 %v1252_v39, %s2491_s15  ;;  %v546_v9 = vld [vmem:[#allocation2 + $0x28] sm:$0xff]  ;;  %v640_v13 = vld [vmem:[#allocation2] sm:$0xff]  ;;  %v1355_v39 = vmul.f32 %v2985_v58, %v2847_v34  ;;  %v1448_v58 = vmul.f32 %v2990_v0, %v2825_v12 }
 0x154   : >> { %606 = vst.msk [vmem:[#allocation2 + $0x8] sm:$0xff] %vm337_vm0, %v598_v2  ;;  %609 = vst.msk [vmem:[#allocation2 + $0x20] sm:$0xff] %vm337_vm0, %v601_v49  ;;  %p2366_p7 = pnand (%p350_p13), %p2365_p6, %p2359_p2 }
 0x155   : >> { %v580_v3 = vpop.permute.xlu1 %579  ;;  %v586_v5 = vpop.permute.xlu0 %585 }
 0x156   : >> { %v600_v7 = vadd.f32 %v580_v3, %v544_v4  ;;  %v603_v8 = vadd.f32 %v586_v5, %v547_v6 }
 0x157   : >> { %1274 = vrot.lane.b32.xlu0 %v1254_v32, %s2491_s15  ;;  %1268 = vrot.lane.b32.xlu1 %v1251_v52, %s2491_s15  ;;  %v548_v18 = vld [vmem:[#allocation2 + $0x38] sm:$0xff]  ;;  %v642_v56 = vld [vmem:[#allocation2 + $0x10] sm:$0xff]  ;;  %v1354_v32 = vmul.f32 %v2983_v57, %v2861_v45 }
 0x158   : >> { %608 = vst.msk [vmem:[#allocation2 + $0x18] sm:$0xff] %vm337_vm0, %v600_v7  ;;  %611 = vst.msk [vmem:[#allocation2 + $0x30] sm:$0xff] %vm337_vm0, %v603_v8 }
 0x159   : >> { %v584_v60 = vpop.permute.xlu1 %583  ;;  %v673_v10 = vpop.permute.xlu0 %672 }
 0x15a   : >> { %v602_v16 = vadd.f32 %v584_v60, %v546_v9  ;;  %v696_v17 = vadd.f32 %v673_v10, %v640_v13  ;;  %v1356_v13 = vmul.f32 %v2983_v57, %v2871_v54  ;;  %v1452_v57 = vmul.f32 %v2990_v0, %v2834_v21 }
 0x15b   : >> { %1278 = vrot.lane.b32.xlu0 %v1256_v14, %s2491_s15  ;;  %1272 = vrot.lane.b32.xlu1 %v1253_v15, %s2491_s15  ;;  %v641_v28 = vld [vmem:[#allocation2 + $0x8] sm:$0xff]  ;;  %v644_v30 = vld [vmem:[#allocation2 + $0x20] sm:$0xff]  ;;  %v1450_v14 = vmul.f32 %v2990_v0, %v2822_v11  ;;  %v1449_v11 = vmul.f32 %v2992_v51, %v2837_v23  ;;  %v1454_v21 = vmul.f32 %v2990_v0, %v2847_v34 }
 0x15c   : >> { %610 = vst.msk [vmem:[#allocation2 + $0x28] sm:$0xff] %vm337_vm0, %v602_v16  ;;  %704 = vst.msk [vmem:[#allocation2] sm:$0xff] %vm337_vm0, %v696_v17  ;;  %v1451_v23 = vmul.f32 %v2992_v51, %v2850_v35  ;;  %v1453_v34 = vmul.f32 %v2992_v51, %v2861_v45  ;;  %v1547_v35 = vmul.f32 %v2998_v38, %v2825_v12 }
 0x15d   : >> { %v588_v43 = vpop.permute.xlu1 %587  ;;  %v677_v19 = vpop.permute.xlu0 %676  ;;  %v1455_v12 = vmul.f32 %v2992_v51, %v2871_v54 }
 0x15e   : >> { %v604_v24 = vadd.f32 %v588_v43, %v548_v18  ;;  %v698_v25 = vadd.f32 %v677_v19, %v642_v56 }
 0x15f   : >> { %1276 = vrot.lane.b32.xlu1 %v1255_v22, %s2491_s15  ;;  %1365 = vrot.lane.b32.xlu0 %v1349_v20, %s2492_s18  ;;  %v643_v33 = vld [vmem:[#allocation2 + $0x18] sm:$0xff]  ;;  %v646_v47 = vld [vmem:[#allocation2 + $0x30] sm:$0xff] }
 0x160   : >> { %612 = vst.msk [vmem:[#allocation2 + $0x38] sm:$0xff] %vm337_vm0, %v604_v24  ;;  %706 = vst.msk [vmem:[#allocation2 + $0x10] sm:$0xff] %vm337_vm0, %v698_v25 }
 0x161   : >> { %v675_v42 = vpop.permute.xlu1 %674  ;;  %v681_v29 = vpop.permute.xlu0 %680 }
 0x162   : >> { %v697_v37 = vadd.f32 %v675_v42, %v641_v28  ;;  %v700_v41 = vadd.f32 %v681_v29, %v644_v30 }
 0x163   : >> { %1280 = vrot.lane.b32.xlu1 %v1257_v31, %s2491_s15  ;;  %1369 = vrot.lane.b32.xlu0 %v1351_v36, %s2492_s18  ;;  %v645_v50 = vld [vmem:[#allocation2 + $0x28] sm:$0xff]  ;;  %v739_v62 = vld [vmem:[#allocation2] sm:$0xff] }
 0x164   : >> { %705 = vst.msk [vmem:[#allocation2 + $0x8] sm:$0xff] %vm337_vm0, %v697_v37  ;;  %708 = vst.msk [vmem:[#allocation2 + $0x20] sm:$0xff] %vm337_vm0, %v700_v41 }
 0x165   : >> { %v679_v40 = vpop.permute.xlu1 %678  ;;  %v685_v44 = vpop.permute.xlu0 %684 }
 0x166   : >> { %v699_v55 = vadd.f32 %v679_v40, %v643_v33  ;;  %v702_v46 = vadd.f32 %v685_v44, %v646_v47  ;;  %v3131_v40 = vld [vmem:[%s2818_s24 + $0x20] sm:$0xff] }
 0x167   : >> { %1367 = vrot.lane.b32.xlu1 %v1350_v48, %s2492_s18  ;;  %1373 = vrot.lane.b32.xlu0 %v1353_v53, %s2492_s18  ;;  %v647_v4 = vld [vmem:[#allocation2 + $0x38] sm:$0xff]  ;;  %v741_v6 = vld [vmem:[#allocation2 + $0x10] sm:$0xff]  ;;  %v1549_v48 = vmul.f32 %v2998_v38, %v3131_v40 }
 0x168   : >> { %707 = vst.msk [vmem:[#allocation2 + $0x18] sm:$0xff] %vm337_vm0, %v699_v55  ;;  %710 = vst.msk [vmem:[#allocation2 + $0x30] sm:$0xff] %vm337_vm0, %v702_v46  ;;  %v3142_v46 = vld [vmem:[%s2818_s24 + $0x8] sm:$0xff] }
 0x169   : >> { %v683_v59 = vpop.permute.xlu1 %682  ;;  %v772_v61 = vpop.permute.xlu0 %771 }
 0x16a   : >> { %v701_v2 = vadd.f32 %v683_v59, %v645_v50  ;;  %v795_v49 = vadd.f32 %v772_v61, %v739_v62  ;;  %v3145_v59 = vld [vmem:[%s2818_s24 + $0x40] sm:$0xff]  ;;  %v1548_v62 = vmul.f32 %v2996_v63, %v3142_v46 }
 0x16b   : >> { %1371 = vrot.lane.b32.xlu1 %v1352_v1, %s2492_s18  ;;  %1377 = vrot.lane.b32.xlu0 %v1355_v39, %s2492_s18  ;;  %v740_v60 = vld [vmem:[#allocation2 + $0x8] sm:$0xff]  ;;  %v743_v10 = vld [vmem:[#allocation2 + $0x20] sm:$0xff]  ;;  %v1551_v1 = vmul.f32 %v2998_v38, %v3145_v59 }
 0x16c   : >> { %709 = vst.msk [vmem:[#allocation2 + $0x28] sm:$0xff] %vm337_vm0, %v701_v2  ;;  %803 = vst.msk [vmem:[#allocation2] sm:$0xff] %vm337_vm0, %v795_v49  ;;  %v3156_v49 = vld [vmem:[%s2818_s24 + $0x28] sm:$0xff] }
 0x16d   : >> { %v687_v3 = vpop.permute.xlu1 %686  ;;  %v776_v5 = vpop.permute.xlu0 %775 }
 0x16e   : >> { %v703_v52 = vadd.f32 %v687_v3, %v647_v4  ;;  %v797_v7 = vadd.f32 %v776_v5, %v741_v6  ;;  %v3159_v3 = vld [vmem:[%s2818_s24 + $0x60] sm:$0xff] }
 0x16f   : >> { %1375 = vrot.lane.b32.xlu1 %v1354_v32, %s2492_s18  ;;  %1464 = vrot.lane.b32.xlu0 %v1448_v58, %s2493_s25  ;;  %v742_v43 = vld [vmem:[#allocation2 + $0x18] sm:$0xff]  ;;  %v745_v19 = vld [vmem:[#allocation2 + $0x30] sm:$0xff]  ;;  %v1550_v58 = vmul.f32 %v2996_v63, %v3156_v49 }
 0x170   : >> { %711 = vst.msk [vmem:[#allocation2 + $0x38] sm:$0xff] %vm337_vm0, %v703_v52  ;;  %805 = vst.msk [vmem:[#allocation2 + $0x10] sm:$0xff] %vm337_vm0, %v797_v7  ;;  %v1553_v52 = vmul.f32 %v2998_v38, %v3159_v3 }
 0x171   : >> { %v774_v8 = vpop.permute.xlu1 %773  ;;  %v780_v9 = vpop.permute.xlu0 %779 }
 0x172   : >> { %v796_v15 = vadd.f32 %v774_v8, %v740_v60  ;;  %v799_v16 = vadd.f32 %v780_v9, %v743_v10  ;;  %v3170_v60 = vld [vmem:[%s2818_s24 + $0x48] sm:$0xff] }
 0x173   : >> { %1379 = vrot.lane.b32.xlu1 %v1356_v13, %s2492_s18  ;;  %1468 = vrot.lane.b32.xlu0 %v1450_v14, %s2493_s25  ;;  %v744_v24 = vld [vmem:[#allocation2 + $0x28] sm:$0xff]  ;;  %v838_v42 = vld [vmem:[#allocation2] sm:$0xff] }
 0x174   : >> { %804 = vst.msk [vmem:[#allocation2 + $0x8] sm:$0xff] %vm337_vm0, %v796_v15  ;;  %807 = vst.msk [vmem:[#allocation2 + $0x20] sm:$0xff] %vm337_vm0, %v799_v16  ;;  %v1552_v15 = vmul.f32 %v2996_v63, %v3170_v60 }
 0x175   : >> { %v778_v17 = vpop.permute.xlu1 %777  ;;  %v784_v18 = vpop.permute.xlu0 %783 }
 0x176   : >> { %v798_v56 = vadd.f32 %v778_v17, %v742_v43  ;;  %v801_v22 = vadd.f32 %v784_v18, %v745_v19  ;;  %v3179_v17 = vld [vmem:[%s2818_s24 + $0x68] sm:$0xff] }
 0x177   : >> { %1472 = vrot.lane.b32.xlu0 %v1452_v57, %s2493_s25  ;;  %1466 = vrot.lane.b32.xlu1 %v1449_v11, %s2493_s25  ;;  %v746_v31 = vld [vmem:[#allocation2 + $0x38] sm:$0xff]  ;;  %v840_v37 = vld [vmem:[#allocation2 + $0x10] sm:$0xff]  ;;  %v1554_v11 = vmul.f32 %v2996_v63, %v3179_v17 }
 0x178   : >> { %806 = vst.msk [vmem:[#allocation2 + $0x18] sm:$0xff] %vm337_vm0, %v798_v56  ;;  %809 = vst.msk [vmem:[#allocation2 + $0x30] sm:$0xff] %vm337_vm0, %v801_v22 }
 0x179   : >> { %v782_v20 = vpop.permute.xlu1 %781  ;;  %v871_v25 = vpop.permute.xlu0 %870 }
 0x17a   : >> { %v800_v28 = vadd.f32 %v782_v20, %v744_v24  ;;  %v894_v29 = vadd.f32 %v871_v25, %v838_v42 }
 0x17b   : >> { %1476 = vrot.lane.b32.xlu0 %v1454_v21, %s2493_s25  ;;  %1470 = vrot.lane.b32.xlu1 %v1451_v23, %s2493_s25  ;;  %v839_v45 = vld [vmem:[#allocation2 + $0x8] sm:$0xff]  ;;  %v842_v47 = vld [vmem:[#allocation2 + $0x20] sm:$0xff] }
 0x17c   : >> { %808 = vst.msk [vmem:[#allocation2 + $0x28] sm:$0xff] %vm337_vm0, %v800_v28  ;;  %902 = vst.msk [vmem:[#allocation2] sm:$0xff] %vm337_vm0, %v894_v29 }
 0x17d   : >> { %v786_v30 = vpop.permute.xlu1 %785  ;;  %v875_v36 = vpop.permute.xlu0 %874 }
 0x17e   : >> { %v802_v0 = vadd.f32 %v786_v30, %v746_v31  ;;  %v896_v41 = vadd.f32 %v875_v36, %v840_v37 }
 0x17f   : >> { %1474 = vrot.lane.b32.xlu1 %v1453_v34, %s2493_s25  ;;  %1563 = vrot.lane.b32.xlu0 %v1547_v35, %s2494_s20  ;;  %v841_v51 = vld [vmem:[#allocation2 + $0x18] sm:$0xff]  ;;  %v844_v61 = vld [vmem:[#allocation2 + $0x30] sm:$0xff] }
 0x180   : >> { %810 = vst.msk [vmem:[#allocation2 + $0x38] sm:$0xff] %vm337_vm0, %v802_v0  ;;  %904 = vst.msk [vmem:[#allocation2 + $0x10] sm:$0xff] %vm337_vm0, %v896_v41 }
 0x181   : >> { %v873_v33 = vpop.permute.xlu1 %872  ;;  %v879_v44 = vpop.permute.xlu0 %878 }
 0x182   : >> { %v895_v53 = vadd.f32 %v873_v33, %v839_v45  ;;  %v898_v55 = vadd.f32 %v879_v44, %v842_v47 }
 0x183   : >> { %1478 = vrot.lane.b32.xlu1 %v1455_v12, %s2493_s25  ;;  %1567 = vrot.lane.b32.xlu0 %v1549_v48, %s2494_s20  ;;  %v843_v5 = vld [vmem:[#allocation2 + $0x28] sm:$0xff]  ;;  %v937_v32 = vld [vmem:[#allocation2] sm:$0xff] }
 0x184   : >> { %903 = vst.msk [vmem:[#allocation2 + $0x8] sm:$0xff] %vm337_vm0, %v895_v53  ;;  %906 = vst.msk [vmem:[#allocation2 + $0x20] sm:$0xff] %vm337_vm0, %v898_v55 }
 0x185   : >> { %v877_v54 = vpop.permute.xlu1 %876  ;;  %v883_v50 = vpop.permute.xlu0 %882 }
 0x186   : >> { %v897_v39 = vadd.f32 %v877_v54, %v841_v51  ;;  %v900_v2 = vadd.f32 %v883_v50, %v844_v61 }
 0x187   : >> { %1565 = vrot.lane.b32.xlu1 %v1548_v62, %s2494_s20  ;;  %1571 = vrot.lane.b32.xlu0 %v1551_v1, %s2494_s20  ;;  %v845_v10 = vld [vmem:[#allocation2 + $0x38] sm:$0xff]  ;;  %v939_v14 = vld [vmem:[#allocation2 + $0x10] sm:$0xff]  ;;  %v1622_v1 = vld [vmem:[%s2818_s24] sm:$0xff]  ;;  %s2496_s24 = smov 114  }
 0x188   : >> { %905 = vst.msk [vmem:[#allocation2 + $0x18] sm:$0xff] %vm337_vm0, %v897_v39  ;;  %908 = vst.msk [vmem:[#allocation2 + $0x30] sm:$0xff] %vm337_vm0, %v900_v2 }
 0x189   : >> { %v881_v4 = vpop.permute.xlu1 %880  ;;  %v970_v6 = vpop.permute.xlu0 %969 }
 0x18a   : >> { %v899_v7 = vadd.f32 %v881_v4, %v843_v5  ;;  %v993_v8 = vadd.f32 %v970_v6, %v937_v32 }
 0x18b   : >> { %1569 = vrot.lane.b32.xlu1 %v1550_v58, %s2494_s20  ;;  %1575 = vrot.lane.b32.xlu0 %v1553_v52, %s2494_s20  ;;  %v938_v18 = vld [vmem:[#allocation2 + $0x8] sm:$0xff]  ;;  %v941_v57 = vld [vmem:[#allocation2 + $0x20] sm:$0xff] }
 0x18c   : >> { %907 = vst.msk [vmem:[#allocation2 + $0x28] sm:$0xff] %vm337_vm0, %v899_v7  ;;  %1001 = vst.msk [vmem:[#allocation2] sm:$0xff] %vm337_vm0, %v993_v8 }
 0x18d   : >> { %v885_v9 = vpop.permute.xlu1 %884  ;;  %v974_v13 = vpop.permute.xlu0 %973 }
 0x18e   : >> { %v901_v38 = vadd.f32 %v885_v9, %v845_v10  ;;  %v995_v16 = vadd.f32 %v974_v13, %v939_v14 }
 0x18f   : >> { %1573 = vrot.lane.b32.xlu1 %v1552_v15, %s2494_s20  ;;  %v940_v24 = vld [vmem:[#allocation2 + $0x18] sm:$0xff]  ;;  %v943_v42 = vld [vmem:[#allocation2 + $0x30] sm:$0xff] }
 0x190   : >> { %909 = vst.msk [vmem:[#allocation2 + $0x38] sm:$0xff] %vm337_vm0, %v901_v38  ;;  %1003 = vst.msk [vmem:[#allocation2 + $0x10] sm:$0xff] %vm337_vm0, %v995_v16 }
 0x191   : >> { %v972_v43 = vpop.permute.xlu1 %971  ;;  %v978_v19 = vpop.permute.xlu0 %977 }
 0x192   : >> { %v994_v56 = vadd.f32 %v972_v43, %v938_v18  ;;  %v997_v22 = vadd.f32 %v978_v19, %v941_v57 }
 0x193   : >> { %1577 = vrot.lane.b32.xlu1 %v1554_v11, %s2494_s20  ;;  %v942_v63 = vld [vmem:[#allocation2 + $0x28] sm:$0xff]  ;;  %v1036_v30 = vld [vmem:[#allocation2] sm:$0xff] }
 0x194   : >> { %1002 = vst.msk [vmem:[#allocation2 + $0x8] sm:$0xff] %vm337_vm0, %v994_v56  ;;  %1005 = vst.msk [vmem:[#allocation2 + $0x20] sm:$0xff] %vm337_vm0, %v997_v22 }
 0x195   : >> { %v976_v20 = vpop.permute.xlu1 %975  ;;  %v982_v25 = vpop.permute.xlu0 %981 }
 0x196   : >> { %v996_v21 = vadd.f32 %v976_v20, %v940_v24  ;;  %v999_v23 = vadd.f32 %v982_v25, %v943_v42 }
 0x197   : >> { %v944_v34 = vld [vmem:[#allocation2 + $0x38] sm:$0xff]  ;;  %v1038_v0 = vld [vmem:[#allocation2 + $0x10] sm:$0xff] }
 0x198   : >> { %1004 = vst.msk [vmem:[#allocation2 + $0x18] sm:$0xff] %vm337_vm0, %v996_v21  ;;  %1007 = vst.msk [vmem:[#allocation2 + $0x30] sm:$0xff] %vm337_vm0, %v999_v23 }
 0x199   : >> { %v980_v28 = vpop.permute.xlu1 %979  ;;  %v1069_v29 = vpop.permute.xlu0 %1068 }
 0x19a   : >> { %v998_v31 = vadd.f32 %v980_v28, %v942_v63  ;;  %v1092_v36 = vadd.f32 %v1069_v29, %v1036_v30 }
 0x19b   : >> { %v1037_v44 = vld [vmem:[#allocation2 + $0x8] sm:$0xff]  ;;  %v1040_v12 = vld [vmem:[#allocation2 + $0x20] sm:$0xff] }
 0x19c   : >> { %1006 = vst.msk [vmem:[#allocation2 + $0x28] sm:$0xff] %vm337_vm0, %v998_v31  ;;  %1100 = vst.msk [vmem:[#allocation2] sm:$0xff] %vm337_vm0, %v1092_v36 }
 0x19d   : >> { %v984_v37 = vpop.permute.xlu1 %983  ;;  %v1073_v35 = vpop.permute.xlu0 %1072 }
 0x19e   : >> { %v1000_v41 = vadd.f32 %v984_v37, %v944_v34  ;;  %v1094_v33 = vadd.f32 %v1073_v35, %v1038_v0 }
 0x19f   : >> { %v1039_v54 = vld [vmem:[#allocation2 + $0x18] sm:$0xff]  ;;  %v1042_v50 = vld [vmem:[#allocation2 + $0x30] sm:$0xff] }
 0x1a0   : >> { %1008 = vst.msk [vmem:[#allocation2 + $0x38] sm:$0xff] %vm337_vm0, %v1000_v41  ;;  %1102 = vst.msk [vmem:[#allocation2 + $0x10] sm:$0xff] %vm337_vm0, %v1094_v33 }
 0x1a1   : >> { %v1071_v45 = vpop.permute.xlu1 %1070  ;;  %v1077_v47 = vpop.permute.xlu0 %1076 }
 0x1a2   : >> { %v1093_v48 = vadd.f32 %v1071_v45, %v1037_v44  ;;  %v1096_v53 = vadd.f32 %v1077_v47, %v1040_v12 }
 0x1a3   : >> { %v1041_v2 = vld [vmem:[#allocation2 + $0x28] sm:$0xff]  ;;  %v1135_v8 = vld [vmem:[#allocation2] sm:$0xff] }
 0x1a4   : >> { %1101 = vst.msk [vmem:[#allocation2 + $0x8] sm:$0xff] %vm337_vm0, %v1093_v48  ;;  %1104 = vst.msk [vmem:[#allocation2 + $0x20] sm:$0xff] %vm337_vm0, %v1096_v53 }
 0x1a5   : >> { %v1075_v55 = vpop.permute.xlu1 %1074  ;;  %v1081_v51 = vpop.permute.xlu0 %1080 }
 0x1a6   : >> { %v1095_v61 = vadd.f32 %v1075_v55, %v1039_v54  ;;  %v1098_v62 = vadd.f32 %v1081_v51, %v1042_v50 }
 0x1a7   : >> { %v1043_v52 = vld [vmem:[#allocation2 + $0x38] sm:$0xff]  ;;  %v1137_v16 = vld [vmem:[#allocation2 + $0x10] sm:$0xff] }
 0x1a8   : >> { %1103 = vst.msk [vmem:[#allocation2 + $0x18] sm:$0xff] %vm337_vm0, %v1095_v61  ;;  %1106 = vst.msk [vmem:[#allocation2 + $0x30] sm:$0xff] %vm337_vm0, %v1098_v62 }
 0x1a9   : >> { %v1079_v39 = vpop.permute.xlu1 %1078  ;;  %v1641_v4 = vpop.permute.xlu0 %1640 }
 0x1aa   : >> { %v1097_v5 = vadd.f32 %v1079_v39, %v1041_v2  ;;  %v1646_v6 = vmul.f32 %v1641_v4, %v1622_v1  ;;  %v1648_v32 = vmul.f32 %v1641_v4, %v3131_v40  ;;  %v1650_v13 = vmul.f32 %v1641_v4, %v3145_v59 }
 0x1ab   : >> { %v1136_v19 = vld [vmem:[#allocation2 + $0x8] sm:$0xff]  ;;  %v1139_v11 = vld [vmem:[#allocation2 + $0x20] sm:$0xff]  ;;  %v1652_v56 = vmul.f32 %v1641_v4, %v3159_v3 }
 0x1ac   : >> { %1105 = vst.msk [vmem:[#allocation2 + $0x28] sm:$0xff] %vm337_vm0, %v1097_v5  ;;  %1662 = vrot.lane.b32.xlu0 %v1646_v6, %s2495_s26 }
 0x1ad   : >> { %v1083_v58 = vpop.permute.xlu1 %1082  ;;  %v1168_v7 = vpop.permute.xlu0 %1167 }
 0x1ae   : >> { %v1099_v9 = vadd.f32 %v1083_v58, %v1043_v52  ;;  %v1191_v10 = vadd.f32 %v1168_v7, %v1135_v8 }
 0x1af   : >> { %v1138_v42 = vld [vmem:[#allocation2 + $0x18] sm:$0xff]  ;;  %v1141_v23 = vld [vmem:[#allocation2 + $0x30] sm:$0xff] }
 0x1b0   : >> { %1107 = vst.msk [vmem:[#allocation2 + $0x38] sm:$0xff] %vm337_vm0, %v1099_v9  ;;  %1199 = vst.msk [vmem:[#allocation2] sm:$0xff] %vm337_vm0, %v1191_v10  ;;  %1666 = vrot.lane.b32.xlu0 %v1648_v32, %s2495_s26 }
 0x1b1   : >> { %v1643_v14 = vpop.permute.xlu1 %1642  ;;  %v1172_v15 = vpop.permute.xlu0 %1171 }
 0x1b2   : >> { %v1647_v38 = vmul.f32 %v1643_v14, %v3142_v46  ;;  %v1193_v43 = vadd.f32 %v1172_v15, %v1137_v16  ;;  %v1649_v22 = vmul.f32 %v1643_v14, %v3156_v49  ;;  %v1651_v28 = vmul.f32 %v1643_v14, %v3170_v60 }
 0x1b3   : >> { %v1140_v31 = vld [vmem:[#allocation2 + $0x28] sm:$0xff]  ;;  %v1653_v37 = vmul.f32 %v1643_v14, %v3179_v17 }
 0x1b4   : >> { %1664 = vrot.lane.b32.xlu1 %v1647_v38, %s2495_s26  ;;  %1670 = vrot.lane.b32.xlu0 %v1650_v13, %s2495_s26  ;;  %1201 = vst.msk [vmem:[#allocation2 + $0x10] sm:$0xff] %vm337_vm0, %v1193_v43 }
 0x1b5   : >> { %v1170_v18 = vpop.permute.xlu1 %1169  ;;  %v1176_v57 = vpop.permute.xlu0 %1175 }
 0x1b6   : >> { %v1192_v20 = vadd.f32 %v1170_v18, %v1136_v19  ;;  %v1195_v24 = vadd.f32 %v1176_v57, %v1139_v11 }
 0x1b7   : >> { %v1142_v33 = vld [vmem:[#allocation2 + $0x38] sm:$0xff]  ;;  %v1234_v44 = vld [vmem:[#allocation2] sm:$0xff] }
 0x1b8   : >> { %1200 = vst.msk [vmem:[#allocation2 + $0x8] sm:$0xff] %vm337_vm0, %v1192_v20  ;;  %1203 = vst.msk [vmem:[#allocation2 + $0x20] sm:$0xff] %vm337_vm0, %v1195_v24  ;;  %1668 = vrot.lane.b32.xlu1 %v1649_v22, %s2495_s26  ;;  %1674 = vrot.lane.b32.xlu0 %v1652_v56, %s2495_s26 }
 0x1b9   : >> { %v1174_v25 = vpop.permute.xlu1 %1173  ;;  %v1180_v21 = vpop.permute.xlu0 %1179 }
 0x1ba   : >> { %v1194_v63 = vadd.f32 %v1174_v25, %v1138_v42  ;;  %v1197_v29 = vadd.f32 %v1180_v21, %v1141_v23 }
 0x1bb   : >> { %v1236_v54 = vld [vmem:[#allocation2 + $0x10] sm:$0xff] }
 0x1bc   : >> { %1202 = vst.msk [vmem:[#allocation2 + $0x18] sm:$0xff] %vm337_vm0, %v1194_v63  ;;  %1205 = vst.msk [vmem:[#allocation2 + $0x30] sm:$0xff] %vm337_vm0, %v1197_v29  ;;  %1672 = vrot.lane.b32.xlu1 %v1651_v28, %s2495_s26 }
 0x1bd   : >> { %v1178_v30 = vpop.permute.xlu1 %1177  ;;  %v1740_v36 = vpop.permute.xlu0 %1739 }
 0x1be   : >> { %v1196_v34 = vadd.f32 %v1178_v30, %v1140_v31  ;;  %v1745_v35 = vmul.f32 %v1740_v36, %v1622_v1  ;;  %v1747_v0 = vmul.f32 %v1740_v36, %v3131_v40  ;;  %v1749_v48 = vmul.f32 %v1740_v36, %v3145_v59 }
 0x1bf   : >> { %v1235_v59 = vld [vmem:[#allocation2 + $0x8] sm:$0xff]  ;;  %v1238_v62 = vld [vmem:[#allocation2 + $0x20] sm:$0xff]  ;;  %v1751_v1 = vmul.f32 %v1740_v36, %v3159_v3 }
 0x1c0   : >> { %1204 = vst.msk [vmem:[#allocation2 + $0x28] sm:$0xff] %vm337_vm0, %v1196_v34  ;;  %1676 = vrot.lane.b32.xlu1 %v1653_v37, %s2495_s26  ;;  %1761 = vrot.lane.b32.xlu0 %v1745_v35, %s2496_s24 }
 0x1c1   : >> { %v1182_v41 = vpop.permute.xlu1 %1181  ;;  %v1267_v45 = vpop.permute.xlu0 %1266 }
 0x1c2   : >> { %v1198_v47 = vadd.f32 %v1182_v41, %v1142_v33  ;;  %v1290_v12 = vadd.f32 %v1267_v45, %v1234_v44 }
 0x1c3   : >> { %v1237_v5 = vld [vmem:[#allocation2 + $0x18] sm:$0xff]  ;;  %v1240_v32 = vld [vmem:[#allocation2 + $0x30] sm:$0xff] }
 0x1c4   : >> { %1206 = vst.msk [vmem:[#allocation2 + $0x38] sm:$0xff] %vm337_vm0, %v1198_v47  ;;  %1298 = vst.msk [vmem:[#allocation2] sm:$0xff] %vm337_vm0, %v1290_v12  ;;  %1765 = vrot.lane.b32.xlu0 %v1747_v0, %s2496_s24 }
 0x1c5   : >> { %v1742_v40 = vpop.permute.xlu1 %1741  ;;  %v1271_v53 = vpop.permute.xlu0 %1270 }
 0x1c6   : >> { %v1746_v55 = vmul.f32 %v1742_v40, %v3142_v46  ;;  %v1292_v51 = vadd.f32 %v1271_v53, %v1236_v54  ;;  %v1748_v39 = vmul.f32 %v1742_v40, %v3156_v49  ;;  %v1750_v58 = vmul.f32 %v1742_v40, %v3170_v60 }
 0x1c7   : >> { %v1239_v7 = vld [vmem:[#allocation2 + $0x28] sm:$0xff]  ;;  %v1752_v10 = vmul.f32 %v1742_v40, %v3179_v17 }
 0x1c8   : >> { %1763 = vrot.lane.b32.xlu1 %v1746_v55, %s2496_s24  ;;  %1769 = vrot.lane.b32.xlu0 %v1749_v48, %s2496_s24  ;;  %1300 = vst.msk [vmem:[#allocation2 + $0x10] sm:$0xff] %vm337_vm0, %v1292_v51 }
 0x1c9   : >> { %v1269_v50 = vpop.permute.xlu1 %1268  ;;  %v1275_v61 = vpop.permute.xlu0 %1274 }
 0x1ca   : >> { %v1291_v2 = vadd.f32 %v1269_v50, %v1235_v59  ;;  %v1294_v4 = vadd.f32 %v1275_v61, %v1238_v62 }
 0x1cb   : >> { %v1333_v9 = vld [vmem:[#allocation2] sm:$0xff]  ;;  %v1241_v15 = vld [vmem:[#allocation2 + $0x38] sm:$0xff] }
 0x1cc   : >> { %1299 = vst.msk [vmem:[#allocation2 + $0x8] sm:$0xff] %vm337_vm0, %v1291_v2  ;;  %1302 = vst.msk [vmem:[#allocation2 + $0x20] sm:$0xff] %vm337_vm0, %v1294_v4  ;;  %1767 = vrot.lane.b32.xlu1 %v1748_v39, %s2496_s24  ;;  %1773 = vrot.lane.b32.xlu0 %v1751_v1, %s2496_s24 }
 0x1cd   : >> { %v1273_v46 = vpop.permute.xlu1 %1272  ;;  %v1279_v6 = vpop.permute.xlu0 %1278 }
 0x1ce   : >> { %v1293_v52 = vadd.f32 %v1273_v46, %v1237_v5  ;;  %v1296_v3 = vadd.f32 %v1279_v6, %v1240_v32 }
 0x1cf   : >> { %v1335_v16 = vld [vmem:[#allocation2 + $0x10] sm:$0xff] }
 0x1d0   : >> { %1301 = vst.msk [vmem:[#allocation2 + $0x18] sm:$0xff] %vm337_vm0, %v1293_v52  ;;  %1304 = vst.msk [vmem:[#allocation2 + $0x30] sm:$0xff] %vm337_vm0, %v1296_v3  ;;  %1771 = vrot.lane.b32.xlu1 %v1750_v58, %s2496_s24 }
 0x1d1   : >> { %v1277_v49 = vpop.permute.xlu1 %1276  ;;  %v1366_v8 = vpop.permute.xlu0 %1365 }
 0x1d2   : >> { %v1295_v13 = vadd.f32 %v1277_v49, %v1239_v7  ;;  %v1389_v14 = vadd.f32 %v1366_v8, %v1333_v9 }
 0x1d3   : >> { %v1334_v17 = vld [vmem:[#allocation2 + $0x8] sm:$0xff]  ;;  %v1337_v11 = vld [vmem:[#allocation2 + $0x20] sm:$0xff] }
 0x1d4   : >> { %1303 = vst.msk [vmem:[#allocation2 + $0x28] sm:$0xff] %vm337_vm0, %v1295_v13  ;;  %1397 = vst.msk [vmem:[#allocation2] sm:$0xff] %vm337_vm0, %v1389_v14  ;;  %1775 = vrot.lane.b32.xlu1 %v1752_v10, %s2496_s24 }
 0x1d5   : >> { %v1281_v60 = vpop.permute.xlu1 %1280  ;;  %v1370_v38 = vpop.permute.xlu0 %1369 }
 0x1d6   : >> { %v1297_v43 = vadd.f32 %v1281_v60, %v1241_v15  ;;  %v1391_v18 = vadd.f32 %v1370_v38, %v1335_v16 }
 0x1d7   : >> { %v1336_v24 = vld [vmem:[#allocation2 + $0x18] sm:$0xff]  ;;  %v1339_v42 = vld [vmem:[#allocation2 + $0x30] sm:$0xff] }
 0x1d8   : >> { %1305 = vst.msk [vmem:[#allocation2 + $0x38] sm:$0xff] %vm337_vm0, %v1297_v43  ;;  %1399 = vst.msk [vmem:[#allocation2 + $0x10] sm:$0xff] %vm337_vm0, %v1391_v18 }
 0x1d9   : >> { %v1368_v19 = vpop.permute.xlu1 %1367  ;;  %v1374_v57 = vpop.permute.xlu0 %1373 }
 0x1da   : >> { %v1390_v56 = vadd.f32 %v1368_v19, %v1334_v17  ;;  %v1393_v22 = vadd.f32 %v1374_v57, %v1337_v11 }
 0x1db   : >> { %v1338_v63 = vld [vmem:[#allocation2 + $0x28] sm:$0xff]  ;;  %v1432_v30 = vld [vmem:[#allocation2] sm:$0xff] }
 0x1dc   : >> { %1398 = vst.msk [vmem:[#allocation2 + $0x8] sm:$0xff] %vm337_vm0, %v1390_v56  ;;  %1401 = vst.msk [vmem:[#allocation2 + $0x20] sm:$0xff] %vm337_vm0, %v1393_v22 }
 0x1dd   : >> { %v1372_v20 = vpop.permute.xlu1 %1371  ;;  %v1378_v25 = vpop.permute.xlu0 %1377 }
 0x1de   : >> { %v1392_v21 = vadd.f32 %v1372_v20, %v1336_v24  ;;  %v1395_v23 = vadd.f32 %v1378_v25, %v1339_v42 }
 0x1df   : >> { %v1340_v34 = vld [vmem:[#allocation2 + $0x38] sm:$0xff]  ;;  %v1434_v0 = vld [vmem:[#allocation2 + $0x10] sm:$0xff] }
 0x1e0   : >> { %1400 = vst.msk [vmem:[#allocation2 + $0x18] sm:$0xff] %vm337_vm0, %v1392_v21  ;;  %1403 = vst.msk [vmem:[#allocation2 + $0x30] sm:$0xff] %vm337_vm0, %v1395_v23 }
 0x1e1   : >> { %v1376_v28 = vpop.permute.xlu1 %1375  ;;  %v1465_v29 = vpop.permute.xlu0 %1464 }
 0x1e2   : >> { %v1394_v31 = vadd.f32 %v1376_v28, %v1338_v63  ;;  %v1488_v36 = vadd.f32 %v1465_v29, %v1432_v30 }
 0x1e3   : >> { %v1433_v44 = vld [vmem:[#allocation2 + $0x8] sm:$0xff]  ;;  %v1436_v12 = vld [vmem:[#allocation2 + $0x20] sm:$0xff] }
 0x1e4   : >> { %1402 = vst.msk [vmem:[#allocation2 + $0x28] sm:$0xff] %vm337_vm0, %v1394_v31  ;;  %1496 = vst.msk [vmem:[#allocation2] sm:$0xff] %vm337_vm0, %v1488_v36 }
 0x1e5   : >> { %v1380_v37 = vpop.permute.xlu1 %1379  ;;  %v1469_v35 = vpop.permute.xlu0 %1468 }
 0x1e6   : >> { %v1396_v41 = vadd.f32 %v1380_v37, %v1340_v34  ;;  %v1490_v33 = vadd.f32 %v1469_v35, %v1434_v0 }
 0x1e7   : >> { %v1435_v55 = vld [vmem:[#allocation2 + $0x18] sm:$0xff]  ;;  %v1438_v51 = vld [vmem:[#allocation2 + $0x30] sm:$0xff] }
 0x1e8   : >> { %1404 = vst.msk [vmem:[#allocation2 + $0x38] sm:$0xff] %vm337_vm0, %v1396_v41  ;;  %1498 = vst.msk [vmem:[#allocation2 + $0x10] sm:$0xff] %vm337_vm0, %v1490_v33 }
 0x1e9   : >> { %v1467_v45 = vpop.permute.xlu1 %1466  ;;  %v1473_v47 = vpop.permute.xlu0 %1472 }
 0x1ea   : >> { %v1489_v48 = vadd.f32 %v1467_v45, %v1433_v44  ;;  %v1492_v40 = vadd.f32 %v1473_v47, %v1436_v12 }
 0x1eb   : >> { %v1437_v62 = vld [vmem:[#allocation2 + $0x28] sm:$0xff]  ;;  %v1531_v39 = vld [vmem:[#allocation2] sm:$0xff] }
 0x1ec   : >> { %1497 = vst.msk [vmem:[#allocation2 + $0x8] sm:$0xff] %vm337_vm0, %v1489_v48  ;;  %1500 = vst.msk [vmem:[#allocation2 + $0x20] sm:$0xff] %vm337_vm0, %v1492_v40 }
 0x1ed   : >> { %v1471_v53 = vpop.permute.xlu1 %1470  ;;  %v1477_v54 = vpop.permute.xlu0 %1476 }
 0x1ee   : >> { %v1491_v50 = vadd.f32 %v1471_v53, %v1435_v55  ;;  %v1494_v59 = vadd.f32 %v1477_v54, %v1438_v51 }
 0x1ef   : >> { %v1439_v5 = vld [vmem:[#allocation2 + $0x38] sm:$0xff]  ;;  %v1533_v32 = vld [vmem:[#allocation2 + $0x10] sm:$0xff] }
 0x1f0   : >> { %1499 = vst.msk [vmem:[#allocation2 + $0x18] sm:$0xff] %vm337_vm0, %v1491_v50  ;;  %1502 = vst.msk [vmem:[#allocation2 + $0x30] sm:$0xff] %vm337_vm0, %v1494_v59 }
 0x1f1   : >> { %v1475_v61 = vpop.permute.xlu1 %1474  ;;  %v1564_v1 = vpop.permute.xlu0 %1563 }
 0x1f2   : >> { %v1493_v2 = vadd.f32 %v1475_v61, %v1437_v62  ;;  %v1587_v4 = vadd.f32 %v1564_v1, %v1531_v39 }
 0x1f3   : >> { %v1532_v49 = vld [vmem:[#allocation2 + $0x8] sm:$0xff]  ;;  %v1535_v8 = vld [vmem:[#allocation2 + $0x20] sm:$0xff] }
 0x1f4   : >> { %1501 = vst.msk [vmem:[#allocation2 + $0x28] sm:$0xff] %vm337_vm0, %v1493_v2  ;;  %1595 = vst.msk [vmem:[#allocation2] sm:$0xff] %vm337_vm0, %v1587_v4 }
 0x1f5   : >> { %v1479_v46 = vpop.permute.xlu1 %1478  ;;  %v1568_v6 = vpop.permute.xlu0 %1567 }
 0x1f6   : >> { %v1495_v58 = vadd.f32 %v1479_v46, %v1439_v5  ;;  %v1589_v52 = vadd.f32 %v1568_v6, %v1533_v32 }
 0x1f7   : >> { %v1534_v14 = vld [vmem:[#allocation2 + $0x18] sm:$0xff]  ;;  %v1537_v15 = vld [vmem:[#allocation2 + $0x30] sm:$0xff] }
 0x1f8   : >> { %1503 = vst.msk [vmem:[#allocation2 + $0x38] sm:$0xff] %vm337_vm0, %v1495_v58  ;;  %1597 = vst.msk [vmem:[#allocation2 + $0x10] sm:$0xff] %vm337_vm0, %v1589_v52 }
 0x1f9   : >> { %v1566_v3 = vpop.permute.xlu1 %1565  ;;  %v1572_v7 = vpop.permute.xlu0 %1571 }
 0x1fa   : >> { %v1588_v9 = vadd.f32 %v1566_v3, %v1532_v49  ;;  %v1591_v10 = vadd.f32 %v1572_v7, %v1535_v8 }
 0x1fb   : >> { %v1536_v18 = vld [vmem:[#allocation2 + $0x28] sm:$0xff]  ;;  %v1630_v22 = vld [vmem:[#allocation2] sm:$0xff] }
 0x1fc   : >> { %1596 = vst.msk [vmem:[#allocation2 + $0x8] sm:$0xff] %vm337_vm0, %v1588_v9  ;;  %1599 = vst.msk [vmem:[#allocation2 + $0x20] sm:$0xff] %vm337_vm0, %v1591_v10  ;;  %v1801_v9 = vld [vmem:[#allocation3] sm:$0xff] (%p350_p13)  ;;  %v1802_v10 = vld [vmem:[#allocation3 + $0x8] sm:$0xff] (%p350_p13) }
 0x1fd   : >> { %v1570_v13 = vpop.permute.xlu1 %1569  ;;  %v1576_v60 = vpop.permute.xlu0 %1575  ;;  %2352 = vrcp.f32 (%p350_p13), %v1801_v9 }
 0x1fe   : >> { %v1590_v38 = vadd.f32 %v1570_v13, %v1534_v14  ;;  %v1593_v16 = vadd.f32 %v1576_v60, %v1537_v15  ;;  %2354 = vrcp.f32 (%p350_p13), %v1802_v10 }
 0x1ff   : >> { %v1538_v57 = vld [vmem:[#allocation2 + $0x38] sm:$0xff]  ;;  %v1632_v25 = vld [vmem:[#allocation2 + $0x10] sm:$0xff] }
 0x200   : >> { %1598 = vst.msk [vmem:[#allocation2 + $0x18] sm:$0xff] %vm337_vm0, %v1590_v38  ;;  %1601 = vst.msk [vmem:[#allocation2 + $0x30] sm:$0xff] %vm337_vm0, %v1593_v16 }
 0x201   : >> { %v1574_v43 = vpop.permute.xlu1 %1573 }
 0x202   : >> { %v1592_v19 = vadd.f32 %v1574_v43, %v1536_v18 }
 0x203   : >> { %v1631_v23 = vld [vmem:[#allocation2 + $0x8] sm:$0xff]  ;;  %v1634_v63 = vld [vmem:[#allocation2 + $0x20] sm:$0xff] }
 0x204   : >> { %1600 = vst.msk [vmem:[#allocation2 + $0x28] sm:$0xff] %vm337_vm0, %v1592_v19 }
 0x205   : >> { %v1578_v17 = vpop.permute.xlu1 %1577 }
 0x206   : >> { %v1594_v11 = vadd.f32 %v1578_v17, %v1538_v57 }
 0x207   : >> { %v1633_v36 = vld [vmem:[#allocation2 + $0x18] sm:$0xff]  ;;  %v1636_v34 = vld [vmem:[#allocation2 + $0x30] sm:$0xff]  ;;  %v2353_v26 = vpop.eup (%p350_p13), %2352 }
 0x208   : >> { %1602 = vst.msk [vmem:[#allocation2 + $0x38] sm:$0xff] %vm337_vm0, %v1594_v11  ;;  %v2355_v27 = vpop.eup (%p350_p13), %2354 }
 0x20b   : >> { %v1635_v33 = vld [vmem:[#allocation2 + $0x28] sm:$0xff] }
 0x20f   : >> { %v1637_v47 = vld [vmem:[#allocation2 + $0x38] sm:$0xff] }
 0x21e   : >> { %v1663_v56 = vpop.permute.xlu0 %1662 }
 0x21f   : >> { %v1686_v20 = vadd.f32 %v1663_v56, %v1630_v22 }
 0x221   : >> { %1694 = vst.msk [vmem:[#allocation2] sm:$0xff] %vm337_vm0, %v1686_v20 }
 0x222   : >> { %v1667_v24 = vpop.permute.xlu0 %1666 }
 0x223   : >> { %v1688_v42 = vadd.f32 %v1667_v24, %v1632_v25 }
 0x225   : >> { %1696 = vst.msk [vmem:[#allocation2 + $0x10] sm:$0xff] %vm337_vm0, %v1688_v42 }
 0x226   : >> { %v1665_v21 = vpop.permute.xlu1 %1664  ;;  %v1671_v28 = vpop.permute.xlu0 %1670 }
 0x227   : >> { %v1687_v29 = vadd.f32 %v1665_v21, %v1631_v23  ;;  %v1690_v30 = vadd.f32 %v1671_v28, %v1634_v63 }
 0x228   : >> { %v1729_v48 = vld [vmem:[#allocation2] sm:$0xff] }
 0x229   : >> { %1695 = vst.msk [vmem:[#allocation2 + $0x8] sm:$0xff] %vm337_vm0, %v1687_v29  ;;  %1698 = vst.msk [vmem:[#allocation2 + $0x20] sm:$0xff] %vm337_vm0, %v1690_v30 }
 0x22a   : >> { %v1669_v31 = vpop.permute.xlu1 %1668  ;;  %v1675_v37 = vpop.permute.xlu0 %1674 }
 0x22b   : >> { %v1689_v35 = vadd.f32 %v1669_v31, %v1633_v36  ;;  %v1692_v0 = vadd.f32 %v1675_v37, %v1636_v34 }
 0x22c   : >> { %v1731_v54 = vld [vmem:[#allocation2 + $0x10] sm:$0xff] }
 0x22d   : >> { %1697 = vst.msk [vmem:[#allocation2 + $0x18] sm:$0xff] %vm337_vm0, %v1689_v35  ;;  %1700 = vst.msk [vmem:[#allocation2 + $0x30] sm:$0xff] %vm337_vm0, %v1692_v0 }
 0x22e   : >> { %v1673_v41 = vpop.permute.xlu1 %1672 }
 0x22f   : >> { %v1691_v45 = vadd.f32 %v1673_v41, %v1635_v33 }
 0x230   : >> { %v1730_v59 = vld [vmem:[#allocation2 + $0x8] sm:$0xff]  ;;  %v1733_v62 = vld [vmem:[#allocation2 + $0x20] sm:$0xff] }
 0x231   : >> { %1699 = vst.msk [vmem:[#allocation2 + $0x28] sm:$0xff] %vm337_vm0, %v1691_v45 }
 0x232   : >> { %v1677_v44 = vpop.permute.xlu1 %1676  ;;  %v1762_v12 = vpop.permute.xlu0 %1761 }
 0x233   : >> { %v1693_v40 = vadd.f32 %v1677_v44, %v1637_v47  ;;  %v1785_v53 = vadd.f32 %v1762_v12, %v1729_v48 }
 0x234   : >> { %v1732_v4 = vld [vmem:[#allocation2 + $0x18] sm:$0xff]  ;;  %v1735_v5 = vld [vmem:[#allocation2 + $0x30] sm:$0xff] }
 0x235   : >> { %1701 = vst.msk [vmem:[#allocation2 + $0x38] sm:$0xff] %vm337_vm0, %v1693_v40  ;;  %1793 = vst.msk [vmem:[#allocation2] sm:$0xff] %vm337_vm0, %v1785_v53 }
 0x236   : >> { %v1766_v55 = vpop.permute.xlu0 %1765 }
 0x237   : >> { %v1787_v51 = vadd.f32 %v1766_v55, %v1731_v54 }
 0x238   : >> { %v1734_v52 = vld [vmem:[#allocation2 + $0x28] sm:$0xff] }
 0x239   : >> { %1795 = vst.msk [vmem:[#allocation2 + $0x10] sm:$0xff] %vm337_vm0, %v1787_v51 }
 0x23a   : >> { %v1764_v50 = vpop.permute.xlu1 %1763  ;;  %v1770_v61 = vpop.permute.xlu0 %1769 }
 0x23b   : >> { %v1786_v1 = vadd.f32 %v1764_v50, %v1730_v59  ;;  %v1789_v39 = vadd.f32 %v1770_v61, %v1733_v62 }
 0x23c   : >> { %v1736_v7 = vld [vmem:[#allocation2 + $0x38] sm:$0xff]  ;;  %v1805_v13 = vld [vmem:[#allocation2] sm:$0xff] (%p350_p13) }
 0x23d   : >> { %1794 = vst.msk [vmem:[#allocation2 + $0x8] sm:$0xff] %vm337_vm0, %v1786_v1  ;;  %1797 = vst.msk [vmem:[#allocation2 + $0x20] sm:$0xff] %vm337_vm0, %v1789_v39  ;;  %v1813_v19 = vmul.f32 (%p350_p13), %v2353_v26, %v1805_v13 }
 0x23e   : >> { %v1768_v2 = vpop.permute.xlu1 %1767  ;;  %v1774_v46 = vpop.permute.xlu0 %1773 }
 0x23f   : >> { %v1788_v6 = vadd.f32 %v1768_v2, %v1732_v4  ;;  %v1791_v32 = vadd.f32 %v1774_v46, %v1735_v5  ;;  %1821 = vst.msk [vmem:[%s2585_s6] sm:$0xff] (%p350_p13), %vm337_vm0, %v1813_v19 }
 0x240   : > { %v1807_v60 = vld [vmem:[#allocation2 + $0x10] sm:$0xff] (%p350_p13) }
 0x241   : >> { %1796 = vst.msk [vmem:[#allocation2 + $0x18] sm:$0xff] %vm337_vm0, %v1788_v6  ;;  %1799 = vst.msk [vmem:[#allocation2 + $0x30] sm:$0xff] %vm337_vm0, %v1791_v32  ;;  %v1815_v17 = vmul.f32 (%p350_p13), %v2353_v26, %v1807_v60 }
 0x242   : >> { %v1772_v58 = vpop.permute.xlu1 %1771 }
 0x243   : >> { %v1790_v3 = vadd.f32 %v1772_v58, %v1734_v52  ;;  %352 = sbr.rel (!%p350_p13) target bundleno = 65 (0x41), region = 122  ;;  %1823 = vst.msk [vmem:[%s2585_s6 + $0x10] sm:$0xff] (%p350_p13), %vm337_vm0, %v1815_v17 }
 0x244   : > { %v1806_v14 = vld [vmem:[#allocation2 + $0x8] sm:$0xff] (%p350_p13)  ;;  %v1809_v15 = vld [vmem:[#allocation2 + $0x20] sm:$0xff] (%p350_p13) }
 0x245   : >> { %1798 = vst.msk [vmem:[#allocation2 + $0x28] sm:$0xff] %vm337_vm0, %v1790_v3  ;;  %v1817_v57 = vmul.f32 (%p350_p13), %v2353_v26, %v1809_v15  ;;  %v1814_v56 = vmul.f32 (%p350_p13), %v2355_v27, %v1806_v14 }
 0x246   : >> { %v1776_v49 = vpop.permute.xlu1 %1775 }
 0x247   : >> { %v1792_v8 = vadd.f32 %v1776_v49, %v1736_v7  ;;  %1825 = vst.msk [vmem:[%s2585_s6 + $0x20] sm:$0xff] (%p350_p13), %vm337_vm0, %v1817_v57  ;;  %1822 = vst.msk [vmem:[%s2585_s6 + $0x8] sm:$0xff] (%p350_p13), %vm337_vm0, %v1814_v56 }
 0x248   : > { %v1811_v38 = vld [vmem:[#allocation2 + $0x30] sm:$0xff] (%p350_p13)  ;;  %v1808_v16 = vld [vmem:[#allocation2 + $0x18] sm:$0xff] (%p350_p13) }
 0x249   : >> { %1800 = vst.msk [vmem:[#allocation2 + $0x38] sm:$0xff] %vm337_vm0, %v1792_v8  ;;  %v1819_v11 = vmul.f32 (%p350_p13), %v2353_v26, %v1811_v38  ;;  %v1816_v22 = vmul.f32 (%p350_p13), %v2355_v27, %v1808_v16 }
 0x24b   : > { %1827 = vst.msk [vmem:[%s2585_s6 + $0x30] sm:$0xff] %vm337_vm0, %v1819_v11  ;;  %1824 = vst.msk [vmem:[%s2585_s6 + $0x18] sm:$0xff] %vm337_vm0, %v1816_v22 }
 0x24c   : > { %v1810_v43 = vld [vmem:[#allocation2 + $0x28] sm:$0xff] }
 0x24d   : > { %v1818_v20 = vmul.f32 %v2355_v27, %v1810_v43 }
 0x24f   : > { %1826 = vst.msk [vmem:[%s2585_s6 + $0x28] sm:$0xff] %vm337_vm0, %v1818_v20 }
 0x250   : > { %v1812_v18 = vld [vmem:[#allocation2 + $0x38] sm:$0xff] }
 0x251   : > { %v1820_v24 = vmul.f32 %v2355_v27, %v1812_v18 }
 0x253   : > { %1828 = vst.msk [vmem:[%s2585_s6 + $0x38] sm:$0xff] %vm337_vm0, %v1820_v24 }
 0x254   : > { %2369 = shalt.err (!%p2366_p7)
}
 0x255   : > { %s2370_s23 = scalar_lea.hbm %s3296_s5, 1024  ;;  %s2374_s15 = scalar_lea.hbm %s3366_s2, 2048 }
 0x256   : > { %p2371_p9 = scmp.ne.s32.totalorder %s3296_s5, %s2370_s23  ;;  %p2375_p12 = scmp.lt.u32.totalorder %s3296_s5, %s3366_s2 }
 0x257   : > { %p2376_p13 = scmp.lt.u32.totalorder %s2374_s15, %s2370_s23  ;;  %p2378_p1 = scmp.lt.u32.totalorder %s2370_s23, %s3296_s5 }
 0x258   : > { %p2372_p10 = pnand %p2371_p9, %p2555_p4 }
 0x259   : > { %p2377_p0 = por %p2376_p13, %p2375_p12 }
 0x25a   : > { %p2373_p11 = pneg %p2372_p10 }
 0x25b   : > { %p2379_p2 = por %p2378_p1, %p2377_p0 }
 0x25d   : > { %p2380_p3 = pnand %p2379_p2, %p2373_p11 }
 0x25f   : > { %2383 = shalt.err (!%p2380_p3)
}
 0x260   : > { %s2498_s20 = smov 128   ;;  %s2499_s26 = smov 8  }
 0x261   : > { %2174 = dma.vmem_to_hbm [thread:$0]  (%p2555_p4), %s3298_s28, 1024, %s3296_s5, %s3318_s16, %s2498_s20, %s2498_s20, %s2499_s26  }
 0x262 PF: > { %p2180_p5 = scmp.ge.s32.totalorder %s2450_s14, 2  ;;  %s1860_s24 = sand.u32 1, %s2430_s9  }
 0x263   : > { %s1861_s27 = scalar_lea.sflag [#allocation5], %s1860_s24 }
 0x264   : > { %p2177_p6 = pnand %p2180_p5, %p2562_p8 }
 0x266   : > { %2425 = dma.done.wait (!%p2177_p6), %s1861_s27, 1024  }
 0x267   : > { %2427 = vsyncadd (!%p2177_p6), %s1861_s27, 4294966272  ;;  %s15_s14 = sadd.s32 1, %s2450_s14   ;;  %s3373_s9 = smov %s2434_s10 }
 0x268   : > { %p12_p7 = scmp.ge.s32.totalorder %s15_s14, 4   ;;  %s3374_s10 = smov %s2438_s11 }
 0x269   : > { %s3375_s11 = smov %s2568_s22  ;;  %s3376_s12 = smov %s2446_s13 }
 0x26a   : > { %s3377_s13 = smov %s3379_s17  ;;  %14 = sbr.rel (!%p12_p7) target bundleno = 4 (0x4), region = 133 }
 0x271   :  { %1866 = vsyncpa [#allocation5], 1 }
 0x272   :  { %1868 = vsyncpa [#allocation5 + $0x1], 1 }

</bundles_post_ra>
